<compile_context>
chip_gen: v5e
topology: v5e:2x2
jax: 0.10.0
libtpu: 0.0.40
codegen_flags: <defaults>
</compile_context>

<pallas_src>
import numpy as np
import jax
import jax.numpy as jnp
from jax.experimental import pallas as pl
from jax.experimental.pallas import tpu as pltpu


def mixed_lora_kernel(block_adapter_ref,                       # scalar prefetch (SMEM, int32)
                      x_ref, w_ref, bias_ref, a_ref, b_ref,    # VMEM tiles
                      scaling_ref,                             # SMEM (num_adapters,) f32
                      o_ref,                                   # VMEM output tile
                      acc_ref, xa_ref):                        # VMEM scratch
    # All pallas index queries at top level (never inside a pl.when body).
    i = pl.program_id(0)
    k = pl.program_id(2)
    nk = pl.num_programs(2)

    # Per-token-block adapter id and its LoRA scaling (cheap scalar SMEM reads).
    a_id = block_adapter_ref[i]
    scale = scaling_ref[a_id]

    @pl.when(k == 0)
    def _init():
        # Fold the bias into the accumulator init (saves a (tm, tn) add in the tail).
        acc_ref[...] = jnp.broadcast_to(bias_ref[...], acc_ref.shape)
        xa_ref[...] = jnp.zeros_like(xa_ref)

    x = x_ref[...]                                             # (tm, tk) compute dtype

    # Base linear partial: (tm, tk) @ (tk, tn) -> f32 accumulate.
    acc_ref[...] += jnp.dot(x, w_ref[...], preferred_element_type=jnp.float32)

    # LoRA down-projection partial. Recomputed for every output-column block j (cheap, ~R/tn
    # extra flops) so there is no cross-j carry and j can be a "parallel" grid axis.
    # A tile is (R, tk), lane-dense; contract x's last dim against A-tile's last dim.
    xa_ref[...] += jax.lax.dot_general(
        x, a_ref[0],
        dimension_numbers=(((1,), (1,)), ((), ())),
        preferred_element_type=jnp.float32)

    @pl.when(k == nk - 1)
    def _finalize():
        # Scale the small (tm, R) xa instead of the (tm, tn) lora result.
        xa_scaled = (xa_ref[...] * scale).astype(b_ref.dtype)
        lora = jnp.dot(xa_scaled, b_ref[0], preferred_element_type=jnp.float32)  # (tm, tn)
        o_ref[...] = (acc_ref[...] + lora).astype(o_ref.dtype)


def _vmem_limit_bytes(tm, tn, tk, r, compute_dtype, out_dtype):
    """Size the VMEM limit from the actual double-buffered tile footprint (+2x headroom)."""
    cbytes = jnp.dtype(compute_dtype).itemsize
    obytes = jnp.dtype(out_dtype).itemsize
    dbl_inputs = 2 * ((tm * tk + tk * tn + r * tk + r * tn) * cbytes + tn * 4)
    dbl_output = 2 * tm * tn * obytes
    scratch = (tm * tn + tm * r) * 4
    total = dbl_inputs + dbl_output + scratch
    return int(min(max(2 * total, 16 * 1024 * 1024), 64 * 1024 * 1024))


def mixed_lora_forward(x, w, bias, a_stack_t, b_stack, scaling, block_adapter,
                       *, tm=512, tn=512, tk=1024, compute_dtype=jnp.bfloat16):
    """x:(T,D_in)  w:(D_in,D_out)  bias:(D_out,)  a_stack_t:(A,R,D_in)  b_stack:(A,R,D_out)
       scaling:(A,)  block_adapter:(T//tm,) int32 adapter id per token tile."""
    T, D_in = x.shape
    D_out = w.shape[1]
    R = a_stack_t.shape[1]

    tm = min(tm, T)
    tn = min(tn, D_out)
    tk = min(tk, D_in)
    assert T % tm == 0 and D_in % tk == 0 and D_out % tn == 0
    assert block_adapter.shape == (T // tm,), "block_adapter length must equal T // tm"

    out_dtype = x.dtype
    xc = x.astype(compute_dtype)
    wc = w.astype(compute_dtype)
    ac = a_stack_t.astype(compute_dtype)
    bc = b_stack.astype(compute_dtype)
    bias2 = bias.astype(jnp.float32).reshape(1, D_out)
    scaling = scaling.astype(jnp.float32)
    block_adapter = block_adapter.astype(jnp.int32)

    grid = (T // tm, D_out // tn, D_in // tk)

    return pl.pallas_call(
        mixed_lora_kernel,
        out_shape=jax.ShapeDtypeStruct((T, D_out), out_dtype),
        grid_spec=pltpu.PrefetchScalarGridSpec(
            num_scalar_prefetch=1,
            grid=grid,
            in_specs=[
                pl.BlockSpec((tm, tk), lambda i, j, k, adp: (i, k)),            # x
                pl.BlockSpec((tk, tn), lambda i, j, k, adp: (k, j)),            # W (D_in, D_out)
                pl.BlockSpec((1, tn), lambda i, j, k, adp: (0, j)),             # bias
                pl.BlockSpec((1, R, tk), lambda i, j, k, adp: (adp[i], 0, k)),  # A^T[adapter]
                pl.BlockSpec((1, R, tn), lambda i, j, k, adp: (adp[i], 0, j)),  # B[adapter]
                pl.BlockSpec(memory_space=pltpu.MemorySpace.SMEM),              # scaling table
            ],
            out_specs=pl.BlockSpec((tm, tn), lambda i, j, k, adp: (i, j)),
            scratch_shapes=[
                pltpu.VMEM((tm, tn), jnp.float32),   # base-linear (+bias) accumulator
                pltpu.VMEM((tm, R), jnp.float32),    # x @ A^T accumulator (re-init per (i, j))
            ],
        ),
        compiler_params=pltpu.CompilerParams(
            # No cross-iteration carry on i or j any more -> both parallel (v7x megacore).
            dimension_semantics=("parallel", "parallel", "arbitrary"),
            vmem_limit_bytes=_vmem_limit_bytes(tm, tn, tk, R, compute_dtype, out_dtype)),
    )(block_adapter, xc, wc, bias2, ac, bc, scaling)


def build_block_adapter(segment, lora_ids, num_tokens, tm):
    """MixedLoraContext (segment boundaries + per-segment lora id) -> per-token-tile adapter id.
    Host-side (numpy) so the alignment assert never hits a traced value."""
    segment = np.asarray(segment, dtype=np.int64)
    lora_ids = np.asarray(lora_ids, dtype=np.int64)
    assert (segment % tm == 0).all(), "segment boundaries must be multiples of tm"
    token_pos = np.arange(num_tokens)
    seg_of_token = np.sum(token_pos[:, None] >= segment[None, 1:], axis=1)
    per_token = lora_ids[seg_of_token]
    block_adapter = per_token[::tm]
    assert (block_adapter >= 0).all(), "adapter ids must be valid indices"
    return jnp.asarray(block_adapter, dtype=jnp.int32)


if __name__ == "__main__":
    key = jax.random.PRNGKey(0)
    k_x, k_w, k_b, k_a, k_bb = jax.random.split(key, 5)

    # Small shapes consistent with the module's forward (tokens, hidden).
    T = 384          # total tokens in the mixed batch (3 segments of 128)
    D_in = 512       # base_layer.in_features
    D_out = 512      # base_layer.out_features
    R = 8            # LoRA rank
    NUM_ADAPTERS = 3
    TM = 128         # segments are 128 tokens -> tm must divide the segment length
    TN, TK = 512, 512
    # bf16 operands + f32 accumulation on TPU; fall back to f32 if the backend is not TPU
    # (keeps the script runnable under CPU/interpret, where bf16 x bf16 = f32 dots fail).
    on_tpu = jax.devices()[0].platform == "tpu"
    COMPUTE_DTYPE = jnp.bfloat16 if on_tpu else jnp.float32

    x = jax.random.normal(k_x, (T, D_in), dtype=jnp.float32)
    w = jax.random.normal(k_w, (D_in, D_out), dtype=jnp.float32) * 0.05     # nn.Linear weight.T
    bias = jax.random.normal(k_b, (D_out,), dtype=jnp.float32) * 0.1
    # LoRA A pre-transposed: (adapters, R, D_in); B: (adapters, R, D_out).
    a_stack_t = jax.random.normal(k_a, (NUM_ADAPTERS, R, D_in), dtype=jnp.float32) * 0.05
    b_stack = jax.random.normal(k_bb, (NUM_ADAPTERS, R, D_out), dtype=jnp.float32) * 0.05
    scaling = jnp.array([2.0, 0.5, 1.5], dtype=jnp.float32)                 # alpha / rank

    # MixedLoraContext: segment token offsets + per-segment lora id (aligned to TM).
    segment = np.array([0, 128, 256, 384], dtype=np.int64)
    lora_ids = np.array([0, 2, 1], dtype=np.int64)
    block_adapter = build_block_adapter(segment, lora_ids, T, TM)

    out = mixed_lora_forward(x, w, bias, a_stack_t, b_stack, scaling, block_adapter,
                             tm=TM, tn=TN, tk=TK, compute_dtype=COMPUTE_DTYPE)
    out = jax.block_until_ready(out)

    # Pure-JAX reference of MixedLoraLinear.forward (not is_scaled path). Operands are rounded
    # to the kernel's compute dtype but all dots run in f32 (numerically equivalent to
    # bf16-operand / f32-accumulation, and supported on every backend).
    def round_to_compute(a):
        return a.astype(COMPUTE_DTYPE).astype(jnp.float32)

    xc32 = round_to_compute(x)
    wc32 = round_to_compute(w)
    ac32 = round_to_compute(a_stack_t)
    bc32 = round_to_compute(b_stack)

    token_pos = np.arange(T)
    seg_of_token = np.sum(token_pos[:, None] >= segment[None, 1:], axis=1)
    adapter_per_token = lora_ids[seg_of_token]

    base = jnp.dot(xc32, wc32) + bias[None, :]
    xa = jnp.einsum("td,ard->tar", xc32, ac32)
    lora_all = jnp.einsum("tar,aro->tao", round_to_compute(xa), bc32)
    lora = lora_all[np.arange(T), adapter_per_token]
    ref = (base + lora * scaling[jnp.asarray(adapter_per_token)][:, None]).astype(x.dtype)
    ref = jax.block_until_ready(ref)

    assert out.shape == ref.shape and out.dtype == ref.dtype
    assert jnp.allclose(out, ref, atol=2e-2, rtol=2e-2), "mismatch vs reference"
    print("KERNEL_OK")
</pallas_src>

<mosaic_0001>
module attributes {stable_mosaic.version = 11 : i64} {
  func.func @mixed_lora_kernel(%arg0: i32, %arg1: i32, %arg2: i32, %arg3: memref<3xi32, #tpu.memory_space<smem>>, %arg4: memref<128x512xf32, #tpu.memory_space<vmem>>, %arg5: memref<512x512xf32, #tpu.memory_space<vmem>>, %arg6: memref<1x512xf32, #tpu.memory_space<vmem>>, %arg7: memref<1x8x512xf32, #tpu.memory_space<vmem>>, %arg8: memref<1x8x512xf32, #tpu.memory_space<vmem>>, %arg9: memref<3xf32, #tpu.memory_space<smem>>, %arg10: memref<128x512xf32, #tpu.memory_space<vmem>>, %arg11: memref<128x512xf32, #tpu.memory_space<vmem>>, %arg12: memref<128x8xf32, #tpu.memory_space<vmem>>) attributes {dimension_semantics = [#tpu.dimension_semantics<parallel>, #tpu.dimension_semantics<parallel>, #tpu.dimension_semantics<arbitrary>], iteration_bounds = array<i64: 3, 1, 1>, scalar_prefetch = 1 : i64, scratch_operands = 2 : i64, tpu.core_type = #tpu.core_type<tc>, window_params = [{transform_indices = @transform_0, window_bounds = array<i64: 128, 512>}, {transform_indices = @transform_1, window_bounds = array<i64: 512, 512>}, {transform_indices = @transform_2, window_bounds = array<i64: 1, 512>}, {transform_indices = @transform_3, window_bounds = array<i64: 1, 8, 512>}, {transform_indices = @transform_4, window_bounds = array<i64: 1, 8, 512>}, {transform_indices = @transform_5, window_bounds = array<i64: 3>}, {transform_indices = @transform_6, window_bounds = array<i64: 128, 512>}]} {
    %0 = arith.index_cast %arg0 : i32 to index
    %1 = memref.load %arg3[%0] : memref<3xi32, #tpu.memory_space<smem>>
    %2 = arith.index_cast %1 : i32 to index
    %3 = memref.load %arg9[%2] : memref<3xf32, #tpu.memory_space<smem>>
    %c0_i32 = arith.constant 0 : i32
    %4 = arith.cmpi eq, %arg2, %c0_i32 : i32
    %5 = arith.extui %4 : i1 to i32
    %c0_i32_0 = arith.constant 0 : i32
    %6 = arith.cmpi ne, %5, %c0_i32_0 : i32
    scf.if %6 {
      %c0_18 = arith.constant 0 : index
      %c0_19 = arith.constant 0 : index
      %22 = vector.load %arg6[%c0_18, %c0_19] : memref<1x512xf32, #tpu.memory_space<vmem>>, vector<1x512xf32>
      %23 = vector.shape_cast %22 : vector<1x512xf32> to vector<1x512xf32>
      %24 = vector.broadcast %23 : vector<1x512xf32> to vector<128x512xf32>
      %c0_20 = arith.constant 0 : index
      %c0_21 = arith.constant 0 : index
      %25 = vector.load %arg11[%c0_20, %c0_21] : memref<128x512xf32, #tpu.memory_space<vmem>>, vector<128x512xf32>
      tpu.vector_store %arg11[%c0_20, %c0_21], %24 {strides = array<i32>} : memref<128x512xf32, #tpu.memory_space<vmem>>, vector<128x512xf32>,
      %cst_22 = arith.constant 0.000000e+00 : f32
      %26 = vector.broadcast %cst_22 : f32 to vector<128x8xf32>
      %c0_23 = arith.constant 0 : index
      %c0_24 = arith.constant 0 : index
      %27 = vector.load %arg12[%c0_23, %c0_24] : memref<128x8xf32, #tpu.memory_space<vmem>>, vector<128x8xf32>
      tpu.vector_store %arg12[%c0_23, %c0_24], %26 {strides = array<i32>} : memref<128x8xf32, #tpu.memory_space<vmem>>, vector<128x8xf32>,
    } else {
    }
    %c0 = arith.constant 0 : index
    %c0_1 = arith.constant 0 : index
    %7 = vector.load %arg4[%c0, %c0_1] : memref<128x512xf32, #tpu.memory_space<vmem>>, vector<128x512xf32>
    %c0_2 = arith.constant 0 : index
    %c0_3 = arith.constant 0 : index
    %8 = vector.load %arg11[%c0_2, %c0_3] : memref<128x512xf32, #tpu.memory_space<vmem>>, vector<128x512xf32>
    %c0_4 = arith.constant 0 : index
    %c0_5 = arith.constant 0 : index
    %9 = vector.load %arg5[%c0_4, %c0_5] : memref<512x512xf32, #tpu.memory_space<vmem>>, vector<512x512xf32>
    %cst = arith.constant dense<0.000000e+00> : vector<128x512xf32>
    %10 = tpu.matmul %7, %9, %cst {dimension_numbers = #tpu.dot_dimension_numbers<[1], [0], [0], [1], [0, 0, 1, 1], [], []>} : vector<128x512xf32>, vector<512x512xf32>, vector<128x512xf32> -> vector<128x512xf32>
    %11 = arith.addf %8, %10 : vector<128x512xf32>
    %c0_6 = arith.constant 0 : index
    %c0_7 = arith.constant 0 : index
    %12 = vector.load %arg11[%c0_6, %c0_7] : memref<128x512xf32, #tpu.memory_space<vmem>>, vector<128x512xf32>
    tpu.vector_store %arg11[%c0_6, %c0_7], %11 {strides = array<i32>} : memref<128x512xf32, #tpu.memory_space<vmem>>, vector<128x512xf32>,
    %c0_8 = arith.constant 0 : index
    %c0_9 = arith.constant 0 : index
    %13 = vector.load %arg12[%c0_8, %c0_9] : memref<128x8xf32, #tpu.memory_space<vmem>>, vector<128x8xf32>
    %c0_10 = arith.constant 0 : index
    %c0_11 = arith.constant 0 : index
    %c0_12 = arith.constant 0 : index
    %14 = vector.load %arg7[%c0_10, %c0_11, %c0_12] : memref<1x8x512xf32, #tpu.memory_space<vmem>>, vector<1x8x512xf32>
    %15 = vector.shape_cast %14 : vector<1x8x512xf32> to vector<8x512xf32>
    %cst_13 = arith.constant dense<0.000000e+00> : vector<128x8xf32>
    %16 = tpu.matmul %7, %15, %cst_13 {dimension_numbers = #tpu.dot_dimension_numbers<[1], [1], [0], [0], [0, 0, 1, 0], [], []>} : vector<128x512xf32>, vector<8x512xf32>, vector<128x8xf32> -> vector<128x8xf32>
    %17 = arith.addf %13, %16 : vector<128x8xf32>
    %c0_14 = arith.constant 0 : index
    %c0_15 = arith.constant 0 : index
    %18 = vector.load %arg12[%c0_14, %c0_15] : memref<128x8xf32, #tpu.memory_space<vmem>>, vector<128x8xf32>
    tpu.vector_store %arg12[%c0_14, %c0_15], %17 {strides = array<i32>} : memref<128x8xf32, #tpu.memory_space<vmem>>, vector<128x8xf32>,
    %c0_i32_16 = arith.constant 0 : i32
    %19 = arith.cmpi eq, %arg2, %c0_i32_16 : i32
    %20 = arith.extui %19 : i1 to i32
    %c0_i32_17 = arith.constant 0 : i32
    %21 = arith.cmpi ne, %20, %c0_i32_17 : i32
    scf.if %21 {
      %c0_18 = arith.constant 0 : index
      %c0_19 = arith.constant 0 : index
      %22 = vector.load %arg12[%c0_18, %c0_19] : memref<128x8xf32, #tpu.memory_space<vmem>>, vector<128x8xf32>
      %23 = vector.broadcast %3 : f32 to vector<128x8xf32>
      %24 = arith.mulf %22, %23 : vector<128x8xf32>
      %c0_20 = arith.constant 0 : index
      %c0_21 = arith.constant 0 : index
      %c0_22 = arith.constant 0 : index
      %25 = vector.load %arg8[%c0_20, %c0_21, %c0_22] : memref<1x8x512xf32, #tpu.memory_space<vmem>>, vector<1x8x512xf32>
      %26 = vector.shape_cast %25 : vector<1x8x512xf32> to vector<8x512xf32>
      %cst_23 = arith.constant dense<0.000000e+00> : vector<128x512xf32>
      %27 = tpu.matmul %24, %26, %cst_23 {dimension_numbers = #tpu.dot_dimension_numbers<[1], [0], [0], [1], [0, 0, 1, 1], [], []>} : vector<128x8xf32>, vector<8x512xf32>, vector<128x512xf32> -> vector<128x512xf32>
      %c0_24 = arith.constant 0 : index
      %c0_25 = arith.constant 0 : index
      %28 = vector.load %arg11[%c0_24, %c0_25] : memref<128x512xf32, #tpu.memory_space<vmem>>, vector<128x512xf32>
      %29 = arith.addf %28, %27 : vector<128x512xf32>
      %c0_26 = arith.constant 0 : index
      %c0_27 = arith.constant 0 : index
      %30 = vector.load %arg10[%c0_26, %c0_27] : memref<128x512xf32, #tpu.memory_space<vmem>>, vector<128x512xf32>
      tpu.vector_store %arg10[%c0_26, %c0_27], %29 {strides = array<i32>} : memref<128x512xf32, #tpu.memory_space<vmem>>, vector<128x512xf32>,
    } else {
    }
    return
  }
  func.func @transform_0(%arg0: i32, %arg1: i32, %arg2: i32, %arg3: memref<3xi32, #tpu.memory_space<smem>>) -> (i32, i32) {
    %c0_i32 = arith.constant 0 : i32
    return %arg0, %arg2 : i32, i32
  }
  func.func @transform_1(%arg0: i32, %arg1: i32, %arg2: i32, %arg3: memref<3xi32, #tpu.memory_space<smem>>) -> (i32, i32) {
    %c0_i32 = arith.constant 0 : i32
    return %arg2, %arg1 : i32, i32
  }
  func.func @transform_2(%arg0: i32, %arg1: i32, %arg2: i32, %arg3: memref<3xi32, #tpu.memory_space<smem>>) -> (i32, i32) {
    %c0_i32 = arith.constant 0 : i32
    %c0_i32_0 = arith.constant 0 : i32
    return %c0_i32, %arg1 : i32, i32
  }
  func.func @transform_3(%arg0: i32, %arg1: i32, %arg2: i32, %arg3: memref<3xi32, #tpu.memory_space<smem>>) -> (i32, i32, i32) {
    %0 = arith.index_cast %arg0 : i32 to index
    %1 = memref.load %arg3[%0] : memref<3xi32, #tpu.memory_space<smem>>
    %c0_i32 = arith.constant 0 : i32
    %c0_i32_0 = arith.constant 0 : i32
    return %1, %c0_i32, %arg2 : i32, i32, i32
  }
  func.func @transform_4(%arg0: i32, %arg1: i32, %arg2: i32, %arg3: memref<3xi32, #tpu.memory_space<smem>>) -> (i32, i32, i32) {
    %0 = arith.index_cast %arg0 : i32 to index
    %1 = memref.load %arg3[%0] : memref<3xi32, #tpu.memory_space<smem>>
    %c0_i32 = arith.constant 0 : i32
    %c0_i32_0 = arith.constant 0 : i32
    return %1, %c0_i32, %arg1 : i32, i32, i32
  }
  func.func @transform_5(%arg0: i32, %arg1: i32, %arg2: i32, %arg3: memref<3xi32, #tpu.memory_space<smem>>) -> i32 {
    %c0_i32 = arith.constant 0 : i32
    %c0_i32_0 = arith.constant 0 : i32
    return %c0_i32 : i32
  }
  func.func @transform_6(%arg0: i32, %arg1: i32, %arg2: i32, %arg3: memref<3xi32, #tpu.memory_space<smem>>) -> (i32, i32) {
    %c0_i32 = arith.constant 0 : i32
    return %arg0, %arg1 : i32, i32
  }
}

</mosaic_0001>

<bundles_post_ra>
// kernel: tpu_custom_call.1
= control target key start
LH: loop header
LB: loop body
LE: loop exit
PB: predicated region body
PF: predicated region fallthrough
CT: control target
= control target key end

     0   :  { %s3829_s27 = smov [#allocation5]   ;;  %s5457_s0 = inlined_call_operand.hbm [shape: s32[3], index: 0, kind: input, shape index: {}]   ;;  %s5458_s1 = inlined_call_operand.hbm [shape: f32[384,512], index: 1, kind: input, shape index: {}]   ;;  %s5459_s2 = inlined_call_operand.hbm [shape: f32[512,512], index: 2, kind: input, shape index: {}]   ;;  %s5460_s3 = inlined_call_operand.hbm [shape: f32[1,512], index: 3, kind: input, shape index: {}]   ;;  %s5461_s4 = inlined_call_operand.hbm [shape: f32[3,8,512], index: 4, kind: input, shape index: {}]   ;;  %s5462_s5 = inlined_call_operand.hbm [shape: f32[3,8,512], index: 5, kind: input, shape index: {}]   ;;  %s5463_s6 = inlined_call_operand.vmem [shape: f32[3], index: 6, kind: input, shape index: {}]   ;;  %s5464_s7 = inlined_call_operand.hbm [shape: f32[384,512], index: 7, kind: output, shape index: {}]  }
   0x1   :  { %5516 = sst [smem:[#allocation99_spill]] %s5458_s1  ;;  %s13_s26 = sshll.u32 %s5457_s0, 4  ;;  %s14_s26 = int_to_ptr.hbm [resolvable:$true] %s13_s26 }
   0x2   :  { %5517 = sst [smem:[#allocation100_spill]] %s5459_s2 }
   0x3   :  { %5518 = sst [smem:[#allocation101_spill]] %s5460_s3 }
   0x4   :  { %5519 = sst [smem:[#allocation102_spill]] %s5461_s4 }
   0x5   :  { %5520 = sst [smem:[#allocation103_spill]] %s5462_s5 }
   0x6   :  { %5521 = sst [smem:[#allocation104_spill]] %s5463_s6 }
   0x7   :  { %5522 = sst [smem:[#allocation105_spill]] %s5464_s7 }
   0x8   :  { %16 = dma.hbm_to_smem %s14_s26, 16, %s3829_s27, [#allocation4] }
   0x9   :  { %3755 = dma.done.wait [#allocation4], 16 }
   0xa   :  { %3756 = vsyncadd [#allocation4], 4294967280 }
   0xb   :  { %19 = sfence }
   0xc   :  { %20 = vsyncpa [#allocation7], 0 }
   0xd   :  { %22 = vsyncpa [#allocation7 + $0x1], 0 }
   0xe   :  { %23 = vsyncpa [#allocation11], 0 }
   0xf   :  { %24 = vsyncpa [#allocation14], 0 }
  0x10   :  { %26 = vsyncpa [#allocation14 + $0x1], 0 }
  0x11   :  { %27 = vsyncpa [#allocation9], 0 }
  0x12   :  { %28 = vsyncpa [#allocation8], 0 }
  0x13   :  { %30 = vsyncpa [#allocation8 + $0x1], 0  ;;  %s3881_s28 = smov 0   ;;  %s3883_s29 = smov 0  }
  0x14   :  { %s3885_s30 = smov 0   ;;  %s3887_s0 = smov 0  }
  0x15   :  { %s3889_s8 = smov 0   ;;  %s3891_s9 = smov 0  }
  0x16   :  { %s3893_s10 = smov 0   ;;  %s3895_s11 = smov 0  }
  0x17   :  { %s3897_s12 = smov 0   ;;  %s3899_s13 = smov 0  }
  0x18   :  { %s3901_s14 = smov 0   ;;  %s3903_s15 = smov 0  }
  0x19 LB: > { %5523 = sst [smem:[#allocation29_spill]] %s3799_s8  ;;  %s3942_s16 = sadd.s32 4294967295, %s3827_s15   ;;  %s3827_s15 = sphi %s3903_s15, %s36_s15   ;;  %s3823_s14 = sphi %s3901_s14, %s5718_s14   ;;  %s3819_s13 = sphi %s3899_s13, %s5717_s13   ;;  %s3815_s12 = sphi %s3897_s12, %s5726_s12   ;;  %s3811_s11 = sphi %s3895_s11, %s5725_s11   ;;  %s3807_s10 = sphi %s3893_s10, %s5724_s10   ;;  %s3803_s9 = sphi %s3891_s9, %s5723_s9   ;;  %s3799_s8 = sphi %s3889_s8, %s5722_s8   ;;  %s3795_s0 = sphi %s3887_s0, %s5715_s0   ;;  %s3791_s30 = sphi %s3885_s30, %s5721_s30   ;;  %s3787_s29 = sphi %s3883_s29, %s5720_s29   ;;  %s3783_s28 = sphi %s3881_s28, %s5719_s28  }
  0x1a   : > { %5524 = sst [smem:[#allocation30_spill]] %s3819_s13  ;;  %p3174_p0 = scmp.ge.s32.totalorder %s3827_s15, 1 }
  0x1b   : > { %5525 = sst [smem:[#allocation31_spill]] %s3823_s14  ;;  %p5477_p1 = scmp.eq.s32.totalorder %s3942_s16, 0 }
  0x1c   : > { %p251_p2 = scmp.lt.s32.totalorder %s3827_s15, 4  ;;  %s5526_s2 = sld [smem:[#allocation100_spill]] }
  0x1d   : > { %s3830_s21 = smov [#allocation10]   ;;  %s5465_s24 = smov 512  }
  0x1e   : > { %p3950_p3 = pnand %p3174_p0, %p251_p2  ;;  %s270_s22 = sshll.u32 %s3830_s21, 4  ;;  %s271_s22 = int_to_ptr.vmem [resolvable:$true] %s270_s22 }
  0x1f   : > { %s5466_s25 = smov 32   ;;  %s55_s26 = sadd.s32 1, %s3823_s14 }
  0x20   : > { %s5527_s20 = scalar_select %p3950_p3, 1, 0 }
  0x21   : > { %p3297_p4 = pneg %p3950_p3  ;;  %p57_p6 = scmp.ge.s32.totalorder %s55_s26, 3 }
  0x22   : > { %s268_s19 = sshll.u32 %s5526_s2, 4  ;;  %5528 = sst [smem:[#allocation32_spill]] %s5527_s20  ;;  %s269_s19 = int_to_ptr.hbm [resolvable:$true] %s268_s19 }
  0x23   : > { %p3958_p5 = pnand %p3297_p4, %p5477_p1  ;;  %p72_p7 = scmp.eq.s32.totalorder %s3827_s15, 0 }
  0x24   : > { %s141_s27 = sld [smem:[#allocation5 + %s3823_s14]]  ;;  %s148_s17 = sadd.s32 1, %s3803_s9 }
  0x25   : > { %3300 = dma.hbm_to_vmem [thread:$0]  (!%p3958_p5), %s269_s19, 32768, %s271_s22, [#allocation11], %s5465_s24, %s5465_s24, %s5466_s25  }
  0x26   : > { %s5728_s26 = smov (%p57_p6, %s55_s26), 0  ;;  %p155_p8 = scmp.ne.s32.totalorder %s3803_s9, %s3799_s8 }
  0x27   : > { %5530 = sst [smem:[#allocation33_spill]] %s5728_s26  ;;  %p161_p9 = scmp.ne.s32.totalorder %s3799_s8, %s3795_s0 }
  0x28   : > { %s142_s18 = sld [smem:[#allocation5 + %s5728_s26]]  ;;  %p3328_p10 = scmp.lt.s32.totalorder %s3827_s15, 3 }
  0x29   : > { %p3981_p11 = por %p155_p8, %p72_p7  ;;  %p3987_p12 = por %p161_p9, %p5477_p1 }
  0x2a   : > { %s333_s22 = sand.u32 1, %s3827_s15   ;;  %s335_s0 = sand.u32 1, %s3803_s9  }
  0x2b   : > { %s5532_s21 = scalar_select %p3987_p12, 1, 0 }
  0x2c   : > { %s3183_s24 = sshll.u32 %s335_s0, 5  ;;  %p3997_p13 = pnand %p3328_p10, %p3981_p11 }
  0x2d   : > { %5533 = sst [smem:[#allocation34_spill]] %s5532_s21  ;;  %s337_s13 = scalar_lea.vmem [#allocation13], %s3183_s24 }
  0x2e   : > { %s3280_s2 = scalar_select %p3981_p11, [#allocation5], [#allocation18] }
  0x2f   : > { %s143_s7 = ssub.s32 %s141_s27, %s142_s18  ;;  %s4003_s8 = sshll.u32 %s337_s13, 4 }
  0x30   : > { %5535 = sst [smem:[#allocation35_spill]] %s4003_s8  ;;  %p146_p0 = scmp.eq.s32.totalorder %s143_s7, 0 }
  0x31   : > { %s3281_s21 = scalar_select %p3981_p11, %s3823_s14, 0 }
  0x32   : > { %s4010_s0 = scalar_select %p146_p0, %s3803_s9, %s148_s17  }
  0x33   : > { %s5730_s2 = smov (!%p3328_p10, %s3280_s2), [#allocation20]  ;;  %s5732_s21 = smov (!%p3328_p10, %s3281_s21), 0 }
  0x34   : > { %5536 = sst [smem:[#allocation36_spill]] %s4010_s0  ;;  %s3833_s1 = smov [#allocation12]  }
  0x35   : > { %s5537_s3 = sld [smem:[#allocation101_spill]]  ;;  %s287_s19 = sshll.u32 %s3833_s1, 4  ;;  %s288_s19 = int_to_ptr.vmem [resolvable:$true] %s287_s19 }
  0x36   : > { %s338_s24 = sld [smem:[%s5730_s2 + %s5732_s21]]  ;;  %s3834_s17 = smov [#allocation16]  }
  0x37   : > { %s5538_s6 = sld [smem:[#allocation104_spill]]  ;;  %s4029_s21 = scalar_lea.sflag [#allocation14], %s333_s22 }
  0x38   : > { %s5539_s4 = sld [smem:[#allocation102_spill]]  ;;  %p3593_p4 = pneg %p3997_p13 }
  0x3b   : > { %s285_s27 = sshll.u32 %s5537_s3, 4  ;;  %s286_s27 = int_to_ptr.hbm [resolvable:$true] %s285_s27 }
  0x3c   : > { %3303 = dma.hbm_to_vmem [thread:$0]  (!%p3958_p5), %s286_s27, 64, %s288_s19, [#allocation11]  }
  0x3d   : > { %s297_s7 = sshll.u32 %s5538_s6, 4  ;;  %s3269_s8 = sshll.u32 %s338_s24, 5  ;;  %s298_s7 = int_to_ptr.vmem [resolvable:$true] %s297_s7 }
  0x3e   : > { %3306 = dma.vmem_to_smem (!%p3958_p5), %s298_s7, 16, %s3834_s17, [#allocation9]  }
  0x3f   : > { %s345_s2 = scalar_lea.hbm %s5539_s4, %s3269_s8  ;;  %s3596_s27 = scalar_lea.hbm %s5539_s4, 96 }
  0x40   : > { %s347_s20 = sshll.u32 %s345_s2, 4  ;;  %s348_s20 = int_to_ptr.hbm [resolvable:$true] %s347_s20 }
  0x41   : > { %s3589_s13 = sshra.s32 %s348_s20, 4  ;;  %s3590_s13 = int_to_ptr.hbm [resolvable:$true] %s3589_s13 }
  0x42   : > { %s3591_s18 = scalar_lea.hbm %s3590_s13, 32  ;;  %p3597_p5 = scmp.lt.s32.totalorder %s3590_s13, %s5539_s4 }
  0x43   : > { %p3592_p2 = scmp.ne.s32.totalorder %s3590_s13, %s3591_s18  ;;  %p3598_p9 = scmp.lt.s32.totalorder %s3596_s27, %s3591_s18 }
  0x45   : > { %p3594_p6 = pnand %p3593_p4, %p3592_p2  ;;  %p3599_p11 = por %p3598_p9, %p3597_p5 }
  0x47   : > { %p3595_p8 = pneg %p3594_p6 }
  0x49   : > { %p3600_p0 = pnand %p3599_p11, %p3595_p8 }
  0x4b   : > { %3603 = shalt.err (!%p3600_p0)
}
  0x4c   : > { %s5540_s8 = sld [smem:[#allocation35_spill]]  ;;  %s3173_s0 = sadd.s32 4294967294, %s3827_s15  }
  0x4d   : > { %s59_s25 = ssub.s32 %s3823_s14, %s5728_s26  ;;  %s64_s19 = sadd.s32 1, %s3815_s12 }
  0x4e   : > { %p62_p2 = scmp.eq.s32.totalorder %s59_s25, 0  ;;  %p71_p4 = scmp.ne.s32.totalorder %s3815_s12, %s3811_s11 }
  0x4f   : > { %p77_p6 = scmp.ne.s32.totalorder %s3811_s11, %s3807_s10  ;;  %p244_p9 = scmp.eq.s32.totalorder %s3173_s0, 2 }
  0x50   : > { %s4053_s17 = scalar_select %p62_p2, %s3815_s12, %s64_s19  }
  0x51   : > { %p4057_p8 = por %p72_p7, %p71_p4  ;;  %p4063_p5 = por %p5477_p1, %p77_p6 }
  0x52   : > { %s5541_s22 = int_to_ptr.vmem [resolvable:$true] %s5540_s8  ;;  %s3268_s13 = sshll.u32 %s3823_s14, 9 }
  0x53   : > { %3315 = dma.hbm_to_vmem [thread:$0]  (!%p3997_p13), %s348_s20, 512, %s5541_s22, %s4029_s21  }
  0x54   : > { %p238_p13 = scmp.eq.s32.totalorder %s3942_s16, 2  ;;  %s308_s20 = sand.u32 1, %s3815_s12  }
  0x55   : > { %p4074_p0 = por %p244_p9, %p77_p6  ;;  %s3179_s23 = sshll.u32 %s308_s20, 9 }
  0x56   : > { %p4070_p11 = por %p238_p13, %p71_p4  ;;  %s5546_s7 = sld [smem:[#allocation99_spill]] }
  0x57   : > { %s5545_s1 = scalar_select %p4074_p0, 1, 0 }
  0x58   : > { %s312_s0 = scalar_lea.vmem [#allocation6], %s3179_s23  ;;  %p3308_p2 = pnand %p3328_p10, %p4057_p8 }
  0x59   : > { %s323_s25 = sshll.u32 %s312_s0, 4  ;;  %s309_s19 = scalar_lea.sflag [#allocation7], %s308_s20  ;;  %s324_s25 = int_to_ptr.vmem [resolvable:$true] %s323_s25 }
  0x5a   : > { %s5547_s3 = smov 32   ;;  %s5548_s4 = smov 512  }
  0x5b   : > { %s171_s27 = sld [smem:[#allocation5 + %s3823_s14]]  ;;  %p185_p4 = scmp.ne.s32.totalorder %s3791_s30, %s3787_s29 }
  0x5c   : > { %s320_s8 = scalar_lea.hbm %s5546_s7, %s3268_s13  ;;  %s172_s13 = sld [smem:[#allocation5 + %s5728_s26]] }
  0x5d   : > { %s321_s22 = sshll.u32 %s320_s8, 4  ;;  %p191_p6 = scmp.ne.s32.totalorder %s3787_s29, %s3783_s28  ;;  %s322_s22 = int_to_ptr.hbm [resolvable:$true] %s321_s22 }
  0x5e   : > { %3310 = dma.hbm_to_vmem [thread:$0]  (!%p3308_p2), %s322_s22, 8192, %s324_s25, %s309_s19, %s5548_s4, %s5548_s4, %s5547_s3  }
  0x5f   : > { %p187_p13 = por %p185_p4, %p72_p7  ;;  %p4098_p9 = por %p191_p6, %p5477_p1 }
  0x60   : > { %s358_s23 = sand.u32 1, %s3791_s30   ;;  %s178_s8 = sadd.s32 1, %s3791_s30 }
  0x61   : > { %s3283_s20 = scalar_select %p187_p13, [#allocation5], [#allocation19] }
  0x62   : > { %s3284_s24 = scalar_select %p187_p13, %s3823_s14, 0 }
  0x63   : > { %s173_s7 = ssub.s32 %s171_s27, %s172_s13  ;;  %s3186_s3 = sshll.u32 %s358_s23, 5 }
  0x64   : > { %p176_p8 = scmp.eq.s32.totalorder %s173_s7, 0  ;;  %s5734_s20 = smov (!%p3328_p10, %s3283_s20), [#allocation21] }
  0x65   : > { %s5736_s24 = smov (!%p3328_p10, %s3284_s24), 0  ;;  %p4114_p7 = pnand %p3328_p10, %p187_p13 }
  0x66   : > { %s4108_s4 = scalar_select %p176_p8, %s3791_s30, %s178_s8  }
  0x67   : > { %s361_s22 = sld [smem:[%s5734_s20 + %s5736_s24]]  ;;  %s360_s0 = scalar_lea.vmem [#allocation15], %s3186_s3 }
  0x68   : > { %s372_s25 = sshll.u32 %s360_s0, 4  ;;  %s5551_s7 = sld [smem:[#allocation103_spill]]  ;;  %s373_s25 = int_to_ptr.vmem [resolvable:$true] %s372_s25 }
  0x69   : > { %p3653_p10 = pneg %p4114_p7 }
  0x6d   : > { %s3270_s19 = sshll.u32 %s361_s22, 5 }
  0x6e   : > { %s368_s23 = scalar_lea.hbm %s5551_s7, %s3270_s19  ;;  %s3656_s24 = scalar_lea.hbm %s5551_s7, 96 }
  0x6f   : > { %s370_s6 = sshll.u32 %s368_s23, 4  ;;  %s371_s6 = int_to_ptr.hbm [resolvable:$true] %s370_s6 }
  0x70   : > { %s3649_s8 = sshra.s32 %s371_s6, 4  ;;  %s3650_s8 = int_to_ptr.hbm [resolvable:$true] %s3649_s8 }
  0x71   : > { %s3651_s26 = scalar_lea.hbm %s3650_s8, 32  ;;  %p3657_p13 = scmp.lt.s32.totalorder %s3650_s8, %s5551_s7 }
  0x72   : > { %p3652_p2 = scmp.ne.s32.totalorder %s3650_s8, %s3651_s26  ;;  %p3658_p8 = scmp.lt.s32.totalorder %s3656_s24, %s3651_s26 }
  0x74   : > { %p3654_p4 = pnand %p3653_p10, %p3652_p2  ;;  %p3659_p1 = por %p3658_p8, %p3657_p13 }
  0x76   : > { %p3655_p6 = pneg %p3654_p4 }
  0x78   : > { %p3660_p0 = pnand %p3659_p1, %p3655_p6 }
  0x7a   : > { %3663 = shalt.err (!%p3660_p0)
}
  0x7b   : > { %3320 = dma.hbm_to_vmem [thread:$0]  (!%p4114_p7), %s371_s6, 512, %s373_s25, %s4029_s21  }
  0x7c   : > { %381 = sbr.rel (%p3950_p3) target bundleno = 1137 (0x471), region = 44 }
  0x81   : > { %s4135_s19 = sand.u32 1, %s3811_s11  }
  0x82   : > { %s3190_s14 = sshll.u32 %s4135_s19, 9  ;;  %s384_s27 = scalar_lea.sflag [#allocation7], %s4135_s19 }
  0x83   : > { %s4141_s26 = scalar_lea.vmem [#allocation6], %s3190_s14 }
  0x84   : > { %3758 = dma.done.wait (%p4063_p5), %s384_s27, 8192  }
  0x85   : > { %3760 = vsyncadd (%p4063_p5), %s384_s27, 4294959104  ;;  %p5553_p1 = scmp.eq.s32.totalorder %s3942_s16, 0 }
  0x87   : > { %3762 = dma.done.wait (%p5553_p1), [#allocation11], 32832   ;;  %p5554_p3 = pmov %p5553_p1 }
  0x88   : > { %s5555_s6 = sld [smem:[#allocation29_spill]]  ;;  %s403_s28 = sand.u32 1, %s3942_s16  }
  0x89   : > { %3764 = vsyncadd (%p5554_p3), [#allocation11], 4294934464  ;;  %s404_s23 = scalar_lea.sflag [#allocation14], %s403_s28 }
  0x8e   : > { %s405_s25 = sand.u32 1, %s5555_s6  }
  0x8f   : > { %s3193_s13 = sshll.u32 %s405_s25, 5 }
  0x90   : > { %s4153_s8 = scalar_lea.vmem [#allocation13], %s3193_s13 }
  0x91   : > { %3766 = dma.done.wait (%p3987_p12), %s404_s23, 512  }
  0x92   : > { %3768 = vsyncadd (%p3987_p12), %s404_s23, 4294966784  ;;  %s415_s2 = sand.u32 1, %s3787_s29  }
  0x93   : > { %s3194_s20 = sshll.u32 %s415_s2, 5 }
  0x94   : > { %s4160_s24 = scalar_lea.vmem [#allocation15], %s3194_s20 }
  0x95   : > { %3770 = dma.done.wait (%p4098_p9), %s404_s23, 512  }
  0x96   : > { %3772 = vsyncadd (%p4098_p9), %s404_s23, 4294966784  ;;  %p5557_p5 = pmov %p5553_p1 }
  0x97   : > { %p5558_p0 = pmov %p5553_p1 }
  0x98   : > { %3774 = dma.done.wait (%p5557_p5), [#allocation9], 16  }
  0x99   : > { %3776 = vsyncadd (%p5558_p0), [#allocation9], 4294967280 }
  0x9a   : > { %428 = sfence }
  0x9b   : > { %v887_v0 = vld [vmem:[#allocation10 + $0x5e0] sm:$0xff]  ;;  %v4171_v62 = vld [vmem:[%s4141_s26 + $0x10] sm:$0xff]  ;;  %v4174_v63 = vld [vmem:[%s4141_s26 + $0x18] sm:$0xff]  ;;  %vm554_vm0 = vcmask 64512   ;;  %s5663_s16 = sld [smem:[#allocation30_spill]]  ;;  %s5187_s22 = scalar_lea.vmem [#allocation17], %s3190_s14 }
  0x9c   : > { %v883_v1 = vld [vmem:[#allocation10 + $0x5c0] sm:$0xff]  ;;  %1085 = vmatpush.msra.mxu2 %v887_v0  ;;  %v888_v0 = vld [vmem:[#allocation10 + $0x5e8] sm:$0xff]  ;;  %s2992_s21 = sshll.u32 %s5187_s22, 4  ;;  %s2977_s25 = scalar_lea.sflag [#allocation8], %s4135_s19  ;;  %s2993_s21 = int_to_ptr.vmem [resolvable:$true] %s2992_s21 }
  0x9d   : > { %v951_v2 = vld [vmem:[#allocation10 + $0x7e0] sm:$0xff] }
  0x9e   : > { %1150 = vmatpush.msra.mxu3 %v951_v2  ;;  %v759_v3 = vld [vmem:[#allocation10 + $0x1e0] sm:$0xff]  ;;  %1086 = vmatpush.msra.mxu2 %v883_v1  ;;  %v952_v1 = vld [vmem:[#allocation10 + $0x7e8] sm:$0xff] }
  0x9f   : > { %v823_v4 = vld [vmem:[#allocation10 + $0x3e0] sm:$0xff]  ;;  %955 = vmatpush.msra.mxu0 %v759_v3 }
  0xa0   : > { %v879_v5 = vld [vmem:[#allocation10 + $0x5a0] sm:$0xff]  ;;  %1020 = vmatpush.msra.mxu1 %v823_v4 }
  0xa1   : > { %v947_v6 = vld [vmem:[#allocation10 + $0x7c0] sm:$0xff]  ;;  %1087 = vmatpush.msra.mxu2 %v879_v5  ;;  %v4182_v5 = vld [vmem:[%s4141_s26 + $0x8] sm:$0xff]  ;;  %s474_s5 = sld [smem:[#allocation5 + %s5663_s16]]  ;;  %s3272_s0 = sshll.u32 %s5663_s16, 9 }
  0xa2   : > { %v755_v7 = vld [vmem:[#allocation10 + $0x1c0] sm:$0xff]  ;;  %1151 = vmatpush.msra.mxu3 %v947_v6  ;;  %v760_v6 = vld [vmem:[#allocation10 + $0x1e8] sm:$0xff] }
  0xa3   : > { %v819_v8 = vld [vmem:[#allocation10 + $0x3c0] sm:$0xff]  ;;  %956 = vmatpush.msra.mxu0 %v755_v7  ;;  %v824_v7 = vld [vmem:[#allocation10 + $0x3e8] sm:$0xff] }
  0xa4   : > { %v943_v9 = vld [vmem:[#allocation10 + $0x7a0] sm:$0xff]  ;;  %1021 = vmatpush.msra.mxu1 %v819_v8  ;;  %v884_v8 = vld [vmem:[#allocation10 + $0x5c8] sm:$0xff] }
  0xa5   : > { %v751_v10 = vld [vmem:[#allocation10 + $0x1a0] sm:$0xff]  ;;  %1152 = vmatpush.msra.mxu3 %v943_v9  ;;  %v948_v9 = vld [vmem:[#allocation10 + $0x7c8] sm:$0xff] }
  0xa6   : > { %v875_v11 = vld [vmem:[#allocation10 + $0x580] sm:$0xff]  ;;  %957 = vmatpush.msra.mxu0 %v751_v10  ;;  %v756_v10 = vld [vmem:[#allocation10 + $0x1c8] sm:$0xff] }
  0xa7   : > { %v815_v12 = vld [vmem:[#allocation10 + $0x3a0] sm:$0xff]  ;;  %1088 = vmatpush.msra.mxu2 %v875_v11  ;;  %v820_v11 = vld [vmem:[#allocation10 + $0x3c8] sm:$0xff]  ;;  %s475_s3 = sld [smem:[#allocation16 + %s474_s5]] }
  0xa8   : > { %v939_v13 = vld [vmem:[#allocation10 + $0x780] sm:$0xff]  ;;  %1022 = vmatpush.msra.mxu1 %v815_v12  ;;  %v880_v12 = vld [vmem:[#allocation10 + $0x5a8] sm:$0xff] }
  0xa9   : > { %v747_v14 = vld [vmem:[#allocation10 + $0x180] sm:$0xff]  ;;  %1153 = vmatpush.msra.mxu3 %v939_v13  ;;  %v944_v13 = vld [vmem:[#allocation10 + $0x7a8] sm:$0xff] }
  0xaa   : > { %v811_v15 = vld [vmem:[#allocation10 + $0x380] sm:$0xff]  ;;  %958 = vmatpush.msra.mxu0 %v747_v14  ;;  %v4187_v14 = vld [vmem:[%s4141_s26 + $0x30] sm:$0xff] }
  0xab   : > { %v871_v16 = vld [vmem:[#allocation10 + $0x560] sm:$0xff]  ;;  %1023 = vmatpush.msra.mxu1 %v811_v15  ;;  %v4190_v15 = vld [vmem:[%s4141_s26 + $0x38] sm:$0xff] }
  0xac   : > { %v935_v17 = vld [vmem:[#allocation10 + $0x760] sm:$0xff]  ;;  %1089 = vmatpush.msra.mxu2 %v871_v16  ;;  %v752_v16 = vld [vmem:[#allocation10 + $0x1a8] sm:$0xff] }
  0xad   : > { %v743_v18 = vld [vmem:[#allocation10 + $0x160] sm:$0xff]  ;;  %1154 = vmatpush.msra.mxu3 %v935_v17  ;;  %v816_v17 = vld [vmem:[#allocation10 + $0x3a8] sm:$0xff] }
  0xae   : > { %v807_v19 = vld [vmem:[#allocation10 + $0x360] sm:$0xff]  ;;  %959 = vmatpush.msra.mxu0 %v743_v18  ;;  %v876_v18 = vld [vmem:[#allocation10 + $0x588] sm:$0xff] }
  0xaf   : > { %v867_v20 = vld [vmem:[#allocation10 + $0x540] sm:$0xff]  ;;  %1024 = vmatpush.msra.mxu1 %v807_v19  ;;  %v940_v19 = vld [vmem:[#allocation10 + $0x788] sm:$0xff] }
  0xb0   : > { %v931_v21 = vld [vmem:[#allocation10 + $0x740] sm:$0xff]  ;;  %1090 = vmatpush.msra.mxu2 %v867_v20 }
  0xb1   : > { %v739_v22 = vld [vmem:[#allocation10 + $0x140] sm:$0xff]  ;;  %1155 = vmatpush.msra.mxu3 %v931_v21  ;;  %v4198_v21 = vld [vmem:[%s4141_s26 + $0x28] sm:$0xff] }
  0xb2   : > { %v803_v23 = vld [vmem:[#allocation10 + $0x340] sm:$0xff]  ;;  %960 = vmatpush.msra.mxu0 %v739_v22  ;;  %v748_v22 = vld [vmem:[#allocation10 + $0x188] sm:$0xff] }
  0xb3   : > { %v863_v24 = vld [vmem:[#allocation10 + $0x520] sm:$0xff]  ;;  %1025 = vmatpush.msra.mxu1 %v803_v23  ;;  %v812_v23 = vld [vmem:[#allocation10 + $0x388] sm:$0xff] }
  0xb4   : > { %v927_v25 = vld [vmem:[#allocation10 + $0x720] sm:$0xff]  ;;  %1091 = vmatpush.msra.mxu2 %v863_v24  ;;  %v872_v24 = vld [vmem:[#allocation10 + $0x568] sm:$0xff] }
  0xb5   : > { %v735_v26 = vld [vmem:[#allocation10 + $0x120] sm:$0xff]  ;;  %1156 = vmatpush.msra.mxu3 %v927_v25  ;;  %v936_v25 = vld [vmem:[#allocation10 + $0x768] sm:$0xff] }
  0xb6   : > { %v799_v27 = vld [vmem:[#allocation10 + $0x320] sm:$0xff]  ;;  %961 = vmatpush.msra.mxu0 %v735_v26  ;;  %v744_v26 = vld [vmem:[#allocation10 + $0x168] sm:$0xff] }
  0xb7   : > { %v859_v28 = vld [vmem:[#allocation10 + $0x500] sm:$0xff]  ;;  %1026 = vmatpush.msra.mxu1 %v799_v27  ;;  %v808_v27 = vld [vmem:[#allocation10 + $0x368] sm:$0xff] }
  0xb8   : > { %v923_v29 = vld [vmem:[#allocation10 + $0x700] sm:$0xff]  ;;  %1092 = vmatpush.msra.mxu2 %v859_v28  ;;  %v868_v28 = vld [vmem:[#allocation10 + $0x548] sm:$0xff] }
  0xb9   : > { %v731_v30 = vld [vmem:[#allocation10 + $0x100] sm:$0xff]  ;;  %1157 = vmatpush.msra.mxu3 %v923_v29  ;;  %v932_v29 = vld [vmem:[#allocation10 + $0x748] sm:$0xff] }
  0xba   : > { %v795_v31 = vld [vmem:[#allocation10 + $0x300] sm:$0xff]  ;;  %962 = vmatpush.msra.mxu0 %v731_v30  ;;  %v4203_v30 = vld [vmem:[%s4141_s26 + $0x50] sm:$0xff] }
  0xbb   : > { %v855_v32 = vld [vmem:[#allocation10 + $0x4e0] sm:$0xff]  ;;  %1027 = vmatpush.msra.mxu1 %v795_v31  ;;  %v4206_v31 = vld [vmem:[%s4141_s26 + $0x58] sm:$0xff] }
  0xbc   : > { %v919_v33 = vld [vmem:[#allocation10 + $0x6e0] sm:$0xff]  ;;  %1093 = vmatpush.msra.mxu2 %v855_v32  ;;  %v740_v32 = vld [vmem:[#allocation10 + $0x148] sm:$0xff] }
  0xbd   : > { %v727_v34 = vld [vmem:[#allocation10 + $0xe0] sm:$0xff]  ;;  %1158 = vmatpush.msra.mxu3 %v919_v33  ;;  %v804_v33 = vld [vmem:[#allocation10 + $0x348] sm:$0xff] }
  0xbe   : > { %v791_v35 = vld [vmem:[#allocation10 + $0x2e0] sm:$0xff]  ;;  %963 = vmatpush.msra.mxu0 %v727_v34 }
  0xbf   : > { %v851_v36 = vld [vmem:[#allocation10 + $0x4c0] sm:$0xff]  ;;  %1028 = vmatpush.msra.mxu1 %v791_v35  ;;  %v4214_v35 = vld [vmem:[%s4141_s26 + $0x48] sm:$0xff] }
  0xc0   : > { %v915_v37 = vld [vmem:[#allocation10 + $0x6c0] sm:$0xff]  ;;  %1094 = vmatpush.msra.mxu2 %v851_v36  ;;  %v864_v36 = vld [vmem:[#allocation10 + $0x528] sm:$0xff] }
  0xc1   : > { %v723_v38 = vld [vmem:[#allocation10 + $0xc0] sm:$0xff]  ;;  %1159 = vmatpush.msra.mxu3 %v915_v37  ;;  %v928_v37 = vld [vmem:[#allocation10 + $0x728] sm:$0xff] }
  0xc2   : > { %v787_v39 = vld [vmem:[#allocation10 + $0x2c0] sm:$0xff]  ;;  %964 = vmatpush.msra.mxu0 %v723_v38  ;;  %v736_v38 = vld [vmem:[#allocation10 + $0x128] sm:$0xff] }
  0xc3   : > { %v847_v40 = vld [vmem:[#allocation10 + $0x4a0] sm:$0xff]  ;;  %1029 = vmatpush.msra.mxu1 %v787_v39  ;;  %v800_v39 = vld [vmem:[#allocation10 + $0x328] sm:$0xff] }
  0xc4   : > { %v911_v41 = vld [vmem:[#allocation10 + $0x6a0] sm:$0xff]  ;;  %1095 = vmatpush.msra.mxu2 %v847_v40  ;;  %v4219_v40 = vld [vmem:[%s4141_s26 + $0x70] sm:$0xff] }
  0xc5   : > { %v719_v42 = vld [vmem:[#allocation10 + $0xa0] sm:$0xff]  ;;  %1160 = vmatpush.msra.mxu3 %v911_v41  ;;  %v4222_v41 = vld [vmem:[%s4141_s26 + $0x78] sm:$0xff] }
  0xc6   : > { %v783_v43 = vld [vmem:[#allocation10 + $0x2a0] sm:$0xff]  ;;  %965 = vmatpush.msra.mxu0 %v719_v42 }
  0xc7   : > { %v843_v44 = vld [vmem:[#allocation10 + $0x480] sm:$0xff]  ;;  %1030 = vmatpush.msra.mxu1 %v783_v43  ;;  %v4230_v43 = vld [vmem:[%s4141_s26 + $0x68] sm:$0xff] }
  0xc8   : > { %v907_v45 = vld [vmem:[#allocation10 + $0x680] sm:$0xff]  ;;  %1096 = vmatpush.msra.mxu2 %v843_v44  ;;  %v860_v44 = vld [vmem:[#allocation10 + $0x508] sm:$0xff] }
  0xc9   : > { %v715_v46 = vld [vmem:[#allocation10 + $0x80] sm:$0xff]  ;;  %1161 = vmatpush.msra.mxu3 %v907_v45  ;;  %v924_v45 = vld [vmem:[#allocation10 + $0x708] sm:$0xff] }
  0xca   : > { %v779_v47 = vld [vmem:[#allocation10 + $0x280] sm:$0xff]  ;;  %966 = vmatpush.msra.mxu0 %v715_v46  ;;  %v732_v46 = vld [vmem:[#allocation10 + $0x108] sm:$0xff] }
  0xcb   : > { %v839_v48 = vld [vmem:[#allocation10 + $0x460] sm:$0xff]  ;;  %1031 = vmatpush.msra.mxu1 %v779_v47  ;;  %v796_v47 = vld [vmem:[#allocation10 + $0x308] sm:$0xff] }
  0xcc   : > { %v903_v49 = vld [vmem:[#allocation10 + $0x660] sm:$0xff]  ;;  %1097 = vmatpush.msra.mxu2 %v839_v48  ;;  %v4235_v48 = vld [vmem:[%s4141_s26 + $0x90] sm:$0xff] }
  0xcd   : > { %v711_v50 = vld [vmem:[#allocation10 + $0x60] sm:$0xff]  ;;  %1162 = vmatpush.msra.mxu3 %v903_v49  ;;  %v4238_v49 = vld [vmem:[%s4141_s26 + $0x98] sm:$0xff] }
  0xce   : > { %v775_v51 = vld [vmem:[#allocation10 + $0x260] sm:$0xff]  ;;  %967 = vmatpush.msra.mxu0 %v711_v50 }
  0xcf   : > { %v835_v52 = vld [vmem:[#allocation10 + $0x440] sm:$0xff]  ;;  %1032 = vmatpush.msra.mxu1 %v775_v51  ;;  %v4246_v51 = vld [vmem:[%s4141_s26 + $0x88] sm:$0xff] }
  0xd0   : > { %v899_v53 = vld [vmem:[#allocation10 + $0x640] sm:$0xff]  ;;  %1098 = vmatpush.msra.mxu2 %v835_v52  ;;  %v856_v52 = vld [vmem:[#allocation10 + $0x4e8] sm:$0xff] }
  0xd1   : > { %v707_v54 = vld [vmem:[#allocation10 + $0x40] sm:$0xff]  ;;  %1163 = vmatpush.msra.mxu3 %v899_v53  ;;  %v920_v53 = vld [vmem:[#allocation10 + $0x6e8] sm:$0xff] }
  0xd2   : > { %v771_v55 = vld [vmem:[#allocation10 + $0x240] sm:$0xff]  ;;  %968 = vmatpush.msra.mxu0 %v707_v54  ;;  %v728_v54 = vld [vmem:[#allocation10 + $0xe8] sm:$0xff] }
  0xd3   : > { %v831_v56 = vld [vmem:[#allocation10 + $0x420] sm:$0xff]  ;;  %1033 = vmatpush.msra.mxu1 %v771_v55  ;;  %v792_v55 = vld [vmem:[#allocation10 + $0x2e8] sm:$0xff] }
  0xd4   : > { %v895_v57 = vld [vmem:[#allocation10 + $0x620] sm:$0xff]  ;;  %1099 = vmatpush.msra.mxu2 %v831_v56  ;;  %v4251_v56 = vld [vmem:[%s4141_s26 + $0xb0] sm:$0xff] }
  0xd5   : > { %v703_v58 = vld [vmem:[#allocation10 + $0x20] sm:$0xff]  ;;  %1164 = vmatpush.msra.mxu3 %v895_v57  ;;  %v4254_v57 = vld [vmem:[%s4141_s26 + $0xb8] sm:$0xff] }
  0xd6   : > { %v767_v59 = vld [vmem:[#allocation10 + $0x220] sm:$0xff]  ;;  %969 = vmatpush.msra.mxu0 %v703_v58 }
  0xd7   : > { %v827_v60 = vld [vmem:[#allocation10 + $0x400] sm:$0xff]  ;;  %1034 = vmatpush.msra.mxu1 %v767_v59  ;;  %v4262_v59 = vld [vmem:[%s4141_s26 + $0xa8] sm:$0xff] }
  0xd8   : > { %v891_v61 = vld [vmem:[#allocation10 + $0x600] sm:$0xff]  ;;  %1100 = vmatpush.msra.mxu2 %v827_v60  ;;  %v852_v60 = vld [vmem:[#allocation10 + $0x4c8] sm:$0xff] }
  0xd9   : > { %1165 = vmatpush.msra.mxu3 %v891_v61  ;;  %v699_v2 = vld [vmem:[#allocation10] sm:$0xff]  ;;  %1101 = vmatmul.f32.vlgmr.msra.gmra.mxu2 %v4171_v62  ;;  %v916_v61 = vld [vmem:[#allocation10 + $0x6c8] sm:$0xff] }
  0xda   : > { %v763_v3 = vld [vmem:[#allocation10 + $0x200] sm:$0xff]  ;;  %1166 = vmatmul.f32.vlgmr.msra.gmra.mxu3 %v4174_v63  ;;  %1345 = vmatpush.msrb.mxu2 %v888_v0  ;;  %v724_v0 = vld [vmem:[#allocation10 + $0xc8] sm:$0xff] }
  0xdb   : > { %v4179_v4 = vld [vmem:[%s4141_s26] sm:$0xff]  ;;  %1410 = vmatpush.msrb.mxu3 %v952_v1  ;;  %970 = vmatpush.msra.mxu0 %v699_v2  ;;  %v788_v1 = vld [vmem:[#allocation10 + $0x2c8] sm:$0xff]  ;;  %v4267_v2 = vld [vmem:[%s4141_s26 + $0xd0] sm:$0xff] }
  0xdc   : > { %1035 = vmatpush.msra.mxu1 %v763_v3  ;;  %971 = vmatmul.f32.vlgmr.msra.gmra.mxu0 %v4179_v4  ;;  %v4195_v20 = vld [vmem:[%s4141_s26 + $0x20] sm:$0xff]  ;;  %v4270_v3 = vld [vmem:[%s4141_s26 + $0xd8] sm:$0xff] }
  0xdd   : > { %1036 = vmatmul.f32.vlgmr.msra.gmra.mxu1 %v4182_v5  ;;  %1215 = vmatpush.msrb.mxu0 %v760_v6  ;;  %v4209_v34 = vld [vmem:[%s4141_s26 + $0x40] sm:$0xff] }
  0xde   : > { %1280 = vmatpush.msrb.mxu1 %v824_v7  ;;  %1346 = vmatpush.msrb.mxu2 %v884_v8  ;;  %v4225_v42 = vld [vmem:[%s4141_s26 + $0x60] sm:$0xff]  ;;  %v4278_v7 = vld [vmem:[%s4141_s26 + $0xc8] sm:$0xff] }
  0xdf   : > { %1411 = vmatpush.msrb.mxu3 %v948_v9  ;;  %1216 = vmatpush.msrb.mxu0 %v756_v10  ;;  %v4241_v50 = vld [vmem:[%s4141_s26 + $0x80] sm:$0xff]  ;;  %v848_v8 = vld [vmem:[#allocation10 + $0x4a8] sm:$0xff] }
  0xe0   : > { %1281 = vmatpush.msrb.mxu1 %v820_v11  ;;  %1347 = vmatpush.msrb.mxu2 %v880_v12  ;;  %v4257_v58 = vld [vmem:[%s4141_s26 + $0xa0] sm:$0xff]  ;;  %v912_v9 = vld [vmem:[#allocation10 + $0x6a8] sm:$0xff]  ;;  %v4283_v12 = vld [vmem:[%s4141_s26 + $0xf0] sm:$0xff] }
  0xe1   : > { %1412 = vmatpush.msrb.mxu3 %v944_v13  ;;  %1104 = vmatmul.f32.gmra.mxu2 %v4187_v14  ;;  %v4273_v6 = vld [vmem:[%s4141_s26 + $0xc0] sm:$0xff]  ;;  %v720_v10 = vld [vmem:[#allocation10 + $0xa8] sm:$0xff]  ;;  %v4286_v13 = vld [vmem:[%s4141_s26 + $0xf8] sm:$0xff] }
  0xe2   : > { %1169 = vmatmul.f32.gmra.mxu3 %v4190_v15  ;;  %1217 = vmatpush.msrb.mxu0 %v752_v16  ;;  %v784_v11 = vld [vmem:[#allocation10 + $0x2a8] sm:$0xff]  ;;  %v4289_v16 = vld [vmem:[%s4141_s26 + $0xe0] sm:$0xff] }
  0xe3   : > { %1282 = vmatpush.msrb.mxu1 %v816_v17  ;;  %1348 = vmatpush.msrb.mxu2 %v876_v18  ;;  %v4294_v17 = vld [vmem:[%s4141_s26 + $0xe8] sm:$0xff] }
  0xe4   : > { %1413 = vmatpush.msrb.mxu3 %v940_v19  ;;  %974 = vmatmul.f32.gmra.mxu0 %v4195_v20  ;;  %v844_v18 = vld [vmem:[#allocation10 + $0x488] sm:$0xff] }
  0xe5   : > { %1039 = vmatmul.f32.gmra.mxu1 %v4198_v21  ;;  %1218 = vmatpush.msrb.mxu0 %v748_v22  ;;  %v908_v19 = vld [vmem:[#allocation10 + $0x688] sm:$0xff] }
  0xe6   : > { %1283 = vmatpush.msrb.mxu1 %v812_v23  ;;  %1349 = vmatpush.msrb.mxu2 %v872_v24  ;;  %v716_v22 = vld [vmem:[#allocation10 + $0x88] sm:$0xff]  ;;  %v4299_v24 = vld [vmem:[%s4141_s26 + $0x110] sm:$0xff] }
  0xe7   : > { %1414 = vmatpush.msrb.mxu3 %v936_v25  ;;  %1219 = vmatpush.msrb.mxu0 %v744_v26  ;;  %v780_v23 = vld [vmem:[#allocation10 + $0x288] sm:$0xff]  ;;  %v4302_v25 = vld [vmem:[%s4141_s26 + $0x118] sm:$0xff]  ;;  %v4305_v26 = vld [vmem:[%s4141_s26 + $0x100] sm:$0xff] }
  0xe8   : > { %1284 = vmatpush.msrb.mxu1 %v808_v27  ;;  %1350 = vmatpush.msrb.mxu2 %v868_v28  ;;  %v4310_v27 = vld [vmem:[%s4141_s26 + $0x108] sm:$0xff] }
  0xe9   : > { %1415 = vmatpush.msrb.mxu3 %v932_v29  ;;  %1107 = vmatmul.f32.gmra.mxu2 %v4203_v30  ;;  %v840_v28 = vld [vmem:[#allocation10 + $0x468] sm:$0xff] }
  0xea   : > { %1172 = vmatmul.f32.gmra.mxu3 %v4206_v31  ;;  %1220 = vmatpush.msrb.mxu0 %v740_v32  ;;  %v904_v29 = vld [vmem:[#allocation10 + $0x668] sm:$0xff] }
  0xeb   : > { %1285 = vmatpush.msrb.mxu1 %v804_v33  ;;  %1351 = vmatpush.msrb.mxu2 %v864_v36  ;;  %v712_v32 = vld [vmem:[#allocation10 + $0x68] sm:$0xff]  ;;  %v4315_v36 = vld [vmem:[%s4141_s26 + $0x130] sm:$0xff] }
  0xec   : > { %1416 = vmatpush.msrb.mxu3 %v928_v37  ;;  %977 = vmatmul.f32.gmra.mxu0 %v4209_v34  ;;  %v776_v33 = vld [vmem:[#allocation10 + $0x268] sm:$0xff]  ;;  %v4318_v37 = vld [vmem:[%s4141_s26 + $0x138] sm:$0xff] }
  0xed   : > { %1042 = vmatmul.f32.gmra.mxu1 %v4214_v35  ;;  %1221 = vmatpush.msrb.mxu0 %v736_v38  ;;  %v4321_v38 = vld [vmem:[%s4141_s26 + $0x120] sm:$0xff] }
  0xee   : > { %1286 = vmatpush.msrb.mxu1 %v800_v39  ;;  %1352 = vmatpush.msrb.mxu2 %v860_v44  ;;  %v4326_v39 = vld [vmem:[%s4141_s26 + $0x128] sm:$0xff] }
  0xef   : > { %1417 = vmatpush.msrb.mxu3 %v924_v45  ;;  %1222 = vmatpush.msrb.mxu0 %v732_v46  ;;  %v836_v44 = vld [vmem:[#allocation10 + $0x448] sm:$0xff] }
  0xf0   : > { %1287 = vmatpush.msrb.mxu1 %v796_v47  ;;  %1353 = vmatpush.msrb.mxu2 %v856_v52  ;;  %v900_v45 = vld [vmem:[#allocation10 + $0x648] sm:$0xff]  ;;  %v4331_v52 = vld [vmem:[%s4141_s26 + $0x150] sm:$0xff] }
  0xf1   : > { %1110 = vmatmul.f32.gmra.mxu2 %v4219_v40  ;;  %1418 = vmatpush.msrb.mxu3 %v920_v53  ;;  %v708_v46 = vld [vmem:[#allocation10 + $0x48] sm:$0xff]  ;;  %v4334_v53 = vld [vmem:[%s4141_s26 + $0x158] sm:$0xff] }
  0xf2   : > { %1175 = vmatmul.f32.gmra.mxu3 %v4222_v41  ;;  %1223 = vmatpush.msrb.mxu0 %v728_v54  ;;  %v772_v47 = vld [vmem:[#allocation10 + $0x248] sm:$0xff]  ;;  %v4337_v54 = vld [vmem:[%s4141_s26 + $0x140] sm:$0xff] }
  0xf3   : > { %1288 = vmatpush.msrb.mxu1 %v792_v55  ;;  %1354 = vmatpush.msrb.mxu2 %v852_v60  ;;  %v4342_v55 = vld [vmem:[%s4141_s26 + $0x148] sm:$0xff] }
  0xf4   : > { %980 = vmatmul.f32.gmra.mxu0 %v4225_v42  ;;  %1419 = vmatpush.msrb.mxu3 %v916_v61  ;;  %v832_v60 = vld [vmem:[#allocation10 + $0x428] sm:$0xff] }
  0xf5   : > { %1045 = vmatmul.f32.gmra.mxu1 %v4230_v43  ;;  %1224 = vmatpush.msrb.mxu0 %v724_v0  ;;  %v896_v61 = vld [vmem:[#allocation10 + $0x628] sm:$0xff] }
  0xf6   : > { %1289 = vmatpush.msrb.mxu1 %v788_v1  ;;  %1355 = vmatpush.msrb.mxu2 %v848_v8  ;;  %v704_v0 = vld [vmem:[#allocation10 + $0x28] sm:$0xff]  ;;  %v4347_v8 = vld [vmem:[%s4141_s26 + $0x170] sm:$0xff] }
  0xf7   : > { %1420 = vmatpush.msrb.mxu3 %v912_v9  ;;  %1225 = vmatpush.msrb.mxu0 %v720_v10  ;;  %v768_v1 = vld [vmem:[#allocation10 + $0x228] sm:$0xff]  ;;  %v4350_v9 = vld [vmem:[%s4141_s26 + $0x178] sm:$0xff]  ;;  %v4353_v10 = vld [vmem:[%s4141_s26 + $0x160] sm:$0xff] }
  0xf8   : > { %1290 = vmatpush.msrb.mxu1 %v784_v11  ;;  %1356 = vmatpush.msrb.mxu2 %v844_v18  ;;  %v4358_v11 = vld [vmem:[%s4141_s26 + $0x168] sm:$0xff] }
  0xf9   : > { %1113 = vmatmul.f32.gmra.mxu2 %v4235_v48  ;;  %1421 = vmatpush.msrb.mxu3 %v908_v19  ;;  %v828_v18 = vld [vmem:[#allocation10 + $0x408] sm:$0xff] }
  0xfa   : > { %1178 = vmatmul.f32.gmra.mxu3 %v4238_v49  ;;  %1226 = vmatpush.msrb.mxu0 %v716_v22  ;;  %v892_v19 = vld [vmem:[#allocation10 + $0x608] sm:$0xff] }
  0xfb   : > { %1291 = vmatpush.msrb.mxu1 %v780_v23  ;;  %1357 = vmatpush.msrb.mxu2 %v840_v28  ;;  %v700_v22 = vld [vmem:[#allocation10 + $0x8] sm:$0xff]  ;;  %v4363_v28 = vld [vmem:[%s4141_s26 + $0x190] sm:$0xff] }
  0xfc   : > { %983 = vmatmul.f32.gmra.mxu0 %v4241_v50  ;;  %1422 = vmatpush.msrb.mxu3 %v904_v29  ;;  %v764_v23 = vld [vmem:[#allocation10 + $0x208] sm:$0xff]  ;;  %v4366_v29 = vld [vmem:[%s4141_s26 + $0x198] sm:$0xff] }
  0xfd   : > { %1048 = vmatmul.f32.gmra.mxu1 %v4246_v51  ;;  %1227 = vmatpush.msrb.mxu0 %v712_v32  ;;  %v4371_v32 = vld [vmem:[%s4141_s26 + $0x180] sm:$0xff] }
  0xfe   : > { %1292 = vmatpush.msrb.mxu1 %v776_v33  ;;  %1358 = vmatpush.msrb.mxu2 %v836_v44  ;;  %v4374_v33 = vld [vmem:[%s4141_s26 + $0x188] sm:$0xff]  ;;  %v889_v44 = vld [vmem:[#allocation10 + $0x5f0] sm:$0xff] }
  0xff   : > { %1423 = vmatpush.msrb.mxu3 %v900_v45  ;;  %1228 = vmatpush.msrb.mxu0 %v708_v46  ;;  %v953_v45 = vld [vmem:[#allocation10 + $0x7f0] sm:$0xff] }
 0x100   : > { %1293 = vmatpush.msrb.mxu1 %v772_v47  ;;  %1359 = vmatpush.msrb.mxu2 %v832_v60  ;;  %v761_v46 = vld [vmem:[#allocation10 + $0x1f0] sm:$0xff] }
 0x101   : > { %1116 = vmatmul.f32.gmra.mxu2 %v4251_v56  ;;  %1424 = vmatpush.msrb.mxu3 %v896_v61  ;;  %v825_v47 = vld [vmem:[#allocation10 + $0x3f0] sm:$0xff]  ;;  %v4382_v61 = vld [vmem:[%s4141_s26 + $0x1b8] sm:$0xff] }
 0x102   : > { %1181 = vmatmul.f32.gmra.mxu3 %v4254_v57  ;;  %1229 = vmatpush.msrb.mxu0 %v704_v0  ;;  %v4379_v60 = vld [vmem:[%s4141_s26 + $0x1b0] sm:$0xff]  ;;  %v4387_v0 = vld [vmem:[%s4141_s26 + $0x1a0] sm:$0xff] }
 0x103   : > { %1294 = vmatpush.msrb.mxu1 %v768_v1  ;;  %1360 = vmatpush.msrb.mxu2 %v828_v18  ;;  %5559 = vst [vmem:[#allocation37_spill] sm:$0xff] %v4387_v0  ;;  %v4390_v1 = vld [vmem:[%s4141_s26 + $0x1a8] sm:$0xff]  ;;  %v885_v18 = vld [vmem:[#allocation10 + $0x5d0] sm:$0xff] }
 0x104   : > { %986 = vmatmul.f32.gmra.mxu0 %v4257_v58  ;;  %1425 = vmatpush.msrb.mxu3 %v892_v19  ;;  %5560 = vst [vmem:[#allocation38_spill] sm:$0xff] %v4390_v1  ;;  %v949_v19 = vld [vmem:[#allocation10 + $0x7d0] sm:$0xff] }
 0x105   : > { %1051 = vmatmul.f32.gmra.mxu1 %v4262_v59  ;;  %1230 = vmatpush.msrb.mxu0 %v700_v22  ;;  %v757_v22 = vld [vmem:[#allocation10 + $0x1d0] sm:$0xff] }
 0x106   : > { %1295 = vmatpush.msrb.mxu1 %v764_v23  ;;  %1605 = vmatpush.msra.mxu2 %v889_v44  ;;  %v821_v23 = vld [vmem:[#allocation10 + $0x3d0] sm:$0xff] }
 0x107   : > { %1670 = vmatpush.msra.mxu3 %v953_v45  ;;  %1475 = vmatpush.msra.mxu0 %v761_v46  ;;  %v4395_v44 = vld [vmem:[%s4141_s26 + $0x1d0] sm:$0xff]  ;;  %v4398_v45 = vld [vmem:[%s4141_s26 + $0x1d8] sm:$0xff]  ;;  %v4403_v46 = vld [vmem:[%s4141_s26 + $0x1c0] sm:$0xff] }
 0x108   : > { %1540 = vmatpush.msra.mxu1 %v825_v47  ;;  %1606 = vmatpush.msra.mxu2 %v885_v18  ;;  %5561 = vst [vmem:[#allocation39_spill] sm:$0xff] %v4395_v44  ;;  %v4406_v47 = vld [vmem:[%s4141_s26 + $0x1c8] sm:$0xff]  ;;  %v881_v18 = vld [vmem:[#allocation10 + $0x5b0] sm:$0xff] }
 0x109   : > { %1119 = vmatmul.f32.gmra.mxu2 %v4267_v2  ;;  %1671 = vmatpush.msra.mxu3 %v949_v19  ;;  %5562 = vst [vmem:[#allocation40_spill] sm:$0xff] %v4398_v45  ;;  %v945_v19 = vld [vmem:[#allocation10 + $0x7b0] sm:$0xff] }
 0x10a   : > { %1184 = vmatmul.f32.gmra.mxu3 %v4270_v3  ;;  %1476 = vmatpush.msra.mxu0 %v757_v22  ;;  %5563 = vst [vmem:[#allocation41_spill] sm:$0xff] %v4403_v46  ;;  %v753_v22 = vld [vmem:[#allocation10 + $0x1b0] sm:$0xff] }
 0x10b   : > { %1541 = vmatpush.msra.mxu1 %v821_v23  ;;  %5564 = vst [vmem:[#allocation42_spill] sm:$0xff] %v4406_v47  ;;  %1607 = vmatpush.msra.mxu2 %v881_v18  ;;  %v817_v23 = vld [vmem:[#allocation10 + $0x3b0] sm:$0xff]  ;;  %v4422_v18 = vld [vmem:[%s4141_s26 + $0x1e8] sm:$0xff] }
 0x10c   : > { %989 = vmatmul.f32.gmra.mxu0 %v4273_v6  ;;  %1672 = vmatpush.msra.mxu3 %v945_v19  ;;  %5568 = vst [vmem:[#allocation46_spill] sm:$0xff] %v4422_v18  ;;  %v877_v19 = vld [vmem:[#allocation10 + $0x590] sm:$0xff] }
 0x10d   : > { %1054 = vmatmul.f32.gmra.mxu1 %v4278_v7  ;;  %1477 = vmatpush.msra.mxu0 %v753_v22 }
 0x10e   : > { %1542 = vmatpush.msra.mxu1 %v817_v23  ;;  %1608 = vmatpush.msra.mxu2 %v877_v19  ;;  %v937_v19 = vld [vmem:[#allocation10 + $0x770] sm:$0xff] }
 0x111   : > { %1122 = vmatmul.f32.gmra.mxu2 %v4283_v12 }
 0x112   : > { %1187 = vmatmul.f32.gmra.mxu3 %v4286_v13 }
 0x114   : > { %992 = vmatmul.f32.gmra.mxu0 %v4289_v16 }
 0x115   : > { %1057 = vmatmul.f32.gmra.mxu1 %v4294_v17 }
 0x119   : > { %1125 = vmatmul.f32.gmra.mxu2 %v4299_v24 }
 0x11a   : > { %1190 = vmatmul.f32.gmra.mxu3 %v4302_v25 }
 0x11c   : > { %995 = vmatmul.f32.gmra.mxu0 %v4305_v26 }
 0x11d   : > { %1060 = vmatmul.f32.gmra.mxu1 %v4310_v27 }
 0x121   : > { %1128 = vmatmul.f32.gmra.mxu2 %v4315_v36 }
 0x122   : > { %1193 = vmatmul.f32.gmra.mxu3 %v4318_v37 }
 0x124   : > { %998 = vmatmul.f32.gmra.mxu0 %v4321_v38 }
 0x125   : > { %1063 = vmatmul.f32.gmra.mxu1 %v4326_v39 }
 0x129   : > { %1131 = vmatmul.f32.gmra.mxu2 %v4331_v52 }
 0x12a   : > { %1196 = vmatmul.f32.gmra.mxu3 %v4334_v53 }
 0x12c   : > { %1001 = vmatmul.f32.gmra.mxu0 %v4337_v54 }
 0x12d   : > { %1066 = vmatmul.f32.gmra.mxu1 %v4342_v55 }
 0x131   : > { %1134 = vmatmul.f32.gmra.mxu2 %v4347_v8 }
 0x132   : > { %1199 = vmatmul.f32.gmra.mxu3 %v4350_v9 }
 0x134   : > { %1004 = vmatmul.f32.gmra.mxu0 %v4353_v10 }
 0x135   : > { %1069 = vmatmul.f32.gmra.mxu1 %v4358_v11 }
 0x139   : > { %1137 = vmatmul.f32.gmra.mxu2 %v4363_v28 }
 0x13a   : > { %1202 = vmatmul.f32.gmra.mxu3 %v4366_v29 }
 0x13c   : > { %1007 = vmatmul.f32.gmra.mxu0 %v4371_v32 }
 0x13d   : > { %1072 = vmatmul.f32.gmra.mxu1 %v4374_v33 }
 0x141   : > { %1140 = vmatmul.f32.gmra.mxu2 %v4379_v60 }
 0x142   : > { %1205 = vmatmul.f32.gmra.mxu3 %v4382_v61 }
 0x144   : > { %1010 = vmatmul.f32.gmra.mxu0 %v4387_v0  ;;  %v813_v0 = vld [vmem:[#allocation10 + $0x390] sm:$0xff] }
 0x145   : > { %1075 = vmatmul.f32.gmra.mxu1 %v4390_v1  ;;  %v4411_v1 = vld [vmem:[%s4141_s26 + $0x1f0] sm:$0xff] }
 0x146   : > { %5565 = vst [vmem:[#allocation43_spill] sm:$0xff] %v4411_v1  ;;  %1543 = vmatpush.msra.mxu1 %v813_v0  ;;  %v809_v0 = vld [vmem:[#allocation10 + $0x370] sm:$0xff] }
 0x148   : > { %1544 = vmatpush.msra.mxu1 %v809_v0 }
 0x149   : > { %1143 = vmatmul.f32.gmra.mxu2 %v4395_v44  ;;  %v4414_v44 = vld [vmem:[%s4141_s26 + $0x1f8] sm:$0xff] }
 0x14a   : > { %1208 = vmatmul.f32.gmra.mxu3 %v4398_v45  ;;  %5566 = vst [vmem:[#allocation44_spill] sm:$0xff] %v4414_v44  ;;  %v4419_v45 = vld [vmem:[%s4141_s26 + $0x1e0] sm:$0xff] }
 0x14b   : > { %5567 = vst [vmem:[#allocation45_spill] sm:$0xff] %v4419_v45 }
 0x14c   : > { %1013 = vmatmul.f32.gmra.mxu0 %v4403_v46  ;;  %v941_v46 = vld [vmem:[#allocation10 + $0x790] sm:$0xff] }
 0x14d   : > { %1078 = vmatmul.f32.gmra.mxu1 %v4406_v47  ;;  %1673 = vmatpush.msra.mxu3 %v941_v46  ;;  %v749_v47 = vld [vmem:[#allocation10 + $0x190] sm:$0xff] }
 0x14e   : > { %1478 = vmatpush.msra.mxu0 %v749_v47  ;;  %v745_v47 = vld [vmem:[#allocation10 + $0x170] sm:$0xff] }
 0x14f   : > { %1674 = vmatpush.msra.mxu3 %v937_v19 }
 0x150   : > { %1479 = vmatpush.msra.mxu0 %v745_v47  ;;  %v865_v47 = vld [vmem:[#allocation10 + $0x530] sm:$0xff] }
 0x151   : > { %1146 = vmatmul.f32.gmra.mxu2 %v4411_v1 }
 0x152   : > { %1211 = vmatmul.f32.gmra.mxu3 %v4414_v44  ;;  %v873_v44 = vld [vmem:[#allocation10 + $0x570] sm:$0xff] }
 0x153   : > { %1609 = vmatpush.msra.mxu2 %v873_v44  ;;  %v869_v44 = vld [vmem:[#allocation10 + $0x550] sm:$0xff] }
 0x154   : > { %1016 = vmatmul.f32.gmra.mxu0 %v4419_v45 }
 0x155   : > { %1081 = vmatmul.f32.gmra.mxu1 %v4422_v18  ;;  %1610 = vmatpush.msra.mxu2 %v869_v44  ;;  %v737_v44 = vld [vmem:[#allocation10 + $0x130] sm:$0xff] }
 0x157   : > { %1611 = vmatpush.msra.mxu2 %v865_v47  ;;  %v857_v47 = vld [vmem:[#allocation10 + $0x4f0] sm:$0xff] }
 0x159   : > { %1361 = vmatmul.f32.vlgmr.msrb.gmra.mxu2 %v4171_v62  ;;  %v972_v22 = vpop.f32.mrf.mxu0 }
 0x15a   : > { %v1037_v23 = vpop.f32.mrf.mxu1  ;;  %1426 = vmatmul.f32.vlgmr.msrb.gmra.mxu3 %v4174_v63 }
 0x15b   : > { %v1038_v1 = vadd.f32 %v1037_v23, %v972_v22 }
 0x15c   : > { %v1102_v46 = vpop.f32.mrf.mxu2  ;;  %1231 = vmatmul.f32.vlgmr.msrb.gmra.mxu0 %v4179_v4  ;;  %v933_v4 = vld [vmem:[#allocation10 + $0x750] sm:$0xff] }
 0x15d   : > { %1296 = vmatmul.f32.vlgmr.msrb.gmra.mxu1 %v4182_v5  ;;  %v1167_v18 = vpop.f32.mrf.mxu3  ;;  %v1103_v45 = vadd.f32 %v1102_v46, %v1038_v1  ;;  %1675 = vmatpush.msra.mxu3 %v933_v4 }
 0x15f   : > { %v4430_v62 = vadd.f32 %v1167_v18, %v1103_v45  ;;  %v741_v45 = vld [vmem:[#allocation10 + $0x150] sm:$0xff] }
 0x160   : > { %v805_v18 = vld [vmem:[#allocation10 + $0x350] sm:$0xff]  ;;  %1480 = vmatpush.msra.mxu0 %v741_v45 }
 0x161   : > { %5569 = vst [vmem:[#allocation47_spill] sm:$0xff] %v4430_v62  ;;  %1364 = vmatmul.f32.gmra.mxu2 %v4187_v14  ;;  %v975_v63 = vpop.f32.mrf.mxu0  ;;  %1545 = vmatpush.msra.mxu1 %v805_v18  ;;  %v733_v18 = vld [vmem:[#allocation10 + $0x110] sm:$0xff]  ;;  %v4769_v62 = vld [vmem:[%s4141_s26 + $0x1a0] sm:$0xff] }
 0x162   : > { %v1040_v22 = vpop.f32.mrf.mxu1  ;;  %1429 = vmatmul.f32.gmra.mxu3 %v4190_v15  ;;  %1481 = vmatpush.msra.mxu0 %v737_v44  ;;  %5615 = vst [vmem:[#allocation73_spill] sm:$0xff] %v4769_v62 }
 0x163   : > { %v1041_v23 = vadd.f32 %v1040_v22, %v975_v63 }
 0x164   : > { %v1105_v5 = vpop.f32.mrf.mxu2  ;;  %1234 = vmatmul.f32.gmra.mxu0 %v4195_v20  ;;  %v929_v20 = vld [vmem:[#allocation10 + $0x730] sm:$0xff] }
 0x165   : > { %1299 = vmatmul.f32.gmra.mxu1 %v4198_v21  ;;  %v1170_v1 = vpop.f32.mrf.mxu3  ;;  %v1106_v19 = vadd.f32 %v1105_v5, %v1041_v23  ;;  %1676 = vmatpush.msra.mxu3 %v929_v20  ;;  %v801_v23 = vld [vmem:[#allocation10 + $0x330] sm:$0xff] }
 0x166   : > { %1546 = vmatpush.msra.mxu1 %v801_v23  ;;  %v861_v5 = vld [vmem:[#allocation10 + $0x510] sm:$0xff]  ;;  %1482 = vmatpush.msra.mxu0 %v733_v18 }
 0x167   : > { %v4436_v14 = vadd.f32 %v1170_v1, %v1106_v19  ;;  %1612 = vmatpush.msra.mxu2 %v861_v5  ;;  %v853_v23 = vld [vmem:[#allocation10 + $0x4d0] sm:$0xff] }
 0x169   : > { %5570 = vst [vmem:[#allocation48_spill] sm:$0xff] %v4436_v14  ;;  %1367 = vmatmul.f32.gmra.mxu2 %v4203_v30  ;;  %v978_v15 = vpop.f32.mrf.mxu0 }
 0x16a   : > { %v1043_v46 = vpop.f32.mrf.mxu1  ;;  %1432 = vmatmul.f32.gmra.mxu3 %v4206_v31  ;;  %1613 = vmatpush.msra.mxu2 %v857_v47 }
 0x16b   : > { %v1044_v0 = vadd.f32 %v1043_v46, %v978_v15  ;;  %v797_v15 = vld [vmem:[#allocation10 + $0x310] sm:$0xff] }
 0x16c   : > { %v1108_v21 = vpop.f32.mrf.mxu2  ;;  %1237 = vmatmul.f32.gmra.mxu0 %v4209_v34  ;;  %v925_v34 = vld [vmem:[#allocation10 + $0x710] sm:$0xff]  ;;  %1547 = vmatpush.msra.mxu1 %v797_v15 }
 0x16d   : > { %1302 = vmatmul.f32.gmra.mxu1 %v4214_v35  ;;  %v1173_v63 = vpop.f32.mrf.mxu3  ;;  %v1109_v22 = vadd.f32 %v1108_v21, %v1044_v0  ;;  %1677 = vmatpush.msra.mxu3 %v925_v34  ;;  %v789_v34 = vld [vmem:[#allocation10 + $0x2d0] sm:$0xff] }
 0x16e   : > { %1614 = vmatpush.msra.mxu2 %v853_v23 }
 0x16f   : > { %v4442_v30 = vadd.f32 %v1173_v63, %v1109_v22  ;;  %v729_v63 = vld [vmem:[#allocation10 + $0xf0] sm:$0xff] }
 0x170   : > { %v793_v22 = vld [vmem:[#allocation10 + $0x2f0] sm:$0xff]  ;;  %1483 = vmatpush.msra.mxu0 %v729_v63 }
 0x171   : > { %5571 = vst [vmem:[#allocation49_spill] sm:$0xff] %v4442_v30  ;;  %1370 = vmatmul.f32.gmra.mxu2 %v4219_v40  ;;  %v981_v31 = vpop.f32.mrf.mxu0  ;;  %1548 = vmatpush.msra.mxu1 %v793_v22  ;;  %v781_v63 = vld [vmem:[#allocation10 + $0x290] sm:$0xff] }
 0x172   : > { %v1046_v4 = vpop.f32.mrf.mxu1  ;;  %1435 = vmatmul.f32.gmra.mxu3 %v4222_v41 }
 0x173   : > { %v1047_v1 = vadd.f32 %v1046_v4, %v981_v31  ;;  %1549 = vmatpush.msra.mxu1 %v789_v34 }
 0x174   : > { %v1111_v35 = vpop.f32.mrf.mxu2  ;;  %1240 = vmatmul.f32.gmra.mxu0 %v4225_v42  ;;  %v921_v42 = vld [vmem:[#allocation10 + $0x6f0] sm:$0xff] }
 0x175   : > { %1305 = vmatmul.f32.gmra.mxu1 %v4230_v43  ;;  %v1176_v19 = vpop.f32.mrf.mxu3  ;;  %v1112_v45 = vadd.f32 %v1111_v35, %v1047_v1  ;;  %1678 = vmatpush.msra.mxu3 %v921_v42  ;;  %v725_v1 = vld [vmem:[#allocation10 + $0xd0] sm:$0xff] }
 0x176   : > { %1484 = vmatpush.msra.mxu0 %v725_v1 }
 0x177   : > { %v4448_v40 = vadd.f32 %v1176_v19, %v1112_v45  ;;  %v849_v19 = vld [vmem:[#allocation10 + $0x4b0] sm:$0xff] }
 0x178   : > { %1615 = vmatpush.msra.mxu2 %v849_v19  ;;  %v773_v19 = vld [vmem:[#allocation10 + $0x250] sm:$0xff] }
 0x179   : > { %5572 = vst [vmem:[#allocation50_spill] sm:$0xff] %v4448_v40  ;;  %1373 = vmatmul.f32.gmra.mxu2 %v4235_v48  ;;  %v984_v41 = vpop.f32.mrf.mxu0 }
 0x17a   : > { %v1049_v46 = vpop.f32.mrf.mxu1  ;;  %1438 = vmatmul.f32.gmra.mxu3 %v4238_v49 }
 0x17b   : > { %v1050_v0 = vadd.f32 %v1049_v46, %v984_v41  ;;  %v721_v41 = vld [vmem:[#allocation10 + $0xb0] sm:$0xff] }
 0x17c   : > { %v1114_v43 = vpop.f32.mrf.mxu2  ;;  %1243 = vmatmul.f32.gmra.mxu0 %v4241_v50  ;;  %v917_v50 = vld [vmem:[#allocation10 + $0x6d0] sm:$0xff] }
 0x17d   : > { %1308 = vmatmul.f32.gmra.mxu1 %v4246_v51  ;;  %v1179_v20 = vpop.f32.mrf.mxu3  ;;  %v1115_v21 = vadd.f32 %v1114_v43, %v1050_v0  ;;  %1679 = vmatpush.msra.mxu3 %v917_v50  ;;  %v785_v46 = vld [vmem:[#allocation10 + $0x2b0] sm:$0xff] }
 0x17e   : > { %1485 = vmatpush.msra.mxu0 %v721_v41  ;;  %1550 = vmatpush.msra.mxu1 %v785_v46  ;;  %v845_v0 = vld [vmem:[#allocation10 + $0x490] sm:$0xff] }
 0x17f   : > { %v4454_v48 = vadd.f32 %v1179_v20, %v1115_v21  ;;  %1616 = vmatpush.msra.mxu2 %v845_v0  ;;  %v717_v21 = vld [vmem:[#allocation10 + $0x90] sm:$0xff] }
 0x180   : > { %1486 = vmatpush.msra.mxu0 %v717_v21  ;;  %1551 = vmatpush.msra.mxu1 %v781_v63  ;;  %v713_v50 = vld [vmem:[#allocation10 + $0x70] sm:$0xff]  ;;  %v890_v21 = vld [vmem:[#allocation10 + $0x5f8] sm:$0xff] }
 0x181   : > { %5573 = vst [vmem:[#allocation51_spill] sm:$0xff] %v4454_v48  ;;  %1376 = vmatmul.f32.gmra.mxu2 %v4251_v56  ;;  %v987_v49 = vpop.f32.mrf.mxu0  ;;  %v705_v41 = vld [vmem:[#allocation10 + $0x30] sm:$0xff]  ;;  %v830_v48 = vld [vmem:[#allocation10 + $0x418] sm:$0xff] }
 0x182   : > { %v1052_v44 = vpop.f32.mrf.mxu1  ;;  %1441 = vmatmul.f32.gmra.mxu3 %v4254_v57  ;;  %1487 = vmatpush.msra.mxu0 %v713_v50  ;;  %v769_v46 = vld [vmem:[#allocation10 + $0x230] sm:$0xff] }
 0x183   : > { %v1053_v31 = vadd.f32 %v1052_v44, %v987_v49  ;;  %v841_v49 = vld [vmem:[#allocation10 + $0x470] sm:$0xff] }
 0x184   : > { %v1117_v51 = vpop.f32.mrf.mxu2  ;;  %1246 = vmatmul.f32.gmra.mxu0 %v4257_v58  ;;  %v913_v58 = vld [vmem:[#allocation10 + $0x6b0] sm:$0xff]  ;;  %1617 = vmatpush.msra.mxu2 %v841_v49  ;;  %v762_v49 = vld [vmem:[#allocation10 + $0x1f8] sm:$0xff] }
 0x185   : > { %1311 = vmatmul.f32.gmra.mxu1 %v4262_v59  ;;  %v1182_v4 = vpop.f32.mrf.mxu3  ;;  %v1118_v5 = vadd.f32 %v1117_v51, %v1053_v31  ;;  %1680 = vmatpush.msra.mxu3 %v913_v58  ;;  %v777_v51 = vld [vmem:[#allocation10 + $0x270] sm:$0xff] }
 0x186   : > { %1552 = vmatpush.msra.mxu1 %v777_v51  ;;  %v833_v58 = vld [vmem:[#allocation10 + $0x430] sm:$0xff] }
 0x187   : > { %v4460_v56 = vadd.f32 %v1182_v4, %v1118_v5  ;;  %v837_v5 = vld [vmem:[#allocation10 + $0x450] sm:$0xff] }
 0x188   : > { %1618 = vmatpush.msra.mxu2 %v837_v5  ;;  %1553 = vmatpush.msra.mxu1 %v773_v19  ;;  %v5583_v50 = vld [vmem:[#allocation38_spill] sm:$0xff]  ;;  %v822_v5 = vld [vmem:[#allocation10 + $0x3d8] sm:$0xff] }
 0x189   : > { %5574 = vst [vmem:[#allocation52_spill] sm:$0xff] %v4460_v56  ;;  %1379 = vmatmul.f32.gmra.mxu2 %v4267_v2  ;;  %v990_v57 = vpop.f32.mrf.mxu0  ;;  %v770_v56 = vld [vmem:[#allocation10 + $0x238] sm:$0xff] }
 0x18a   : > { %v1055_v35 = vpop.f32.mrf.mxu1  ;;  %1444 = vmatmul.f32.gmra.mxu3 %v4270_v3  ;;  %1619 = vmatpush.msra.mxu2 %v833_v58 }
 0x18b   : > { %v1056_v45 = vadd.f32 %v1055_v35, %v990_v57  ;;  %v709_v35 = vld [vmem:[#allocation10 + $0x50] sm:$0xff]  ;;  %1554 = vmatpush.msra.mxu1 %v769_v46 }
 0x18c   : > { %v1120_v59 = vpop.f32.mrf.mxu2  ;;  %1249 = vmatmul.f32.gmra.mxu0 %v4273_v6  ;;  %v909_v6 = vld [vmem:[#allocation10 + $0x690] sm:$0xff] }
 0x18d   : > { %1314 = vmatmul.f32.gmra.mxu1 %v4278_v7  ;;  %v1185_v18 = vpop.f32.mrf.mxu3  ;;  %v1121_v15 = vadd.f32 %v1120_v59, %v1056_v45  ;;  %1681 = vmatpush.msra.mxu3 %v909_v6 }
 0x18e   : > { %1488 = vmatpush.msra.mxu0 %v709_v35  ;;  %v946_v35 = vld [vmem:[#allocation10 + $0x7b8] sm:$0xff] }
 0x18f   : > { %v4466_v2 = vadd.f32 %v1185_v18, %v1121_v15 }
 0x190   : > { %1489 = vmatpush.msra.mxu0 %v705_v41 }
 0x191   : > { %5575 = vst [vmem:[#allocation53_spill] sm:$0xff] %v4466_v2  ;;  %1382 = vmatmul.f32.gmra.mxu2 %v4283_v12  ;;  %v993_v3 = vpop.f32.mrf.mxu0  ;;  %v834_v2 = vld [vmem:[#allocation10 + $0x438] sm:$0xff] }
 0x192   : > { %v1058_v47 = vpop.f32.mrf.mxu1  ;;  %1447 = vmatmul.f32.gmra.mxu3 %v4286_v13 }
 0x193   : > { %v1059_v42 = vadd.f32 %v1058_v47, %v993_v3  ;;  %v829_v47 = vld [vmem:[#allocation10 + $0x410] sm:$0xff] }
 0x194   : > { %v1123_v7 = vpop.f32.mrf.mxu2  ;;  %1252 = vmatmul.f32.gmra.mxu0 %v4289_v16  ;;  %v905_v16 = vld [vmem:[#allocation10 + $0x670] sm:$0xff]  ;;  %1620 = vmatpush.msra.mxu2 %v829_v47 }
 0x195   : > { %1317 = vmatmul.f32.gmra.mxu1 %v4294_v17  ;;  %v1188_v43 = vpop.f32.mrf.mxu3  ;;  %v1124_v20 = vadd.f32 %v1123_v7, %v1059_v42  ;;  %1682 = vmatpush.msra.mxu3 %v905_v16  ;;  %v701_v7 = vld [vmem:[#allocation10 + $0x10] sm:$0xff] }
 0x196   : > { %1490 = vmatpush.msra.mxu0 %v701_v7  ;;  %1865 = vmatpush.msrb.mxu2 %v890_v21  ;;  %v4523_v21 = vld [vmem:[%s4141_s26 + $0x10] sm:$0xff] }
 0x197   : > { %v4472_v12 = vadd.f32 %v1188_v43, %v1124_v20  ;;  %v765_v43 = vld [vmem:[#allocation10 + $0x210] sm:$0xff] }
 0x198   : > { %1555 = vmatpush.msra.mxu1 %v765_v43  ;;  %1735 = vmatpush.msrb.mxu0 %v762_v49  ;;  %v750_v43 = vld [vmem:[#allocation10 + $0x198] sm:$0xff] }
 0x199   : > { %5576 = vst [vmem:[#allocation54_spill] sm:$0xff] %v4472_v12  ;;  %1385 = vmatmul.f32.gmra.mxu2 %v4299_v24  ;;  %v996_v13 = vpop.f32.mrf.mxu0  ;;  %v938_v49 = vld [vmem:[#allocation10 + $0x778] sm:$0xff] }
 0x19a   : > { %v1061_v22 = vpop.f32.mrf.mxu1  ;;  %1450 = vmatmul.f32.gmra.mxu3 %v4302_v25  ;;  %v774_v12 = vld [vmem:[#allocation10 + $0x258] sm:$0xff] }
 0x19b   : > { %v1062_v44 = vadd.f32 %v1061_v22, %v996_v13 }
 0x19c   : > { %v1126_v17 = vpop.f32.mrf.mxu2  ;;  %1255 = vmatmul.f32.gmra.mxu0 %v4305_v26  ;;  %v901_v26 = vld [vmem:[#allocation10 + $0x650] sm:$0xff] }
 0x19d   : > { %1320 = vmatmul.f32.gmra.mxu1 %v4310_v27  ;;  %v1191_v23 = vpop.f32.mrf.mxu3  ;;  %v1127_v31 = vadd.f32 %v1126_v17, %v1062_v44  ;;  %1683 = vmatpush.msra.mxu3 %v901_v26  ;;  %v826_v44 = vld [vmem:[#allocation10 + $0x3f8] sm:$0xff] }
 0x19e   : > { %1800 = vmatpush.msrb.mxu1 %v826_v44  ;;  %v886_v17 = vld [vmem:[#allocation10 + $0x5d8] sm:$0xff] }
 0x19f   : > { %v4478_v24 = vadd.f32 %v1191_v23, %v1127_v31  ;;  %1866 = vmatpush.msrb.mxu2 %v886_v17  ;;  %v5582_v31 = vld [vmem:[#allocation37_spill] sm:$0xff] }
 0x1a0   : > { %1801 = vmatpush.msrb.mxu1 %v822_v5  ;;  %v870_v5 = vld [vmem:[#allocation10 + $0x558] sm:$0xff] }
 0x1a1   : > { %5577 = vst [vmem:[#allocation55_spill] sm:$0xff] %v4478_v24  ;;  %1388 = vmatmul.f32.gmra.mxu2 %v4315_v36  ;;  %v999_v25 = vpop.f32.mrf.mxu0  ;;  %v838_v24 = vld [vmem:[#allocation10 + $0x458] sm:$0xff] }
 0x1a2   : > { %v1064_v4 = vpop.f32.mrf.mxu1  ;;  %1453 = vmatmul.f32.gmra.mxu3 %v4318_v37 }
 0x1a3   : > { %v1065_v1 = vadd.f32 %v1064_v4, %v999_v25  ;;  %v758_v4 = vld [vmem:[#allocation10 + $0x1d8] sm:$0xff] }
 0x1a4   : > { %v1129_v27 = vpop.f32.mrf.mxu2  ;;  %1258 = vmatmul.f32.gmra.mxu0 %v4321_v38  ;;  %v897_v38 = vld [vmem:[#allocation10 + $0x630] sm:$0xff] }
 0x1a5   : > { %1323 = vmatmul.f32.gmra.mxu1 %v4326_v39  ;;  %v1194_v34 = vpop.f32.mrf.mxu3  ;;  %v1130_v57 = vadd.f32 %v1129_v27, %v1065_v1  ;;  %1684 = vmatpush.msra.mxu3 %v897_v38  ;;  %v5585_v1 = vld [vmem:[#allocation39_spill] sm:$0xff]  ;;  %v5586_v27 = vld [vmem:[#allocation40_spill] sm:$0xff] }
 0x1a6   : > { %1736 = vmatpush.msrb.mxu0 %v758_v4  ;;  %v754_v38 = vld [vmem:[#allocation10 + $0x1b8] sm:$0xff] }
 0x1a7   : > { %v4484_v36 = vadd.f32 %v1194_v34, %v1130_v57  ;;  %v882_v34 = vld [vmem:[#allocation10 + $0x5b8] sm:$0xff] }
 0x1a8   : > { %1867 = vmatpush.msrb.mxu2 %v882_v34  ;;  %1737 = vmatpush.msrb.mxu0 %v754_v38  ;;  %v4545_v4 = vld [vmem:[%s4141_s26 + $0x38] sm:$0xff]  ;;  %v4553_v34 = vld [vmem:[%s4141_s26 + $0x28] sm:$0xff] }
 0x1a9   : > { %5578 = vst [vmem:[#allocation56_spill] sm:$0xff] %v4484_v36  ;;  %1391 = vmatmul.f32.gmra.mxu2 %v4331_v52  ;;  %v1002_v37 = vpop.f32.mrf.mxu0  ;;  %v4689_v36 = vld [vmem:[%s4141_s26 + $0x138] sm:$0xff] }
 0x1aa   : > { %v1067_v45 = vpop.f32.mrf.mxu1  ;;  %1456 = vmatmul.f32.gmra.mxu3 %v4334_v53  ;;  %1738 = vmatpush.msrb.mxu0 %v750_v43 }
 0x1ab   : > { %v1068_v59 = vadd.f32 %v1067_v45, %v1002_v37  ;;  %v5587_v37 = vld [vmem:[#allocation41_spill] sm:$0xff]  ;;  %v5588_v45 = vld [vmem:[#allocation42_spill] sm:$0xff] }
 0x1ac   : > { %v1132_v39 = vpop.f32.mrf.mxu2  ;;  %1261 = vmatmul.f32.gmra.mxu0 %v4337_v54  ;;  %v893_v54 = vld [vmem:[#allocation10 + $0x610] sm:$0xff] }
 0x1ad   : > { %1326 = vmatmul.f32.gmra.mxu1 %v4342_v55  ;;  %v1197_v18 = vpop.f32.mrf.mxu3  ;;  %v1133_v15 = vadd.f32 %v1132_v39, %v1068_v59  ;;  %1685 = vmatpush.msra.mxu3 %v893_v54  ;;  %v818_v39 = vld [vmem:[#allocation10 + $0x3b8] sm:$0xff] }
 0x1ae   : > { %1802 = vmatpush.msrb.mxu1 %v818_v39  ;;  %v4563_v39 = vld [vmem:[%s4141_s26 + $0x58] sm:$0xff] }
 0x1af   : > { %v4490_v52 = vadd.f32 %v1197_v18, %v1133_v15  ;;  %v5590_v15 = vld [vmem:[#allocation43_spill] sm:$0xff] }
 0x1b1   : > { %5579 = vst [vmem:[#allocation57_spill] sm:$0xff] %v4490_v52  ;;  %1394 = vmatmul.f32.gmra.mxu2 %v4347_v8  ;;  %v1005_v53 = vpop.f32.mrf.mxu0  ;;  %v778_v52 = vld [vmem:[#allocation10 + $0x278] sm:$0xff] }
 0x1b2   : > { %v1070_v3 = vpop.f32.mrf.mxu1  ;;  %1459 = vmatmul.f32.gmra.mxu3 %v4350_v9 }
 0x1b3   : > { %v1071_v0 = vadd.f32 %v1070_v3, %v1005_v53  ;;  %v5591_v53 = vld [vmem:[#allocation44_spill] sm:$0xff] }
 0x1b4   : > { %v1135_v55 = vpop.f32.mrf.mxu2  ;;  %1264 = vmatmul.f32.gmra.mxu0 %v4353_v10  ;;  %v954_v10 = vld [vmem:[#allocation10 + $0x7f8] sm:$0xff] }
 0x1b5   : > { %1329 = vmatmul.f32.gmra.mxu1 %v4358_v11  ;;  %v1200_v42 = vpop.f32.mrf.mxu3  ;;  %v1136_v6 = vadd.f32 %v1135_v55, %v1071_v0  ;;  %1930 = vmatpush.msrb.mxu3 %v954_v10  ;;  %v878_v3 = vld [vmem:[#allocation10 + $0x598] sm:$0xff]  ;;  %v5592_v55 = vld [vmem:[#allocation45_spill] sm:$0xff] }
 0x1b6   : > { %1868 = vmatpush.msrb.mxu2 %v878_v3  ;;  %v942_v0 = vld [vmem:[#allocation10 + $0x798] sm:$0xff]  ;;  %v4567_v3 = vld [vmem:[%s4141_s26 + $0x40] sm:$0xff] }
 0x1b7   : > { %v4496_v8 = vadd.f32 %v1200_v42, %v1136_v6  ;;  %v5593_v42 = vld [vmem:[#allocation46_spill] sm:$0xff] }
 0x1b9   : > { %5580 = vst [vmem:[#allocation58_spill] sm:$0xff] %v4496_v8  ;;  %1397 = vmatmul.f32.gmra.mxu2 %v4363_v28  ;;  %v1008_v9 = vpop.f32.mrf.mxu0  ;;  %v714_v8 = vld [vmem:[#allocation10 + $0x78] sm:$0xff] }
 0x1ba   : > { %v1073_v20 = vpop.f32.mrf.mxu1  ;;  %1462 = vmatmul.f32.gmra.mxu3 %v4366_v29 }
 0x1bb   : > { %v1074_v63 = vadd.f32 %v1073_v20, %v1008_v9  ;;  %v814_v9 = vld [vmem:[#allocation10 + $0x398] sm:$0xff] }
 0x1bc   : > { %v1138_v11 = vpop.f32.mrf.mxu2  ;;  %1267 = vmatmul.f32.gmra.mxu0 %v4371_v32  ;;  %v950_v32 = vld [vmem:[#allocation10 + $0x7d8] sm:$0xff]  ;;  %1803 = vmatpush.msrb.mxu1 %v814_v9 }
 0x1bd   : > { %1332 = vmatmul.f32.gmra.mxu1 %v4374_v33  ;;  %v1203_v13 = vpop.f32.mrf.mxu3  ;;  %v1139_v22 = vadd.f32 %v1138_v11, %v1074_v63  ;;  %1931 = vmatpush.msrb.mxu3 %v950_v32  ;;  %v4527_v11 = vld [vmem:[%s4141_s26 + $0x18] sm:$0xff] }
 0x1be   : > { %v746_v32 = vld [vmem:[#allocation10 + $0x178] sm:$0xff] }
 0x1bf   : > { %v4502_v28 = vadd.f32 %v1203_v13, %v1139_v22  ;;  %1932 = vmatpush.msrb.mxu3 %v946_v35  ;;  %v874_v13 = vld [vmem:[#allocation10 + $0x578] sm:$0xff]  ;;  %1739 = vmatpush.msrb.mxu0 %v746_v32 }
 0x1c0   : > { %1869 = vmatpush.msrb.mxu2 %v874_v13 }
 0x1c1   : > { %5581 = vst [vmem:[#allocation59_spill] sm:$0xff] %v4502_v28  ;;  %1400 = vmatmul.f32.gmra.mxu2 %v4379_v60  ;;  %v1011_v29 = vpop.f32.mrf.mxu0  ;;  %1933 = vmatpush.msrb.mxu3 %v942_v0 }
 0x1c2   : > { %v1076_v16 = vpop.f32.mrf.mxu1  ;;  %1465 = vmatmul.f32.gmra.mxu3 %v4382_v61  ;;  %1870 = vmatpush.msrb.mxu2 %v870_v5  ;;  %v4595_v5 = vld [vmem:[%s4141_s26 + $0x90] sm:$0xff] }
 0x1c3   : > { %v1077_v23 = vadd.f32 %v1076_v16, %v1011_v29  ;;  %1934 = vmatpush.msrb.mxu3 %v938_v49  ;;  %v4531_v29 = vld [vmem:[%s4141_s26] sm:$0xff]  ;;  %v4535_v16 = vld [vmem:[%s4141_s26 + $0x8] sm:$0xff] }
 0x1c4   : > { %v1141_v33 = vpop.f32.mrf.mxu2  ;;  %1270 = vmatmul.f32.gmra.mxu0 %v5582_v31 }
 0x1c5   : > { %1335 = vmatmul.f32.gmra.mxu1 %v5583_v50  ;;  %v1206_v51 = vpop.f32.mrf.mxu3  ;;  %v1142_v25 = vadd.f32 %v1141_v33, %v1077_v23  ;;  %v810_v33 = vld [vmem:[#allocation10 + $0x378] sm:$0xff]  ;;  %v4541_v50 = vld [vmem:[%s4141_s26 + $0x30] sm:$0xff] }
 0x1c6   : > { %1804 = vmatpush.msrb.mxu1 %v810_v33  ;;  %v734_v33 = vld [vmem:[#allocation10 + $0x118] sm:$0xff] }
 0x1c7   : > { %v4508_v60 = vadd.f32 %v1206_v51, %v1142_v25 }
 0x1c9   : > { %5584 = vst [vmem:[#allocation37_spill] sm:$0xff] %v4508_v60  ;;  %1403 = vmatmul.f32.gmra.mxu2 %v5585_v1  ;;  %v1014_v61 = vpop.f32.mrf.mxu0  ;;  %v842_v60 = vld [vmem:[#allocation10 + $0x478] sm:$0xff] }
 0x1ca   : > { %v1079_v26 = vpop.f32.mrf.mxu1  ;;  %1468 = vmatmul.f32.gmra.mxu3 %v5586_v27  ;;  %v4549_v27 = vld [vmem:[%s4141_s26 + $0x20] sm:$0xff] }
 0x1cb   : > { %v1080_v57 = vadd.f32 %v1079_v26, %v1014_v61  ;;  %v934_v61 = vld [vmem:[#allocation10 + $0x758] sm:$0xff] }
 0x1cc   : > { %v1144_v19 = vpop.f32.mrf.mxu2  ;;  %1273 = vmatmul.f32.gmra.mxu0 %v5587_v37  ;;  %1935 = vmatpush.msrb.mxu3 %v934_v61  ;;  %v806_v37 = vld [vmem:[#allocation10 + $0x358] sm:$0xff] }
 0x1cd   : > { %1338 = vmatmul.f32.gmra.mxu1 %v5588_v45  ;;  %v1209_v58 = vpop.f32.mrf.mxu3  ;;  %v1145_v59 = vadd.f32 %v1144_v19, %v1080_v57  ;;  %v742_v19 = vld [vmem:[#allocation10 + $0x158] sm:$0xff] }
 0x1ce   : > { %1740 = vmatpush.msrb.mxu0 %v742_v19  ;;  %1805 = vmatpush.msrb.mxu1 %v806_v37  ;;  %v922_v19 = vld [vmem:[#allocation10 + $0x6f8] sm:$0xff] }
 0x1cf   : > { %v4514_v18 = vadd.f32 %v1209_v58, %v1145_v59  ;;  %v4559_v58 = vld [vmem:[%s4141_s26 + $0x50] sm:$0xff] }
 0x1d1   : > { %5589 = vst [vmem:[#allocation38_spill] sm:$0xff] %v4514_v18  ;;  %1406 = vmatmul.f32.gmra.mxu2 %v5590_v15  ;;  %v1017_v41 = vpop.f32.mrf.mxu0  ;;  %v866_v15 = vld [vmem:[#allocation10 + $0x538] sm:$0xff] }
 0x1d2   : > { %v1082_v46 = vpop.f32.mrf.mxu1  ;;  %1471 = vmatmul.f32.gmra.mxu3 %v5591_v53  ;;  %1871 = vmatpush.msrb.mxu2 %v866_v15  ;;  %v4671_v18 = vld [vmem:[%s4141_s26 + $0x118] sm:$0xff] }
 0x1d3   : > { %v1083_v47 = vadd.f32 %v1082_v46, %v1017_v41  ;;  %v930_v46 = vld [vmem:[#allocation10 + $0x738] sm:$0xff] }
 0x1d4   : > { %v1147_v54 = vpop.f32.mrf.mxu2  ;;  %1276 = vmatmul.f32.gmra.mxu0 %v5592_v55  ;;  %1936 = vmatpush.msrb.mxu3 %v930_v46  ;;  %v738_v55 = vld [vmem:[#allocation10 + $0x138] sm:$0xff] }
 0x1d5   : > { %1341 = vmatmul.f32.gmra.mxu1 %v5593_v42  ;;  %v1212_v6 = vpop.f32.mrf.mxu3  ;;  %v1148_v7 = vadd.f32 %v1147_v54, %v1083_v47  ;;  %v4571_v47 = vld [vmem:[%s4141_s26 + $0x48] sm:$0xff]  ;;  %v802_v42 = vld [vmem:[#allocation10 + $0x338] sm:$0xff]  ;;  %1741 = vmatpush.msrb.mxu0 %v738_v55 }
 0x1d6   : > { %1806 = vmatpush.msrb.mxu1 %v802_v42  ;;  %v730_v46 = vld [vmem:[#allocation10 + $0xf8] sm:$0xff] }
 0x1d7   : > { %v4520_v20 = vadd.f32 %v1212_v6, %v1148_v7  ;;  %v4577_v7 = vld [vmem:[%s4141_s26 + $0x70] sm:$0xff]  ;;  %1742 = vmatpush.msrb.mxu0 %v734_v33 }
 0x1d9   : > { %5594 = vst [vmem:[#allocation39_spill] sm:$0xff] %v4520_v20  ;;  %1621 = vmatmul.f32.vlgmr.msra.gmra.mxu2 %v4523_v21  ;;  %v1232_v63 = vpop.f32.mrf.mxu0  ;;  %1743 = vmatpush.msrb.mxu0 %v730_v46  ;;  %v914_v46 = vld [vmem:[#allocation10 + $0x6b8] sm:$0xff] }
 0x1da   : > { %v1297_v10 = vpop.f32.mrf.mxu1  ;;  %1686 = vmatmul.f32.vlgmr.msra.gmra.mxu3 %v4527_v11  ;;  %v782_v20 = vld [vmem:[#allocation10 + $0x298] sm:$0xff] }
 0x1db   : > { %v1298_v22 = vadd.f32 %v1297_v10, %v1232_v63  ;;  %v4581_v63 = vld [vmem:[%s4141_s26 + $0x78] sm:$0xff] }
 0x1dc   : > { %v1362_v44 = vpop.f32.mrf.mxu2  ;;  %1491 = vmatmul.f32.vlgmr.msra.gmra.mxu0 %v4531_v29  ;;  %v862_v10 = vld [vmem:[#allocation10 + $0x518] sm:$0xff] }
 0x1dd   : > { %1556 = vmatmul.f32.vlgmr.msra.gmra.mxu1 %v4535_v16  ;;  %v1427_v17 = vpop.f32.mrf.mxu3  ;;  %v1363_v23 = vadd.f32 %v1362_v44, %v1298_v22  ;;  %1872 = vmatpush.msrb.mxu2 %v862_v10  ;;  %v926_v22 = vld [vmem:[#allocation10 + $0x718] sm:$0xff]  ;;  %v4585_v44 = vld [vmem:[%s4141_s26 + $0x60] sm:$0xff] }
 0x1de   : > { %1937 = vmatpush.msrb.mxu3 %v926_v22 }
 0x1df   : > { %v4538_v31 = vadd.f32 %v1427_v17, %v1363_v23  ;;  %v4589_v17 = vld [vmem:[%s4141_s26 + $0x68] sm:$0xff] }
 0x1e0   : > { %1938 = vmatpush.msrb.mxu3 %v922_v19 }
 0x1e1   : > { %5595 = vst [vmem:[#allocation40_spill] sm:$0xff] %v4538_v31  ;;  %1624 = vmatmul.f32.gmra.mxu2 %v4541_v50  ;;  %v1235_v51 = vpop.f32.mrf.mxu0  ;;  %v4765_v31 = vld [vmem:[%s4141_s26 + $0x1b8] sm:$0xff] }
 0x1e2   : > { %v1300_v25 = vpop.f32.mrf.mxu1  ;;  %1689 = vmatmul.f32.gmra.mxu3 %v4545_v4  ;;  %5614 = vst [vmem:[#allocation72_spill] sm:$0xff] %v4765_v31 }
 0x1e3   : > { %v1301_v1 = vadd.f32 %v1300_v25, %v1235_v51  ;;  %v798_v51 = vld [vmem:[#allocation10 + $0x318] sm:$0xff] }
 0x1e4   : > { %v1365_v26 = vpop.f32.mrf.mxu2  ;;  %1494 = vmatmul.f32.gmra.mxu0 %v4549_v27  ;;  %1807 = vmatpush.msrb.mxu1 %v798_v51  ;;  %v726_v51 = vld [vmem:[#allocation10 + $0xd8] sm:$0xff] }
 0x1e5   : > { %1559 = vmatmul.f32.gmra.mxu1 %v4553_v34  ;;  %v1430_v57 = vpop.f32.mrf.mxu3  ;;  %v1366_v35 = vadd.f32 %v1365_v26, %v1301_v1  ;;  %v4599_v26 = vld [vmem:[%s4141_s26 + $0x98] sm:$0xff]  ;;  %1744 = vmatpush.msrb.mxu0 %v726_v51 }
 0x1e7   : > { %v4556_v45 = vadd.f32 %v1430_v57, %v1366_v35  ;;  %v858_v57 = vld [vmem:[#allocation10 + $0x4f8] sm:$0xff] }
 0x1e8   : > { %1873 = vmatpush.msrb.mxu2 %v858_v57  ;;  %v4631_v57 = vld [vmem:[%s4141_s26 + $0xd0] sm:$0xff] }
 0x1e9   : > { %5596 = vst [vmem:[#allocation41_spill] sm:$0xff] %v4556_v45  ;;  %1627 = vmatmul.f32.gmra.mxu2 %v4559_v58  ;;  %v1238_v59 = vpop.f32.mrf.mxu0  ;;  %v2139_v45 = vld [vmem:[%s4153_s8] sm:$0xff] }
 0x1ea   : > { %v1303_v38 = vpop.f32.mrf.mxu1  ;;  %1692 = vmatmul.f32.gmra.mxu3 %v4563_v39 }
 0x1eb   : > { %v1304_v41 = vadd.f32 %v1303_v38, %v1238_v59  ;;  %v4603_v59 = vld [vmem:[%s4141_s26 + $0x80] sm:$0xff]  ;;  %v4607_v38 = vld [vmem:[%s4141_s26 + $0x88] sm:$0xff] }
 0x1ec   : > { %v1368_v53 = vpop.f32.mrf.mxu2  ;;  %1497 = vmatmul.f32.gmra.mxu0 %v4567_v3 }
 0x1ed   : > { %1562 = vmatmul.f32.gmra.mxu1 %v4571_v47  ;;  %v1433_v0 = vpop.f32.mrf.mxu3  ;;  %v1369_v54 = vadd.f32 %v1368_v53, %v1304_v41  ;;  %v794_v53 = vld [vmem:[#allocation10 + $0x2f8] sm:$0xff] }
 0x1ee   : > { %1808 = vmatpush.msrb.mxu1 %v794_v53 }
 0x1ef   : > { %v4574_v6 = vadd.f32 %v1433_v0, %v1369_v54  ;;  %v4613_v54 = vld [vmem:[%s4141_s26 + $0xb0] sm:$0xff] }
 0x1f1   : > { %5597 = vst [vmem:[#allocation42_spill] sm:$0xff] %v4574_v6  ;;  %1630 = vmatmul.f32.gmra.mxu2 %v4577_v7  ;;  %v1241_v43 = vpop.f32.mrf.mxu0  ;;  %v4743_v6 = vld [vmem:[%s4141_s26 + $0x198] sm:$0xff] }
 0x1f2   : > { %v1306_v9 = vpop.f32.mrf.mxu1  ;;  %1695 = vmatmul.f32.gmra.mxu3 %v4581_v63 }
 0x1f3   : > { %v1307_v13 = vadd.f32 %v1306_v9, %v1241_v43  ;;  %v4617_v43 = vld [vmem:[%s4141_s26 + $0xb8] sm:$0xff] }
 0x1f4   : > { %v1371_v49 = vpop.f32.mrf.mxu2  ;;  %1500 = vmatmul.f32.gmra.mxu0 %v4585_v44  ;;  %v854_v9 = vld [vmem:[#allocation10 + $0x4d8] sm:$0xff] }
 0x1f5   : > { %1565 = vmatmul.f32.gmra.mxu1 %v4589_v17  ;;  %v1436_v23 = vpop.f32.mrf.mxu3  ;;  %v1372_v32 = vadd.f32 %v1371_v49, %v1307_v13  ;;  %1874 = vmatpush.msrb.mxu2 %v854_v9  ;;  %v918_v13 = vld [vmem:[#allocation10 + $0x6d8] sm:$0xff]  ;;  %v4621_v49 = vld [vmem:[%s4141_s26 + $0xa0] sm:$0xff] }
 0x1f6   : > { %1939 = vmatpush.msrb.mxu3 %v918_v13  ;;  %v722_v13 = vld [vmem:[#allocation10 + $0xb8] sm:$0xff] }
 0x1f7   : > { %v4592_v25 = vadd.f32 %v1436_v23, %v1372_v32  ;;  %v4625_v23 = vld [vmem:[%s4141_s26 + $0xa8] sm:$0xff]  ;;  %1745 = vmatpush.msrb.mxu0 %v722_v13 }
 0x1f8   : > { %1940 = vmatpush.msrb.mxu3 %v914_v46 }
 0x1f9   : > { %5598 = vst [vmem:[#allocation43_spill] sm:$0xff] %v4592_v25  ;;  %1633 = vmatmul.f32.gmra.mxu2 %v4595_v5  ;;  %v1244_v1 = vpop.f32.mrf.mxu0  ;;  %v702_v25 = vld [vmem:[#allocation10 + $0x18] sm:$0xff] }
 0x1fa   : > { %v1309_v61 = vpop.f32.mrf.mxu1  ;;  %1698 = vmatmul.f32.gmra.mxu3 %v4599_v26 }
 0x1fb   : > { %v1310_v35 = vadd.f32 %v1309_v61, %v1244_v1  ;;  %v790_v1 = vld [vmem:[#allocation10 + $0x2d8] sm:$0xff] }
 0x1fc   : > { %v1374_v37 = vpop.f32.mrf.mxu2  ;;  %1503 = vmatmul.f32.gmra.mxu0 %v4603_v59  ;;  %1809 = vmatpush.msrb.mxu1 %v790_v1 }
 0x1fd   : > { %1568 = vmatmul.f32.gmra.mxu1 %v4607_v38  ;;  %v1439_v15 = vpop.f32.mrf.mxu3  ;;  %v1375_v41 = vadd.f32 %v1374_v37, %v1310_v35  ;;  %v4635_v37 = vld [vmem:[%s4141_s26 + $0xd8] sm:$0xff] }
 0x1ff   : > { %v4610_v0 = vadd.f32 %v1439_v15, %v1375_v41  ;;  %v850_v15 = vld [vmem:[#allocation10 + $0x4b8] sm:$0xff] }
 0x200   : > { %1875 = vmatpush.msrb.mxu2 %v850_v15 }
 0x201   : > { %5599 = vst [vmem:[#allocation44_spill] sm:$0xff] %v4610_v0  ;;  %1636 = vmatmul.f32.gmra.mxu2 %v4613_v54  ;;  %v1247_v55 = vpop.f32.mrf.mxu0  ;;  %v4725_v0 = vld [vmem:[%s4141_s26 + $0x178] sm:$0xff] }
 0x202   : > { %v1312_v42 = vpop.f32.mrf.mxu1  ;;  %1701 = vmatmul.f32.gmra.mxu3 %v4617_v43 }
 0x203   : > { %v1313_v10 = vadd.f32 %v1312_v42, %v1247_v55  ;;  %v4639_v55 = vld [vmem:[%s4141_s26 + $0xc0] sm:$0xff]  ;;  %v4643_v42 = vld [vmem:[%s4141_s26 + $0xc8] sm:$0xff] }
 0x204   : > { %v1377_v22 = vpop.f32.mrf.mxu2  ;;  %1506 = vmatmul.f32.gmra.mxu0 %v4621_v49 }
 0x205   : > { %1571 = vmatmul.f32.gmra.mxu1 %v4625_v23  ;;  %v1442_v32 = vpop.f32.mrf.mxu3  ;;  %v1378_v33 = vadd.f32 %v1377_v22, %v1313_v10  ;;  %v786_v22 = vld [vmem:[#allocation10 + $0x2b8] sm:$0xff] }
 0x206   : > { %1810 = vmatpush.msrb.mxu1 %v786_v22  ;;  %v718_v22 = vld [vmem:[#allocation10 + $0x98] sm:$0xff] }
 0x207   : > { %v4628_v61 = vadd.f32 %v1442_v32, %v1378_v33  ;;  %v4649_v33 = vld [vmem:[%s4141_s26 + $0xf0] sm:$0xff]  ;;  %1746 = vmatpush.msrb.mxu0 %v718_v22 }
 0x208   : > { %1811 = vmatpush.msrb.mxu1 %v782_v20 }
 0x209   : > { %5600 = vst [vmem:[#allocation45_spill] sm:$0xff] %v4628_v61  ;;  %1639 = vmatmul.f32.gmra.mxu2 %v4631_v57  ;;  %v1250_v35 = vpop.f32.mrf.mxu0  ;;  %1747 = vmatpush.msrb.mxu0 %v714_v8  ;;  %v4693_v8 = vld [vmem:[%s4141_s26 + $0x120] sm:$0xff]  ;;  %v706_v61 = vld [vmem:[#allocation10 + $0x38] sm:$0xff] }
 0x20a   : > { %v1315_v19 = vpop.f32.mrf.mxu1  ;;  %1704 = vmatmul.f32.gmra.mxu3 %v4635_v37  ;;  %1812 = vmatpush.msrb.mxu1 %v778_v52 }
 0x20b   : > { %v1316_v41 = vadd.f32 %v1315_v19, %v1250_v35  ;;  %v4653_v35 = vld [vmem:[%s4141_s26 + $0xf8] sm:$0xff] }
 0x20c   : > { %v1380_v53 = vpop.f32.mrf.mxu2  ;;  %1509 = vmatmul.f32.gmra.mxu0 %v4639_v55  ;;  %v846_v19 = vld [vmem:[#allocation10 + $0x498] sm:$0xff]  ;;  %1813 = vmatpush.msrb.mxu1 %v774_v12 }
 0x20d   : > { %1574 = vmatmul.f32.gmra.mxu1 %v4643_v42  ;;  %v1445_v9 = vpop.f32.mrf.mxu3  ;;  %v1381_v10 = vadd.f32 %v1380_v53, %v1316_v41  ;;  %1876 = vmatpush.msrb.mxu2 %v846_v19  ;;  %v910_v41 = vld [vmem:[#allocation10 + $0x698] sm:$0xff]  ;;  %v4657_v53 = vld [vmem:[%s4141_s26 + $0xe0] sm:$0xff] }
 0x20e   : > { %1941 = vmatpush.msrb.mxu3 %v910_v41  ;;  %1814 = vmatpush.msrb.mxu1 %v770_v56 }
 0x20f   : > { %v4646_v32 = vadd.f32 %v1445_v9, %v1381_v10  ;;  %v4661_v9 = vld [vmem:[%s4141_s26 + $0xe8] sm:$0xff]  ;;  %1877 = vmatpush.msrb.mxu2 %v842_v60 }
 0x211   : > { %5601 = vst [vmem:[#allocation46_spill] sm:$0xff] %v4646_v32  ;;  %1642 = vmatmul.f32.gmra.mxu2 %v4649_v33  ;;  %v1253_v51 = vpop.f32.mrf.mxu0  ;;  %v4707_v32 = vld [vmem:[%s4141_s26 + $0x158] sm:$0xff] }
 0x212   : > { %v1318_v1 = vpop.f32.mrf.mxu1  ;;  %1707 = vmatmul.f32.gmra.mxu3 %v4653_v35  ;;  %1878 = vmatpush.msrb.mxu2 %v838_v24 }
 0x213   : > { %v1319_v15 = vadd.f32 %v1318_v1, %v1253_v51  ;;  %v4667_v1 = vld [vmem:[%s4141_s26 + $0x110] sm:$0xff] }
 0x214   : > { %v1383_v46 = vpop.f32.mrf.mxu2  ;;  %1512 = vmatmul.f32.gmra.mxu0 %v4657_v53  ;;  %1879 = vmatpush.msrb.mxu2 %v834_v2 }
 0x215   : > { %1577 = vmatmul.f32.gmra.mxu1 %v4661_v9  ;;  %v1448_v10 = vpop.f32.mrf.mxu3  ;;  %v1384_v13 = vadd.f32 %v1383_v46, %v1319_v15  ;;  %v906_v46 = vld [vmem:[#allocation10 + $0x678] sm:$0xff] }
 0x216   : > { %1942 = vmatpush.msrb.mxu3 %v906_v46  ;;  %1880 = vmatpush.msrb.mxu2 %v830_v48 }
 0x217   : > { %v4664_v51 = vadd.f32 %v1448_v10, %v1384_v13  ;;  %v4675_v10 = vld [vmem:[%s4141_s26 + $0x100] sm:$0xff]  ;;  %v4679_v13 = vld [vmem:[%s4141_s26 + $0x108] sm:$0xff] }
 0x219   : > { %5602 = vst [vmem:[#allocation60_spill] sm:$0xff] %v4664_v51  ;;  %1645 = vmatmul.f32.gmra.mxu2 %v4667_v1  ;;  %v1256_v19 = vpop.f32.mrf.mxu0  ;;  %v710_v51 = vld [vmem:[#allocation10 + $0x58] sm:$0xff] }
 0x21a   : > { %v1321_v41 = vpop.f32.mrf.mxu1  ;;  %1710 = vmatmul.f32.gmra.mxu3 %v4671_v18  ;;  %1748 = vmatpush.msrb.mxu0 %v710_v51  ;;  %v4711_v51 = vld [vmem:[%s4141_s26 + $0x140] sm:$0xff] }
 0x21b   : > { %v1322_v15 = vadd.f32 %v1321_v41, %v1256_v19  ;;  %v4685_v19 = vld [vmem:[%s4141_s26 + $0x130] sm:$0xff] }
 0x21c   : > { %v1386_v20 = vpop.f32.mrf.mxu2  ;;  %1515 = vmatmul.f32.gmra.mxu0 %v4675_v10 }
 0x21d   : > { %1580 = vmatmul.f32.gmra.mxu1 %v4679_v13  ;;  %v1451_v22 = vpop.f32.mrf.mxu3  ;;  %v1387_v28 = vadd.f32 %v1386_v20, %v1322_v15  ;;  %v902_v20 = vld [vmem:[#allocation10 + $0x658] sm:$0xff]  ;;  %1749 = vmatpush.msrb.mxu0 %v706_v61  ;;  %v4729_v61 = vld [vmem:[%s4141_s26 + $0x160] sm:$0xff] }
 0x21e   : > { %1943 = vmatpush.msrb.mxu3 %v902_v20  ;;  %5606 = vst [vmem:[#allocation64_spill] sm:$0xff] %v4729_v61 }
 0x21f   : > { %v4682_v60 = vadd.f32 %v1451_v22, %v1387_v28  ;;  %v4697_v28 = vld [vmem:[%s4141_s26 + $0x128] sm:$0xff]  ;;  %1750 = vmatpush.msrb.mxu0 %v702_v25  ;;  %v2142_v25 = vld [vmem:[%s4153_s8 + $0x18] sm:$0xff] }
 0x221   : > { %5603 = vst [vmem:[#allocation61_spill] sm:$0xff] %v4682_v60  ;;  %1648 = vmatmul.f32.gmra.mxu2 %v4685_v19  ;;  %v1259_v41 = vpop.f32.mrf.mxu0  ;;  %2158 = vmatpush.xpose.msra.mxu0 %v2139_v45 }
 0x222   : > { %v1324_v46 = vpop.f32.mrf.mxu1  ;;  %1713 = vmatmul.f32.gmra.mxu3 %v4689_v36 }
 0x223   : > { %v1325_v15 = vadd.f32 %v1324_v46, %v1259_v41  ;;  %v4703_v41 = vld [vmem:[%s4141_s26 + $0x150] sm:$0xff] }
 0x224   : > { %v1389_v52 = vpop.f32.mrf.mxu2  ;;  %1518 = vmatmul.f32.gmra.mxu0 %v4693_v8 }
 0x225   : > { %1583 = vmatmul.f32.gmra.mxu1 %v4697_v28  ;;  %v1454_v22 = vpop.f32.mrf.mxu3  ;;  %v1390_v60 = vadd.f32 %v1389_v52, %v1325_v15  ;;  %v898_v52 = vld [vmem:[#allocation10 + $0x638] sm:$0xff] }
 0x226   : > { %1944 = vmatpush.msrb.mxu3 %v898_v52 }
 0x227   : > { %v4700_v24 = vadd.f32 %v1454_v22, %v1390_v60  ;;  %v4715_v60 = vld [vmem:[%s4141_s26 + $0x148] sm:$0xff] }
 0x229   : > { %5604 = vst [vmem:[#allocation62_spill] sm:$0xff] %v4700_v24  ;;  %1651 = vmatmul.f32.gmra.mxu2 %v4703_v41  ;;  %v1262_v46 = vpop.f32.mrf.mxu0 }
 0x22a   : > { %v1327_v20 = vpop.f32.mrf.mxu1  ;;  %1716 = vmatmul.f32.gmra.mxu3 %v4707_v32 }
 0x22b   : > { %v1328_v15 = vadd.f32 %v1327_v20, %v1262_v46  ;;  %v4721_v46 = vld [vmem:[%s4141_s26 + $0x170] sm:$0xff] }
 0x22c   : > { %v1392_v12 = vpop.f32.mrf.mxu2  ;;  %1521 = vmatmul.f32.gmra.mxu0 %v4711_v51 }
 0x22d   : > { %1586 = vmatmul.f32.gmra.mxu1 %v4715_v60  ;;  %v1457_v22 = vpop.f32.mrf.mxu3  ;;  %v1393_v24 = vadd.f32 %v1392_v12, %v1328_v15  ;;  %v894_v12 = vld [vmem:[#allocation10 + $0x618] sm:$0xff] }
 0x22e   : > { %1945 = vmatpush.msrb.mxu3 %v894_v12 }
 0x22f   : > { %v4718_v2 = vadd.f32 %v1457_v22, %v1393_v24  ;;  %v4733_v24 = vld [vmem:[%s4141_s26 + $0x168] sm:$0xff] }
 0x230   : > { %5607 = vst [vmem:[#allocation65_spill] sm:$0xff] %v4733_v24  ;;  %2353 = vmatpush.xpose.msra.mxu3 %v2142_v25 }
 0x231   : > { %5605 = vst [vmem:[#allocation63_spill] sm:$0xff] %v4718_v2  ;;  %1654 = vmatmul.f32.gmra.mxu2 %v4721_v46  ;;  %v1265_v20 = vpop.f32.mrf.mxu0 }
 0x232   : > { %v1330_v52 = vpop.f32.mrf.mxu1  ;;  %1719 = vmatmul.f32.gmra.mxu3 %v4725_v0 }
 0x233   : > { %v1331_v15 = vadd.f32 %v1330_v52, %v1265_v20  ;;  %v766_v20 = vld [vmem:[#allocation10 + $0x218] sm:$0xff]  ;;  %v4739_v52 = vld [vmem:[%s4141_s26 + $0x190] sm:$0xff] }
 0x234   : > { %v1395_v56 = vpop.f32.mrf.mxu2  ;;  %1524 = vmatmul.f32.gmra.mxu0 %v4729_v61  ;;  %1815 = vmatpush.msrb.mxu1 %v766_v20  ;;  %5609 = vst [vmem:[#allocation67_spill] sm:$0xff] %v4739_v52  ;;  %v4753_v20 = vld [vmem:[%s4141_s26 + $0x188] sm:$0xff] }
 0x235   : > { %1589 = vmatmul.f32.gmra.mxu1 %v4733_v24  ;;  %v1460_v22 = vpop.f32.mrf.mxu3  ;;  %v1396_v2 = vadd.f32 %v1395_v56, %v1331_v15  ;;  %v2141_v15 = vld [vmem:[%s4153_s8 + $0x10] sm:$0xff]  ;;  %5611 = vst [vmem:[#allocation69_spill] sm:$0xff] %v4753_v20 }
 0x236   : > { %2288 = vmatpush.xpose.msra.mxu2 %v2141_v15  ;;  %v4761_v15 = vld [vmem:[%s4141_s26 + $0x1b0] sm:$0xff] }
 0x237   : > { %v4736_v48 = vadd.f32 %v1460_v22, %v1396_v2  ;;  %v4749_v22 = vld [vmem:[%s4141_s26 + $0x180] sm:$0xff]  ;;  %5613 = vst [vmem:[#allocation71_spill] sm:$0xff] %v4761_v15 }
 0x238   : > { %5610 = vst [vmem:[#allocation68_spill] sm:$0xff] %v4749_v22 }
 0x239   : > { %5608 = vst [vmem:[#allocation66_spill] sm:$0xff] %v4736_v48  ;;  %1657 = vmatmul.f32.gmra.mxu2 %v4739_v52  ;;  %v1268_v12 = vpop.f32.mrf.mxu0 }
 0x23a   : > { %v1333_v40 = vpop.f32.mrf.mxu1  ;;  %1722 = vmatmul.f32.gmra.mxu3 %v4743_v6 }
 0x23b   : > { %v1334_v56 = vadd.f32 %v1333_v40, %v1268_v12  ;;  %v2140_v40 = vld [vmem:[%s4153_s8 + $0x8] sm:$0xff] }
 0x23c   : > { %v1398_v2 = vpop.f32.mrf.mxu2  ;;  %1527 = vmatmul.f32.gmra.mxu0 %v4749_v22  ;;  %2223 = vmatpush.xpose.msra.mxu1 %v2140_v40 }
 0x23d   : > { %1592 = vmatmul.f32.gmra.mxu1 %v4753_v20  ;;  %v1463_v48 = vpop.f32.mrf.mxu3  ;;  %v1399_v30 = vadd.f32 %v1398_v2, %v1334_v56  ;;  %v4805_v20 = vld [vmem:[%s4141_s26 + $0x1e0] sm:$0xff] }
 0x23e   : > { %5625 = vst [vmem:[#allocation83_spill] sm:$0xff] %v4805_v20 }
 0x23f   : > { %v4758_v12 = vadd.f32 %v1463_v48, %v1399_v30  ;;  %v4773_v30 = vld [vmem:[%s4141_s26 + $0x1a8] sm:$0xff] }
 0x240   : > { %5616 = vst [vmem:[#allocation74_spill] sm:$0xff] %v4773_v30 }
 0x241   : > { %5612 = vst [vmem:[#allocation70_spill] sm:$0xff] %v4758_v12  ;;  %1660 = vmatmul.f32.gmra.mxu2 %v4761_v15  ;;  %v1271_v25 = vpop.f32.mrf.mxu0  ;;  %v4779_v12 = vld [vmem:[%s4141_s26 + $0x1d0] sm:$0xff] }
 0x242   : > { %v1336_v14 = vpop.f32.mrf.mxu1  ;;  %1725 = vmatmul.f32.gmra.mxu3 %v4765_v31  ;;  %5618 = vst [vmem:[#allocation76_spill] sm:$0xff] %v4779_v12  ;;  %v4783_v31 = vld [vmem:[%s4141_s26 + $0x1d8] sm:$0xff] }
 0x243   : > { %v1337_v56 = vadd.f32 %v1336_v14, %v1271_v25  ;;  %5619 = vst [vmem:[#allocation77_spill] sm:$0xff] %v4783_v31 }
 0x244   : > { %v1401_v2 = vpop.f32.mrf.mxu2  ;;  %1530 = vmatmul.f32.gmra.mxu0 %v4769_v62 }
 0x245   : > { %1595 = vmatmul.f32.gmra.mxu1 %v4773_v30  ;;  %v1466_v45 = vpop.f32.mrf.mxu3  ;;  %v1402_v48 = vadd.f32 %v1401_v2, %v1337_v56  ;;  %v4787_v30 = vld [vmem:[%s4141_s26 + $0x1c0] sm:$0xff]  ;;  %v4791_v56 = vld [vmem:[%s4141_s26 + $0x1c8] sm:$0xff] }
 0x246   : > { %5620 = vst [vmem:[#allocation78_spill] sm:$0xff] %v4787_v30 }
 0x247   : > { %v4776_v40 = vadd.f32 %v1466_v45, %v1402_v48  ;;  %5621 = vst [vmem:[#allocation79_spill] sm:$0xff] %v4791_v56 }
 0x249   : > { %5617 = vst [vmem:[#allocation75_spill] sm:$0xff] %v4776_v40  ;;  %1663 = vmatmul.f32.gmra.mxu2 %v4779_v12  ;;  %v1274_v14 = vpop.f32.mrf.mxu0  ;;  %v4797_v40 = vld [vmem:[%s4141_s26 + $0x1f0] sm:$0xff] }
 0x24a   : > { %v1339_v25 = vpop.f32.mrf.mxu1  ;;  %1728 = vmatmul.f32.gmra.mxu3 %v4783_v31  ;;  %5623 = vst [vmem:[#allocation81_spill] sm:$0xff] %v4797_v40  ;;  %v4801_v31 = vld [vmem:[%s4141_s26 + $0x1f8] sm:$0xff] }
 0x24b   : > { %v1340_v62 = vadd.f32 %v1339_v25, %v1274_v14  ;;  %5624 = vst [vmem:[#allocation82_spill] sm:$0xff] %v4801_v31 }
 0x24c   : > { %v1404_v15 = vpop.f32.mrf.mxu2  ;;  %1533 = vmatmul.f32.gmra.mxu0 %v4787_v30 }
 0x24d   : > { %1598 = vmatmul.f32.gmra.mxu1 %v4791_v56  ;;  %v1469_v2 = vpop.f32.mrf.mxu3  ;;  %v1405_v45 = vadd.f32 %v1404_v15, %v1340_v62  ;;  %v4809_v56 = vld [vmem:[%s4141_s26 + $0x1e8] sm:$0xff]  ;;  %s5713_s26 = sld [smem:[#allocation105_spill]] }
 0x24f   : > { %v4794_v48 = vadd.f32 %v1469_v2, %v1405_v45 }
 0x251   : > { %5622 = vst [vmem:[#allocation80_spill] sm:$0xff] %v4794_v48  ;;  %1666 = vmatmul.f32.gmra.mxu2 %v4797_v40  ;;  %v1277_v14 = vpop.f32.mrf.mxu0 }
 0x252   : > { %v1342_v25 = vpop.f32.mrf.mxu1  ;;  %1731 = vmatmul.f32.gmra.mxu3 %v4801_v31 }
 0x253   : > { %v1343_v30 = vadd.f32 %v1342_v25, %v1277_v14  ;;  %s2991_s6 = scalar_lea.hbm %s5713_s26, %s3272_s0  ;;  %s3699_s20 = scalar_lea.hbm %s5713_s26, 1536 }
 0x254   : > { %v1407_v12 = vpop.f32.mrf.mxu2  ;;  %1536 = vmatmul.f32.gmra.mxu0 %v4805_v20  ;;  %s2994_s28 = sshll.u32 %s2991_s6, 4  ;;  %s2995_s28 = int_to_ptr.hbm [resolvable:$true] %s2994_s28 }
 0x255   : > { %1601 = vmatmul.f32.gmra.mxu1 %v4809_v56  ;;  %v1472_v62 = vpop.f32.mrf.mxu3  ;;  %v1408_v15 = vadd.f32 %v1407_v12, %v1343_v30  ;;  %s3693_s13 = sshra.s32 %s2995_s28, 4  ;;  %s3694_s13 = int_to_ptr.hbm [resolvable:$true] %s3693_s13 }
 0x256   : > { %s3695_s23 = scalar_lea.hbm %s3694_s13, 512  ;;  %p3700_p2 = scmp.lt.s32.totalorder %s3694_s13, %s5713_s26 }
 0x257   : > { %v4812_v2 = vadd.f32 %v1472_v62, %v1408_v15  ;;  %p3696_p12 = scmp.ne.s32.totalorder %s3694_s13, %s3695_s23  ;;  %p3701_p10 = scmp.lt.s32.totalorder %s3699_s20, %s3695_s23 }
 0x259   : > { %5626 = vst [vmem:[#allocation84_spill] sm:$0xff] %v4812_v2  ;;  %1881 = vmatmul.f32.vlgmr.msrb.gmra.mxu2 %v4523_v21  ;;  %v1492_v45 = vpop.f32.mrf.mxu0  ;;  %p3697_p9 = pnand %p3696_p12, %p4070_p11  ;;  %p3702_p4 = por %p3701_p10, %p3700_p2 }
 0x25a   : > { %v1557_v48 = vpop.f32.mrf.mxu1  ;;  %1946 = vmatmul.f32.vlgmr.msrb.gmra.mxu3 %v4527_v11 }
 0x25b   : > { %v1558_v14 = vadd.f32 %v1557_v48, %v1492_v45  ;;  %p3698_p7 = pneg %p3697_p9 }
 0x25c   : > { %v1622_v25 = vpop.f32.mrf.mxu2  ;;  %1751 = vmatmul.f32.vlgmr.msrb.gmra.mxu0 %v4531_v29 }
 0x25d   : > { %1816 = vmatmul.f32.vlgmr.msrb.gmra.mxu1 %v4535_v16  ;;  %v1687_v20 = vpop.f32.mrf.mxu3  ;;  %v1623_v31 = vadd.f32 %v1622_v25, %v1558_v14  ;;  %p3703_p6 = pnand %p3702_p4, %p3698_p7 }
 0x25f   : > { %v4818_v40 = vadd.f32 %v1687_v20, %v1623_v31 }
 0x261   : > { %5627 = vst [vmem:[#allocation85_spill] sm:$0xff] %v4818_v40  ;;  %1884 = vmatmul.f32.gmra.mxu2 %v4541_v50  ;;  %v1495_v12 = vpop.f32.mrf.mxu0 }
 0x262   : > { %v1560_v30 = vpop.f32.mrf.mxu1  ;;  %1949 = vmatmul.f32.gmra.mxu3 %v4545_v4 }
 0x263   : > { %v1561_v62 = vadd.f32 %v1560_v30, %v1495_v12 }
 0x264   : > { %v1625_v15 = vpop.f32.mrf.mxu2  ;;  %1754 = vmatmul.f32.gmra.mxu0 %v4549_v27 }
 0x265   : > { %1819 = vmatmul.f32.gmra.mxu1 %v4553_v34  ;;  %v1690_v48 = vpop.f32.mrf.mxu3  ;;  %v1626_v45 = vadd.f32 %v1625_v15, %v1561_v62 }
 0x267   : > { %v4824_v2 = vadd.f32 %v1690_v48, %v1626_v45 }
 0x269   : > { %5628 = vst [vmem:[#allocation86_spill] sm:$0xff] %v4824_v2  ;;  %1887 = vmatmul.f32.gmra.mxu2 %v4559_v58  ;;  %v1498_v31 = vpop.f32.mrf.mxu0 }
 0x26a   : > { %v1563_v20 = vpop.f32.mrf.mxu1  ;;  %1952 = vmatmul.f32.gmra.mxu3 %v4563_v39 }
 0x26b   : > { %v1564_v14 = vadd.f32 %v1563_v20, %v1498_v31 }
 0x26c   : > { %v1628_v25 = vpop.f32.mrf.mxu2  ;;  %1757 = vmatmul.f32.gmra.mxu0 %v4567_v3 }
 0x26d   : > { %1822 = vmatmul.f32.gmra.mxu1 %v4571_v47  ;;  %v1693_v12 = vpop.f32.mrf.mxu3  ;;  %v1629_v30 = vadd.f32 %v1628_v25, %v1564_v14 }
 0x26f   : > { %v4830_v40 = vadd.f32 %v1693_v12, %v1629_v30 }
 0x271   : > { %5629 = vst [vmem:[#allocation87_spill] sm:$0xff] %v4830_v40  ;;  %1890 = vmatmul.f32.gmra.mxu2 %v4577_v7  ;;  %v1501_v62 = vpop.f32.mrf.mxu0 }
 0x272   : > { %v1566_v15 = vpop.f32.mrf.mxu1  ;;  %1955 = vmatmul.f32.gmra.mxu3 %v4581_v63 }
 0x273   : > { %v1567_v48 = vadd.f32 %v1566_v15, %v1501_v62 }
 0x274   : > { %v1631_v45 = vpop.f32.mrf.mxu2  ;;  %1760 = vmatmul.f32.gmra.mxu0 %v4585_v44 }
 0x275   : > { %1825 = vmatmul.f32.gmra.mxu1 %v4589_v17  ;;  %v1696_v31 = vpop.f32.mrf.mxu3  ;;  %v1632_v20 = vadd.f32 %v1631_v45, %v1567_v48 }
 0x277   : > { %v4836_v2 = vadd.f32 %v1696_v31, %v1632_v20 }
 0x279   : > { %5630 = vst [vmem:[#allocation88_spill] sm:$0xff] %v4836_v2  ;;  %1893 = vmatmul.f32.gmra.mxu2 %v4595_v5  ;;  %v1504_v14 = vpop.f32.mrf.mxu0 }
 0x27a   : > { %v1569_v25 = vpop.f32.mrf.mxu1  ;;  %1958 = vmatmul.f32.gmra.mxu3 %v4599_v26 }
 0x27b   : > { %v1570_v12 = vadd.f32 %v1569_v25, %v1504_v14 }
 0x27c   : > { %v1634_v30 = vpop.f32.mrf.mxu2  ;;  %1763 = vmatmul.f32.gmra.mxu0 %v4603_v59 }
 0x27d   : > { %1828 = vmatmul.f32.gmra.mxu1 %v4607_v38  ;;  %v1699_v62 = vpop.f32.mrf.mxu3  ;;  %v1635_v15 = vadd.f32 %v1634_v30, %v1570_v12 }
 0x27f   : > { %v4842_v40 = vadd.f32 %v1699_v62, %v1635_v15 }
 0x281   : > { %5631 = vst [vmem:[#allocation89_spill] sm:$0xff] %v4842_v40  ;;  %1896 = vmatmul.f32.gmra.mxu2 %v4613_v54  ;;  %v1507_v48 = vpop.f32.mrf.mxu0 }
 0x282   : > { %v1572_v45 = vpop.f32.mrf.mxu1  ;;  %1961 = vmatmul.f32.gmra.mxu3 %v4617_v43 }
 0x283   : > { %v1573_v31 = vadd.f32 %v1572_v45, %v1507_v48 }
 0x284   : > { %v1637_v20 = vpop.f32.mrf.mxu2  ;;  %1766 = vmatmul.f32.gmra.mxu0 %v4621_v49 }
 0x285   : > { %1831 = vmatmul.f32.gmra.mxu1 %v4625_v23  ;;  %v1702_v14 = vpop.f32.mrf.mxu3  ;;  %v1638_v25 = vadd.f32 %v1637_v20, %v1573_v31 }
 0x287   : > { %v4848_v2 = vadd.f32 %v1702_v14, %v1638_v25 }
 0x289   : > { %5632 = vst [vmem:[#allocation90_spill] sm:$0xff] %v4848_v2  ;;  %1899 = vmatmul.f32.gmra.mxu2 %v4631_v57  ;;  %v1510_v12 = vpop.f32.mrf.mxu0 }
 0x28a   : > { %v1575_v30 = vpop.f32.mrf.mxu1  ;;  %1964 = vmatmul.f32.gmra.mxu3 %v4635_v37 }
 0x28b   : > { %v1576_v62 = vadd.f32 %v1575_v30, %v1510_v12 }
 0x28c   : > { %v1640_v15 = vpop.f32.mrf.mxu2  ;;  %1769 = vmatmul.f32.gmra.mxu0 %v4639_v55 }
 0x28d   : > { %1834 = vmatmul.f32.gmra.mxu1 %v4643_v42  ;;  %v1705_v48 = vpop.f32.mrf.mxu3  ;;  %v1641_v45 = vadd.f32 %v1640_v15, %v1576_v62 }
 0x28f   : > { %v4854_v40 = vadd.f32 %v1705_v48, %v1641_v45 }
 0x291   : > { %5633 = vst [vmem:[#allocation91_spill] sm:$0xff] %v4854_v40  ;;  %1902 = vmatmul.f32.gmra.mxu2 %v4649_v33  ;;  %v1513_v31 = vpop.f32.mrf.mxu0 }
 0x292   : > { %v1578_v20 = vpop.f32.mrf.mxu1  ;;  %1967 = vmatmul.f32.gmra.mxu3 %v4653_v35 }
 0x293   : > { %v1579_v14 = vadd.f32 %v1578_v20, %v1513_v31 }
 0x294   : > { %v1643_v25 = vpop.f32.mrf.mxu2  ;;  %1772 = vmatmul.f32.gmra.mxu0 %v4657_v53 }
 0x295   : > { %1837 = vmatmul.f32.gmra.mxu1 %v4661_v9  ;;  %v1708_v12 = vpop.f32.mrf.mxu3  ;;  %v1644_v30 = vadd.f32 %v1643_v25, %v1579_v14 }
 0x297   : > { %v4860_v2 = vadd.f32 %v1708_v12, %v1644_v30 }
 0x299   : > { %5634 = vst [vmem:[#allocation92_spill] sm:$0xff] %v4860_v2  ;;  %1905 = vmatmul.f32.gmra.mxu2 %v4667_v1  ;;  %v1516_v62 = vpop.f32.mrf.mxu0 }
 0x29a   : > { %v1581_v15 = vpop.f32.mrf.mxu1  ;;  %1970 = vmatmul.f32.gmra.mxu3 %v4671_v18 }
 0x29b   : > { %v1582_v48 = vadd.f32 %v1581_v15, %v1516_v62 }
 0x29c   : > { %v1646_v45 = vpop.f32.mrf.mxu2  ;;  %1775 = vmatmul.f32.gmra.mxu0 %v4675_v10 }
 0x29d   : > { %1840 = vmatmul.f32.gmra.mxu1 %v4679_v13  ;;  %v1711_v31 = vpop.f32.mrf.mxu3  ;;  %v1647_v20 = vadd.f32 %v1646_v45, %v1582_v48 }
 0x29f   : > { %v4866_v40 = vadd.f32 %v1711_v31, %v1647_v20 }
 0x2a1   : > { %5635 = vst [vmem:[#allocation93_spill] sm:$0xff] %v4866_v40  ;;  %1908 = vmatmul.f32.gmra.mxu2 %v4685_v19  ;;  %v1519_v14 = vpop.f32.mrf.mxu0 }
 0x2a2   : > { %v1584_v25 = vpop.f32.mrf.mxu1  ;;  %1973 = vmatmul.f32.gmra.mxu3 %v4689_v36 }
 0x2a3   : > { %v1585_v12 = vadd.f32 %v1584_v25, %v1519_v14 }
 0x2a4   : > { %v1649_v30 = vpop.f32.mrf.mxu2  ;;  %1778 = vmatmul.f32.gmra.mxu0 %v4693_v8 }
 0x2a5   : > { %1843 = vmatmul.f32.gmra.mxu1 %v4697_v28  ;;  %v1714_v62 = vpop.f32.mrf.mxu3  ;;  %v1650_v15 = vadd.f32 %v1649_v30, %v1585_v12 }
 0x2a7   : > { %v4872_v2 = vadd.f32 %v1714_v62, %v1650_v15 }
 0x2a9   : > { %5636 = vst [vmem:[#allocation94_spill] sm:$0xff] %v4872_v2  ;;  %1911 = vmatmul.f32.gmra.mxu2 %v4703_v41  ;;  %v1522_v48 = vpop.f32.mrf.mxu0 }
 0x2aa   : > { %v1587_v45 = vpop.f32.mrf.mxu1  ;;  %1976 = vmatmul.f32.gmra.mxu3 %v4707_v32 }
 0x2ab   : > { %v1588_v31 = vadd.f32 %v1587_v45, %v1522_v48 }
 0x2ac   : > { %v1652_v20 = vpop.f32.mrf.mxu2  ;;  %1781 = vmatmul.f32.gmra.mxu0 %v4711_v51 }
 0x2ad   : > { %1846 = vmatmul.f32.gmra.mxu1 %v4715_v60  ;;  %v1717_v14 = vpop.f32.mrf.mxu3  ;;  %v1653_v25 = vadd.f32 %v1652_v20, %v1588_v31 }
 0x2af   : > { %v4878_v40 = vadd.f32 %v1717_v14, %v1653_v25 }
 0x2b1   : > { %5637 = vst [vmem:[#allocation95_spill] sm:$0xff] %v4878_v40  ;;  %1914 = vmatmul.f32.gmra.mxu2 %v4721_v46  ;;  %v1525_v12 = vpop.f32.mrf.mxu0 }
 0x2b2   : > { %v1590_v30 = vpop.f32.mrf.mxu1  ;;  %1979 = vmatmul.f32.gmra.mxu3 %v4725_v0 }
 0x2b3   : > { %v1591_v62 = vadd.f32 %v1590_v30, %v1525_v12  ;;  %v5639_v12 = vld [vmem:[#allocation69_spill] sm:$0xff] }
 0x2b4   : > { %v1655_v15 = vpop.f32.mrf.mxu2  ;;  %1784 = vmatmul.f32.gmra.mxu0 %v4729_v61 }
 0x2b5   : > { %1849 = vmatmul.f32.gmra.mxu1 %v4733_v24  ;;  %v1720_v48 = vpop.f32.mrf.mxu3  ;;  %v1656_v45 = vadd.f32 %v1655_v15, %v1591_v62  ;;  %v5641_v24 = vld [vmem:[#allocation71_spill] sm:$0xff] }
 0x2b7   : > { %v4884_v2 = vadd.f32 %v1720_v48, %v1656_v45  ;;  %v5642_v48 = vld [vmem:[#allocation72_spill] sm:$0xff] }
 0x2b9   : > { %5638 = vst [vmem:[#allocation96_spill] sm:$0xff] %v4884_v2  ;;  %1917 = vmatmul.f32.gmra.mxu2 %v4739_v52  ;;  %v1528_v31 = vpop.f32.mrf.mxu0  ;;  %v5643_v52 = vld [vmem:[#allocation73_spill] sm:$0xff] }
 0x2ba   : > { %v1593_v20 = vpop.f32.mrf.mxu1  ;;  %1982 = vmatmul.f32.gmra.mxu3 %v4743_v6 }
 0x2bb   : > { %v1594_v14 = vadd.f32 %v1593_v20, %v1528_v31  ;;  %v5644_v31 = vld [vmem:[#allocation74_spill] sm:$0xff] }
 0x2bc   : > { %v1658_v25 = vpop.f32.mrf.mxu2  ;;  %1787 = vmatmul.f32.gmra.mxu0 %v4749_v22 }
 0x2bd   : > { %1852 = vmatmul.f32.gmra.mxu1 %v5639_v12  ;;  %v1723_v30 = vpop.f32.mrf.mxu3  ;;  %v1659_v40 = vadd.f32 %v1658_v25, %v1594_v14 }
 0x2bf   : > { %v4890_v61 = vadd.f32 %v1723_v30, %v1659_v40  ;;  %v5646_v40 = vld [vmem:[#allocation76_spill] sm:$0xff]  ;;  %v5647_v30 = vld [vmem:[#allocation77_spill] sm:$0xff] }
 0x2c1   : > { %5640 = vst [vmem:[#allocation97_spill] sm:$0xff] %v4890_v61  ;;  %1920 = vmatmul.f32.gmra.mxu2 %v5641_v24  ;;  %v1531_v62 = vpop.f32.mrf.mxu0  ;;  %v2474_v24 = vld [vmem:[%s4160_s24 + $0x10] sm:$0xff] }
 0x2c2   : > { %v1596_v15 = vpop.f32.mrf.mxu1  ;;  %1985 = vmatmul.f32.gmra.mxu3 %v5642_v48  ;;  %2669 = vmatpush.msrb.mxu2 %v2474_v24 }
 0x2c3   : > { %v1597_v45 = vadd.f32 %v1596_v15, %v1531_v62  ;;  %v5648_v15 = vld [vmem:[#allocation78_spill] sm:$0xff] }
 0x2c4   : > { %v1661_v2 = vpop.f32.mrf.mxu2  ;;  %1790 = vmatmul.f32.gmra.mxu0 %v5643_v52  ;;  %v5649_v52 = vld [vmem:[#allocation79_spill] sm:$0xff] }
 0x2c5   : > { %1855 = vmatmul.f32.gmra.mxu1 %v5644_v31  ;;  %v1726_v20 = vpop.f32.mrf.mxu3  ;;  %v1662_v12 = vadd.f32 %v1661_v2, %v1597_v45  ;;  %v2475_v2 = vld [vmem:[%s4160_s24 + $0x18] sm:$0xff]  ;;  %v5650_v45 = vld [vmem:[#allocation81_spill] sm:$0xff] }
 0x2c6   : > { %2734 = vmatpush.msrb.mxu3 %v2475_v2 }
 0x2c7   : > { %v4896_v22 = vadd.f32 %v1726_v20, %v1662_v12 }
 0x2c9   : > { %5645 = vst [vmem:[#allocation98_spill] sm:$0xff] %v4896_v22  ;;  %1923 = vmatmul.f32.gmra.mxu2 %v5646_v40  ;;  %v1534_v14 = vpop.f32.mrf.mxu0  ;;  %v2473_v40 = vld [vmem:[%s4160_s24 + $0x8] sm:$0xff] }
 0x2ca   : > { %v1599_v25 = vpop.f32.mrf.mxu1  ;;  %1988 = vmatmul.f32.gmra.mxu3 %v5647_v30  ;;  %v2472_v30 = vld [vmem:[%s4160_s24] sm:$0xff]  ;;  %2604 = vmatpush.msrb.mxu1 %v2473_v40 }
 0x2cb   : > { %v1600_v61 = vadd.f32 %v1599_v25, %v1534_v14  ;;  %v5651_v14 = vld [vmem:[#allocation82_spill] sm:$0xff]  ;;  %2539 = vmatpush.msrb.mxu0 %v2472_v30 }
 0x2cc   : > { %v1664_v62 = vpop.f32.mrf.mxu2  ;;  %1793 = vmatmul.f32.gmra.mxu0 %v5648_v15  ;;  %v5652_v15 = vld [vmem:[#allocation83_spill] sm:$0xff] }
 0x2cd   : > { %1858 = vmatmul.f32.gmra.mxu1 %v5649_v52  ;;  %v1729_v48 = vpop.f32.mrf.mxu3  ;;  %v1665_v31 = vadd.f32 %v1664_v62, %v1600_v61 }
 0x2cf   : > { %v4904_v12 = vadd.f32 %v1729_v48, %v1665_v31 }
 0x2d1   : > { %1926 = vmatmul.f32.gmra.mxu2 %v5650_v45  ;;  %v1537_v20 = vpop.f32.mrf.mxu0 }
 0x2d2   : > { %v1602_v22 = vpop.f32.mrf.mxu1  ;;  %1991 = vmatmul.f32.gmra.mxu3 %v5651_v14 }
 0x2d3   : > { %v1603_v25 = vadd.f32 %v1602_v22, %v1537_v20 }
 0x2d4   : > { %v1667_v52 = vpop.f32.mrf.mxu2  ;;  %1796 = vmatmul.f32.gmra.mxu0 %v5652_v15 }
 0x2d5   : > { %1861 = vmatmul.f32.gmra.mxu1 %v4809_v56  ;;  %v1732_v61 = vpop.f32.mrf.mxu3  ;;  %v1668_v24 = vadd.f32 %v1667_v52, %v1603_v25 }
 0x2d7   : > { %v4912_v48 = vadd.f32 %v1732_v61, %v1668_v24 }
 0x2d9   : > { %2289 = vmatmul.f32.vlgmr.msra.gmra.mxu2 %v4523_v21  ;;  %v1752_v31 = vpop.f32.mrf.mxu0 }
 0x2da   : > { %v1817_v62 = vpop.f32.mrf.mxu1  ;;  %2354 = vmatmul.f32.vlgmr.msra.gmra.mxu3 %v4527_v11 }
 0x2db   : > { %v1818_v22 = vadd.f32 %v1817_v62, %v1752_v31 }
 0x2dc   : > { %v1882_v2 = vpop.f32.mrf.mxu2  ;;  %2159 = vmatmul.f32.vlgmr.msra.gmra.mxu0 %v4531_v29 }
 0x2dd   : > { %2224 = vmatmul.f32.vlgmr.msra.gmra.mxu1 %v4535_v16  ;;  %v1947_v40 = vpop.f32.mrf.mxu3  ;;  %v1883_v30 = vadd.f32 %v1882_v2, %v1818_v22 }
 0x2df   : > { %v4918_v20 = vadd.f32 %v1947_v40, %v1883_v30 }
 0x2e1   : > { %2292 = vmatmul.f32.gmra.mxu2 %v4541_v50  ;;  %v1755_v52 = vpop.f32.mrf.mxu0 }
 0x2e2   : > { %v1820_v25 = vpop.f32.mrf.mxu1  ;;  %2357 = vmatmul.f32.gmra.mxu3 %v4545_v4 }
 0x2e3   : > { %v1821_v21 = vadd.f32 %v1820_v25, %v1755_v52 }
 0x2e4   : > { %v1885_v61 = vpop.f32.mrf.mxu2  ;;  %2162 = vmatmul.f32.gmra.mxu0 %v4549_v27 }
 0x2e5   : > { %2227 = vmatmul.f32.gmra.mxu1 %v4553_v34  ;;  %v1950_v11 = vpop.f32.mrf.mxu3  ;;  %v1886_v29 = vadd.f32 %v1885_v61, %v1821_v21 }
 0x2e7   : > { %v4924_v24 = vadd.f32 %v1950_v11, %v1886_v29 }
 0x2e9   : > { %2295 = vmatmul.f32.gmra.mxu2 %v4559_v58  ;;  %v1758_v16 = vpop.f32.mrf.mxu0 }
 0x2ea   : > { %v1823_v31 = vpop.f32.mrf.mxu1  ;;  %2360 = vmatmul.f32.gmra.mxu3 %v4563_v39 }
 0x2eb   : > { %v1824_v50 = vadd.f32 %v1823_v31, %v1758_v16 }
 0x2ec   : > { %v1888_v62 = vpop.f32.mrf.mxu2  ;;  %2165 = vmatmul.f32.gmra.mxu0 %v4567_v3 }
 0x2ed   : > { %2230 = vmatmul.f32.gmra.mxu1 %v4571_v47  ;;  %v1953_v4 = vpop.f32.mrf.mxu3  ;;  %v1889_v27 = vadd.f32 %v1888_v62, %v1824_v50 }
 0x2ef   : > { %v4930_v22 = vadd.f32 %v1953_v4, %v1889_v27 }
 0x2f1   : > { %2298 = vmatmul.f32.gmra.mxu2 %v4577_v7  ;;  %v1761_v34 = vpop.f32.mrf.mxu0 }
 0x2f2   : > { %v1826_v2 = vpop.f32.mrf.mxu1  ;;  %2363 = vmatmul.f32.gmra.mxu3 %v4581_v63 }
 0x2f3   : > { %v1827_v58 = vadd.f32 %v1826_v2, %v1761_v34  ;;  %v5653_v2 = vld [vmem:[#allocation64_spill] sm:$0xff] }
 0x2f4   : > { %v1891_v40 = vpop.f32.mrf.mxu2  ;;  %2168 = vmatmul.f32.gmra.mxu0 %v4585_v44 }
 0x2f5   : > { %2233 = vmatmul.f32.gmra.mxu1 %v4589_v17  ;;  %v1956_v39 = vpop.f32.mrf.mxu3  ;;  %v1892_v3 = vadd.f32 %v1891_v40, %v1827_v58  ;;  %v3835_v40 = vmov 0.0  }
 0x2f6   : > { %555 = vst.msk [vmem:[#allocation3] sm:$0xff] %vm554_vm0, %v3835_v40 }
 0x2f7   : > { %v4936_v30 = vadd.f32 %v1956_v39, %v1892_v3  ;;  %556 = vst.msk [vmem:[#allocation3 + $0x8] sm:$0xff] %vm554_vm0, %v3835_v40  ;;  %v5656_v39 = vld [vmem:[#allocation68_spill] sm:$0xff]  ;;  %v5657_v3 = vld [vmem:[#allocation69_spill] sm:$0xff] }
 0x2f8   : > { %557 = vst.msk [vmem:[#allocation3 + $0x10] sm:$0xff] %vm554_vm0, %v3835_v40 }
 0x2f9   : > { %2301 = vmatmul.f32.gmra.mxu2 %v4595_v5  ;;  %v1764_v47 = vpop.f32.mrf.mxu0  ;;  %558 = vst.msk [vmem:[#allocation3 + $0x18] sm:$0xff] %vm554_vm0, %v3835_v40 }
 0x2fa   : > { %v1829_v52 = vpop.f32.mrf.mxu1  ;;  %2366 = vmatmul.f32.gmra.mxu3 %v4599_v26  ;;  %559 = vst.msk [vmem:[#allocation3 + $0x20] sm:$0xff] %vm554_vm0, %v3835_v40 }
 0x2fb   : > { %v1830_v7 = vadd.f32 %v1829_v52, %v1764_v47  ;;  %560 = vst.msk [vmem:[#allocation3 + $0x28] sm:$0xff] %vm554_vm0, %v3835_v40 }
 0x2fc   : > { %v1894_v25 = vpop.f32.mrf.mxu2  ;;  %2171 = vmatmul.f32.gmra.mxu0 %v4603_v59  ;;  %561 = vst.msk [vmem:[#allocation3 + $0x30] sm:$0xff] %vm554_vm0, %v3835_v40 }
 0x2fd   : > { %2236 = vmatmul.f32.gmra.mxu1 %v4607_v38  ;;  %v1959_v63 = vpop.f32.mrf.mxu3  ;;  %v1895_v44 = vadd.f32 %v1894_v25, %v1830_v7  ;;  %562 = vst.msk [vmem:[#allocation3 + $0x38] sm:$0xff] %vm554_vm0, %v3835_v40  ;;  %v5659_v25 = vld [vmem:[#allocation72_spill] sm:$0xff] }
 0x2fe   : > { %563 = vst.msk [vmem:[#allocation3 + $0x40] sm:$0xff] %vm554_vm0, %v3835_v40 }
 0x2ff   : > { %v4942_v21 = vadd.f32 %v1959_v63, %v1895_v44  ;;  %564 = vst.msk [vmem:[#allocation3 + $0x48] sm:$0xff] %vm554_vm0, %v3835_v40  ;;  %v5660_v44 = vld [vmem:[#allocation73_spill] sm:$0xff] }
 0x300   : > { %565 = vst.msk [vmem:[#allocation3 + $0x50] sm:$0xff] %vm554_vm0, %v3835_v40 }
 0x301   : > { %2304 = vmatmul.f32.gmra.mxu2 %v4613_v54  ;;  %v1767_v17 = vpop.f32.mrf.mxu0  ;;  %566 = vst.msk [vmem:[#allocation3 + $0x58] sm:$0xff] %vm554_vm0, %v3835_v40 }
 0x302   : > { %v1832_v61 = vpop.f32.mrf.mxu1  ;;  %2369 = vmatmul.f32.gmra.mxu3 %v4617_v43  ;;  %567 = vst.msk [vmem:[#allocation3 + $0x60] sm:$0xff] %vm554_vm0, %v3835_v40 }
 0x303   : > { %v1833_v5 = vadd.f32 %v1832_v61, %v1767_v17  ;;  %v5661_v17 = vld [vmem:[#allocation74_spill] sm:$0xff]  ;;  %568 = vst.msk [vmem:[#allocation3 + $0x68] sm:$0xff] %vm554_vm0, %v3835_v40 }
 0x304   : > { %v1897_v11 = vpop.f32.mrf.mxu2  ;;  %2174 = vmatmul.f32.gmra.mxu0 %v4621_v49  ;;  %569 = vst.msk [vmem:[#allocation3 + $0x70] sm:$0xff] %vm554_vm0, %v3835_v40 }
 0x305   : > { %2239 = vmatmul.f32.gmra.mxu1 %v4625_v23  ;;  %v1962_v26 = vpop.f32.mrf.mxu3  ;;  %v1898_v59 = vadd.f32 %v1897_v11, %v1833_v5  ;;  %570 = vst.msk [vmem:[#allocation3 + $0x78] sm:$0xff] %vm554_vm0, %v3835_v40  ;;  %v5662_v5 = vld [vmem:[#allocation76_spill] sm:$0xff] }
 0x307   : > { %v4948_v29 = vadd.f32 %v1962_v26, %v1898_v59  ;;  %v5664_v59 = vld [vmem:[#allocation77_spill] sm:$0xff] }
 0x309   : > { %2307 = vmatmul.f32.gmra.mxu2 %v4631_v57  ;;  %v1770_v38 = vpop.f32.mrf.mxu0 }
 0x30a   : > { %v1835_v16 = vpop.f32.mrf.mxu1  ;;  %2372 = vmatmul.f32.gmra.mxu3 %v4635_v37 }
 0x30b   : > { %v1836_v54 = vadd.f32 %v1835_v16, %v1770_v38  ;;  %v5665_v16 = vld [vmem:[#allocation78_spill] sm:$0xff] }
 0x30c   : > { %v1900_v31 = vpop.f32.mrf.mxu2  ;;  %2177 = vmatmul.f32.gmra.mxu0 %v4639_v55 }
 0x30d   : > { %2242 = vmatmul.f32.gmra.mxu1 %v4643_v42  ;;  %v1965_v43 = vpop.f32.mrf.mxu3  ;;  %v1901_v49 = vadd.f32 %v1900_v31, %v1836_v54  ;;  %v5666_v54 = vld [vmem:[#allocation79_spill] sm:$0xff] }
 0x30f   : > { %v4954_v50 = vadd.f32 %v1965_v43, %v1901_v49 }
 0x311   : > { %2310 = vmatmul.f32.gmra.mxu2 %v4649_v33  ;;  %v1773_v23 = vpop.f32.mrf.mxu0 }
 0x312   : > { %v1838_v62 = vpop.f32.mrf.mxu1  ;;  %2375 = vmatmul.f32.gmra.mxu3 %v4653_v35 }
 0x313   : > { %v1839_v57 = vadd.f32 %v1838_v62, %v1773_v23 }
 0x314   : > { %v1903_v4 = vpop.f32.mrf.mxu2  ;;  %2180 = vmatmul.f32.gmra.mxu0 %v4657_v53 }
 0x315   : > { %2245 = vmatmul.f32.gmra.mxu1 %v4661_v9  ;;  %v1968_v37 = vpop.f32.mrf.mxu3  ;;  %v1904_v55 = vadd.f32 %v1903_v4, %v1839_v57 }
 0x317   : > { %v4960_v27 = vadd.f32 %v1968_v37, %v1904_v55 }
 0x319   : > { %2313 = vmatmul.f32.gmra.mxu2 %v4667_v1  ;;  %v4963_v42 = vpop.f32.mrf.mxu0 }
 0x31a   : > { %v4965_v34 = vpop.f32.mrf.mxu1  ;;  %2378 = vmatmul.f32.gmra.mxu3 %v4671_v18 }
 0x31c   : > { %v4968_v33 = vpop.f32.mrf.mxu2  ;;  %2183 = vmatmul.f32.gmra.mxu0 %v4675_v10 }
 0x31d   : > { %2248 = vmatmul.f32.gmra.mxu1 %v4679_v13  ;;  %v4972_v35 = vpop.f32.mrf.mxu3 }
 0x321   : > { %2316 = vmatmul.f32.gmra.mxu2 %v4685_v19  ;;  %v4975_v53 = vpop.f32.mrf.mxu0 }
 0x322   : > { %v4977_v9 = vpop.f32.mrf.mxu1  ;;  %2381 = vmatmul.f32.gmra.mxu3 %v4689_v36 }
 0x324   : > { %v4980_v1 = vpop.f32.mrf.mxu2  ;;  %2186 = vmatmul.f32.gmra.mxu0 %v4693_v8 }
 0x325   : > { %2251 = vmatmul.f32.gmra.mxu1 %v4697_v28  ;;  %v4984_v18 = vpop.f32.mrf.mxu3 }
 0x329   : > { %2319 = vmatmul.f32.gmra.mxu2 %v4703_v41  ;;  %v4987_v10 = vpop.f32.mrf.mxu0 }
 0x32a   : > { %v4989_v13 = vpop.f32.mrf.mxu1  ;;  %2384 = vmatmul.f32.gmra.mxu3 %v4707_v32  ;;  %v5654_v32 = vld [vmem:[#allocation65_spill] sm:$0xff] }
 0x32c   : > { %v4992_v19 = vpop.f32.mrf.mxu2  ;;  %2189 = vmatmul.f32.gmra.mxu0 %v4711_v51  ;;  %v5655_v51 = vld [vmem:[#allocation67_spill] sm:$0xff] }
 0x32d   : > { %2254 = vmatmul.f32.gmra.mxu1 %v4715_v60  ;;  %v4996_v36 = vpop.f32.mrf.mxu3 }
 0x331   : > { %2322 = vmatmul.f32.gmra.mxu2 %v4721_v46  ;;  %v4999_v8 = vpop.f32.mrf.mxu0 }
 0x332   : > { %v5001_v28 = vpop.f32.mrf.mxu1  ;;  %2387 = vmatmul.f32.gmra.mxu3 %v4725_v0 }
 0x334   : > { %v5004_v41 = vpop.f32.mrf.mxu2  ;;  %2192 = vmatmul.f32.gmra.mxu0 %v5653_v2 }
 0x335   : > { %2257 = vmatmul.f32.gmra.mxu1 %v5654_v32  ;;  %v5008_v58 = vpop.f32.mrf.mxu3  ;;  %v2123_v32 = vld [vmem:[#allocation3] sm:$0xff] }
 0x339   : > { %2325 = vmatmul.f32.gmra.mxu2 %v5655_v51  ;;  %v5011_v60 = vpop.f32.mrf.mxu0 }
 0x33a   : > { %v5013_v46 = vpop.f32.mrf.mxu1  ;;  %2390 = vmatmul.f32.gmra.mxu3 %v4743_v6  ;;  %v5658_v6 = vld [vmem:[#allocation71_spill] sm:$0xff] }
 0x33c   : > { %v5019_v0 = vpop.f32.mrf.mxu2  ;;  %2195 = vmatmul.f32.gmra.mxu0 %v5656_v39 }
 0x33d   : > { %2260 = vmatmul.f32.gmra.mxu1 %v5657_v3  ;;  %v5023_v47 = vpop.f32.mrf.mxu3 }
 0x341   : > { %2328 = vmatmul.f32.gmra.mxu2 %v5658_v6  ;;  %v5031_v52 = vpop.f32.mrf.mxu0 }
 0x342   : > { %v5033_v7 = vpop.f32.mrf.mxu1  ;;  %2393 = vmatmul.f32.gmra.mxu3 %v5659_v25  ;;  %v2124_v25 = vld [vmem:[#allocation3 + $0x8] sm:$0xff] }
 0x344   : > { %v5039_v63 = vpop.f32.mrf.mxu2  ;;  %2198 = vmatmul.f32.gmra.mxu0 %v5660_v44 }
 0x345   : > { %2263 = vmatmul.f32.gmra.mxu1 %v5661_v17  ;;  %v5043_v61 = vpop.f32.mrf.mxu3  ;;  %v5076_v17 = vstv %s475_s3 }
 0x349   : > { %2331 = vmatmul.f32.gmra.mxu2 %v5662_v5  ;;  %v5051_v11 = vpop.f32.mrf.mxu0 }
 0x34a   : > { %v5053_v26 = vpop.f32.mrf.mxu1  ;;  %2396 = vmatmul.f32.gmra.mxu3 %v5664_v59 }
 0x34c   : > { %v5056_v38 = vpop.f32.mrf.mxu2  ;;  %2201 = vmatmul.f32.gmra.mxu0 %v5665_v16 }
 0x34d   : > { %2266 = vmatmul.f32.gmra.mxu1 %v5666_v54  ;;  %v5060_v31 = vpop.f32.mrf.mxu3 }
 0x351   : > { %2334 = vmatmul.f32.gmra.mxu2 %v5650_v45  ;;  %v5063_v43 = vpop.f32.mrf.mxu0 }
 0x352   : > { %v5065_v49 = vpop.f32.mrf.mxu1  ;;  %2399 = vmatmul.f32.gmra.mxu3 %v5651_v14 }
 0x354   : > { %v5068_v23 = vpop.f32.mrf.mxu2  ;;  %2204 = vmatmul.f32.gmra.mxu0 %v5652_v15 }
 0x355   : > { %2269 = vmatmul.f32.gmra.mxu1 %v4809_v56  ;;  %v5072_v62 = vpop.f32.mrf.mxu3 }
 0x359   : > { %v2160_v57 = vpop.f32.mrf.mxu0 }
 0x35a   : > { %v2225_v4 = vpop.f32.mrf.mxu1 }
 0x35b   : > { %v2226_v37 = vadd.f32 %v2225_v4, %v2160_v57 }
 0x35c   : > { %v2290_v55 = vpop.f32.mrf.mxu2 }
 0x35d   : > { %v2355_v45 = vpop.f32.mrf.mxu3  ;;  %v2291_v2 = vadd.f32 %v2290_v55, %v2226_v37 }
 0x35f   : > { %v2356_v51 = vadd.f32 %v2355_v45, %v2291_v2  ;;  %v2125_v2 = vld [vmem:[#allocation3 + $0x10] sm:$0xff] }
 0x361   : > { %v2403_v40 = vadd.f32 %v2356_v51, %v2123_v32  ;;  %v2163_v14 = vpop.f32.mrf.mxu0 }
 0x362   : > { %v2228_v39 = vpop.f32.mrf.mxu1 }
 0x363   : > { %v2229_v3 = vadd.f32 %v2228_v39, %v2163_v14  ;;  %2420 = vst.msk [vmem:[#allocation3] sm:$0xff] %vm554_vm0, %v2403_v40 }
 0x364   : > { %v2293_v15 = vpop.f32.mrf.mxu2 }
 0x365   : > { %v2358_v56 = vpop.f32.mrf.mxu3  ;;  %v2294_v6 = vadd.f32 %v2293_v15, %v2229_v3 }
 0x367   : > { %v2359_v44 = vadd.f32 %v2358_v56, %v2294_v6 }
 0x369   : > { %v2404_v5 = vadd.f32 %v2359_v44, %v2124_v25  ;;  %v2166_v59 = vpop.f32.mrf.mxu0  ;;  %v2126_v44 = vld [vmem:[#allocation3 + $0x18] sm:$0xff] }
 0x36a   : > { %v2231_v16 = vpop.f32.mrf.mxu1  ;;  %v2439_v57 = vld [vmem:[#allocation3] sm:$0xff] }
 0x36b   : > { %v2232_v54 = vadd.f32 %v2231_v16, %v2166_v59  ;;  %2421 = vst.msk [vmem:[#allocation3 + $0x8] sm:$0xff] %vm554_vm0, %v2404_v5  ;;  %v2456_v4 = vmul.f32 %v5076_v17, %v2439_v57 }
 0x36c   : > { %v2296_v37 = vpop.f32.mrf.mxu2 }
 0x36d   : > { %v2361_v55 = vpop.f32.mrf.mxu3  ;;  %v2297_v45 = vadd.f32 %v2296_v37, %v2232_v54  ;;  %3197 = vmatmul.msk.f32.vlgmr.msrb.gmra.mxu0 %vm554_vm0, %v2456_v4  ;;  %3213 = vmatmul.msk.f32.vlgmr.msrb.gmra.mxu1 %vm554_vm0, %v2456_v4 }
 0x36e   : > { %3229 = vmatmul.msk.f32.vlgmr.msrb.gmra.mxu2 %vm554_vm0, %v2456_v4  ;;  %3245 = vmatmul.msk.f32.vlgmr.msrb.gmra.mxu3 %vm554_vm0, %v2456_v4 }
 0x36f   : > { %v2362_v32 = vadd.f32 %v2361_v55, %v2297_v45 }
 0x371   : > { %v2405_v51 = vadd.f32 %v2362_v32, %v2125_v2  ;;  %v2169_v40 = vpop.f32.mrf.mxu0  ;;  %v2127_v32 = vld [vmem:[#allocation3 + $0x20] sm:$0xff] }
 0x372   : > { %v2234_v14 = vpop.f32.mrf.mxu1  ;;  %v2440_v3 = vld [vmem:[#allocation3 + $0x8] sm:$0xff] }
 0x373   : > { %v2235_v39 = vadd.f32 %v2234_v14, %v2169_v40  ;;  %2422 = vst.msk [vmem:[#allocation3 + $0x10] sm:$0xff] %vm554_vm0, %v2405_v51  ;;  %v2457_v15 = vmul.f32 %v5076_v17, %v2440_v3 }
 0x374   : > { %v2299_v56 = vpop.f32.mrf.mxu2 }
 0x375   : > { %v2364_v6 = vpop.f32.mrf.mxu3  ;;  %v2300_v25 = vadd.f32 %v2299_v56, %v2235_v39  ;;  %3198 = vmatmul.msk.f32.gmra.mxu0 %vm554_vm0, %v2457_v15  ;;  %3214 = vmatmul.msk.f32.gmra.mxu1 %vm554_vm0, %v2457_v15 }
 0x376   : > { %3230 = vmatmul.msk.f32.gmra.mxu2 %vm554_vm0, %v2457_v15  ;;  %3246 = vmatmul.msk.f32.gmra.mxu3 %vm554_vm0, %v2457_v15 }
 0x377   : > { %v2365_v5 = vadd.f32 %v2364_v6, %v2300_v25 }
 0x379   : > { %v2406_v59 = vadd.f32 %v2365_v5, %v2126_v44  ;;  %v2172_v16 = vpop.f32.mrf.mxu0  ;;  %v2128_v5 = vld [vmem:[#allocation3 + $0x28] sm:$0xff] }
 0x37a   : > { %v2237_v54 = vpop.f32.mrf.mxu1  ;;  %v2441_v4 = vld [vmem:[#allocation3 + $0x10] sm:$0xff] }
 0x37b   : > { %v2238_v57 = vadd.f32 %v2237_v54, %v2172_v16  ;;  %2423 = vst.msk [vmem:[#allocation3 + $0x18] sm:$0xff] %vm554_vm0, %v2406_v59  ;;  %v2458_v37 = vmul.f32 %v5076_v17, %v2441_v4 }
 0x37c   : > { %v2302_v55 = vpop.f32.mrf.mxu2 }
 0x37d   : > { %v2367_v45 = vpop.f32.mrf.mxu3  ;;  %v2303_v2 = vadd.f32 %v2302_v55, %v2238_v57  ;;  %3199 = vmatmul.msk.f32.gmra.mxu0 %vm554_vm0, %v2458_v37  ;;  %3215 = vmatmul.msk.f32.gmra.mxu1 %vm554_vm0, %v2458_v37 }
 0x37e   : > { %3231 = vmatmul.msk.f32.gmra.mxu2 %vm554_vm0, %v2458_v37  ;;  %3247 = vmatmul.msk.f32.gmra.mxu3 %vm554_vm0, %v2458_v37 }
 0x37f   : > { %v2368_v51 = vadd.f32 %v2367_v45, %v2303_v2 }
 0x381   : > { %v2407_v40 = vadd.f32 %v2368_v51, %v2127_v32  ;;  %v2175_v14 = vpop.f32.mrf.mxu0  ;;  %v2129_v51 = vld [vmem:[#allocation3 + $0x30] sm:$0xff] }
 0x382   : > { %v2240_v39 = vpop.f32.mrf.mxu1  ;;  %v2442_v15 = vld [vmem:[#allocation3 + $0x18] sm:$0xff] }
 0x383   : > { %v2241_v3 = vadd.f32 %v2240_v39, %v2175_v14  ;;  %2424 = vst.msk [vmem:[#allocation3 + $0x20] sm:$0xff] %vm554_vm0, %v2407_v40  ;;  %v2459_v56 = vmul.f32 %v5076_v17, %v2442_v15 }
 0x384   : > { %v2305_v6 = vpop.f32.mrf.mxu2 }
 0x385   : > { %v2370_v25 = vpop.f32.mrf.mxu3  ;;  %v2306_v44 = vadd.f32 %v2305_v6, %v2241_v3  ;;  %3200 = vmatmul.msk.f32.gmra.mxu0 %vm554_vm0, %v2459_v56  ;;  %3216 = vmatmul.msk.f32.gmra.mxu1 %vm554_vm0, %v2459_v56 }
 0x386   : > { %3232 = vmatmul.msk.f32.gmra.mxu2 %vm554_vm0, %v2459_v56  ;;  %3248 = vmatmul.msk.f32.gmra.mxu3 %vm554_vm0, %v2459_v56 }
 0x387   : > { %v2371_v59 = vadd.f32 %v2370_v25, %v2306_v44 }
 0x389   : > { %v2408_v16 = vadd.f32 %v2371_v59, %v2128_v5  ;;  %v2178_v54 = vpop.f32.mrf.mxu0  ;;  %v2130_v59 = vld [vmem:[#allocation3 + $0x38] sm:$0xff] }
 0x38a   : > { %v2243_v57 = vpop.f32.mrf.mxu1  ;;  %v2443_v37 = vld [vmem:[#allocation3 + $0x20] sm:$0xff] }
 0x38b   : > { %v2244_v4 = vadd.f32 %v2243_v57, %v2178_v54  ;;  %2425 = vst.msk [vmem:[#allocation3 + $0x28] sm:$0xff] %vm554_vm0, %v2408_v16  ;;  %v2460_v55 = vmul.f32 %v5076_v17, %v2443_v37 }
 0x38c   : > { %v2308_v45 = vpop.f32.mrf.mxu2 }
 0x38d   : > { %v2373_v2 = vpop.f32.mrf.mxu3  ;;  %v2309_v32 = vadd.f32 %v2308_v45, %v2244_v4  ;;  %3201 = vmatmul.msk.f32.gmra.mxu0 %vm554_vm0, %v2460_v55  ;;  %3217 = vmatmul.msk.f32.gmra.mxu1 %vm554_vm0, %v2460_v55 }
 0x38e   : > { %3233 = vmatmul.msk.f32.gmra.mxu2 %vm554_vm0, %v2460_v55  ;;  %3249 = vmatmul.msk.f32.gmra.mxu3 %vm554_vm0, %v2460_v55 }
 0x38f   : > { %v2374_v40 = vadd.f32 %v2373_v2, %v2309_v32 }
 0x391   : > { %v2409_v14 = vadd.f32 %v2374_v40, %v2129_v51  ;;  %v2181_v39 = vpop.f32.mrf.mxu0  ;;  %v2131_v40 = vld [vmem:[#allocation3 + $0x40] sm:$0xff] }
 0x392   : > { %v2246_v3 = vpop.f32.mrf.mxu1  ;;  %v2444_v56 = vld [vmem:[#allocation3 + $0x28] sm:$0xff] }
 0x393   : > { %v2247_v15 = vadd.f32 %v2246_v3, %v2181_v39  ;;  %2426 = vst.msk [vmem:[#allocation3 + $0x30] sm:$0xff] %vm554_vm0, %v2409_v14  ;;  %v2461_v6 = vmul.f32 %v5076_v17, %v2444_v56 }
 0x394   : > { %v2311_v25 = vpop.f32.mrf.mxu2 }
 0x395   : > { %v2376_v44 = vpop.f32.mrf.mxu3  ;;  %v2312_v5 = vadd.f32 %v2311_v25, %v2247_v15  ;;  %3202 = vmatmul.msk.f32.gmra.mxu0 %vm554_vm0, %v2461_v6  ;;  %3218 = vmatmul.msk.f32.gmra.mxu1 %vm554_vm0, %v2461_v6 }
 0x396   : > { %3234 = vmatmul.msk.f32.gmra.mxu2 %vm554_vm0, %v2461_v6  ;;  %3250 = vmatmul.msk.f32.gmra.mxu3 %vm554_vm0, %v2461_v6 }
 0x397   : > { %v2377_v16 = vadd.f32 %v2376_v44, %v2312_v5 }
 0x399   : > { %v2410_v54 = vadd.f32 %v2377_v16, %v2130_v59  ;;  %v2184_v57 = vpop.f32.mrf.mxu0  ;;  %v2132_v16 = vld [vmem:[#allocation3 + $0x48] sm:$0xff] }
 0x39a   : > { %v2249_v4 = vpop.f32.mrf.mxu1  ;;  %v2445_v55 = vld [vmem:[#allocation3 + $0x30] sm:$0xff] }
 0x39b   : > { %v2250_v37 = vadd.f32 %v2249_v4, %v2184_v57  ;;  %2427 = vst.msk [vmem:[#allocation3 + $0x38] sm:$0xff] %vm554_vm0, %v2410_v54  ;;  %v2462_v45 = vmul.f32 %v5076_v17, %v2445_v55 }
 0x39c   : > { %v2314_v2 = vpop.f32.mrf.mxu2 }
 0x39d   : > { %v2379_v32 = vpop.f32.mrf.mxu3  ;;  %v2315_v51 = vadd.f32 %v2314_v2, %v2250_v37  ;;  %3203 = vmatmul.msk.f32.gmra.mxu0 %vm554_vm0, %v2462_v45  ;;  %3219 = vmatmul.msk.f32.gmra.mxu1 %vm554_vm0, %v2462_v45 }
 0x39e   : > { %3235 = vmatmul.msk.f32.gmra.mxu2 %vm554_vm0, %v2462_v45  ;;  %3251 = vmatmul.msk.f32.gmra.mxu3 %vm554_vm0, %v2462_v45 }
 0x39f   : > { %v2380_v14 = vadd.f32 %v2379_v32, %v2315_v51 }
 0x3a1   : > { %v2411_v39 = vadd.f32 %v2380_v14, %v2131_v40  ;;  %v2187_v3 = vpop.f32.mrf.mxu0  ;;  %v2133_v14 = vld [vmem:[#allocation3 + $0x50] sm:$0xff] }
 0x3a2   : > { %v2252_v15 = vpop.f32.mrf.mxu1  ;;  %v2446_v6 = vld [vmem:[#allocation3 + $0x38] sm:$0xff] }
 0x3a3   : > { %v2253_v56 = vadd.f32 %v2252_v15, %v2187_v3  ;;  %2428 = vst.msk [vmem:[#allocation3 + $0x40] sm:$0xff] %vm554_vm0, %v2411_v39  ;;  %v2463_v25 = vmul.f32 %v5076_v17, %v2446_v6 }
 0x3a4   : > { %v2317_v44 = vpop.f32.mrf.mxu2 }
 0x3a5   : > { %v2382_v5 = vpop.f32.mrf.mxu3  ;;  %v2318_v59 = vadd.f32 %v2317_v44, %v2253_v56  ;;  %3204 = vmatmul.msk.f32.gmra.mxu0 %vm554_vm0, %v2463_v25  ;;  %3220 = vmatmul.msk.f32.gmra.mxu1 %vm554_vm0, %v2463_v25 }
 0x3a6   : > { %3236 = vmatmul.msk.f32.gmra.mxu2 %vm554_vm0, %v2463_v25  ;;  %3252 = vmatmul.msk.f32.gmra.mxu3 %vm554_vm0, %v2463_v25 }
 0x3a7   : > { %v2383_v54 = vadd.f32 %v2382_v5, %v2318_v59 }
 0x3a9   : > { %v2412_v57 = vadd.f32 %v2383_v54, %v2132_v16  ;;  %v2190_v4 = vpop.f32.mrf.mxu0  ;;  %v2134_v54 = vld [vmem:[#allocation3 + $0x58] sm:$0xff] }
 0x3aa   : > { %v2255_v37 = vpop.f32.mrf.mxu1  ;;  %v2447_v45 = vld [vmem:[#allocation3 + $0x40] sm:$0xff] }
 0x3ab   : > { %v2256_v55 = vadd.f32 %v2255_v37, %v2190_v4  ;;  %2429 = vst.msk [vmem:[#allocation3 + $0x48] sm:$0xff] %vm554_vm0, %v2412_v57  ;;  %v2464_v2 = vmul.f32 %v5076_v17, %v2447_v45 }
 0x3ac   : > { %v2320_v32 = vpop.f32.mrf.mxu2 }
 0x3ad   : > { %v2385_v51 = vpop.f32.mrf.mxu3  ;;  %v2321_v40 = vadd.f32 %v2320_v32, %v2256_v55  ;;  %3205 = vmatmul.msk.f32.gmra.mxu0 %vm554_vm0, %v2464_v2  ;;  %3221 = vmatmul.msk.f32.gmra.mxu1 %vm554_vm0, %v2464_v2 }
 0x3ae   : > { %3237 = vmatmul.msk.f32.gmra.mxu2 %vm554_vm0, %v2464_v2  ;;  %3253 = vmatmul.msk.f32.gmra.mxu3 %vm554_vm0, %v2464_v2 }
 0x3af   : > { %v2386_v39 = vadd.f32 %v2385_v51, %v2321_v40 }
 0x3b1   : > { %v2413_v3 = vadd.f32 %v2386_v39, %v2133_v14  ;;  %v2193_v15 = vpop.f32.mrf.mxu0  ;;  %v2135_v39 = vld [vmem:[#allocation3 + $0x60] sm:$0xff] }
 0x3b2   : > { %v2258_v56 = vpop.f32.mrf.mxu1  ;;  %v2448_v25 = vld [vmem:[#allocation3 + $0x48] sm:$0xff] }
 0x3b3   : > { %v2259_v6 = vadd.f32 %v2258_v56, %v2193_v15  ;;  %2430 = vst.msk [vmem:[#allocation3 + $0x50] sm:$0xff] %vm554_vm0, %v2413_v3  ;;  %v2465_v44 = vmul.f32 %v5076_v17, %v2448_v25 }
 0x3b4   : > { %v2323_v5 = vpop.f32.mrf.mxu2 }
 0x3b5   : > { %v2388_v59 = vpop.f32.mrf.mxu3  ;;  %v2324_v16 = vadd.f32 %v2323_v5, %v2259_v6  ;;  %3206 = vmatmul.msk.f32.gmra.mxu0 %vm554_vm0, %v2465_v44  ;;  %3222 = vmatmul.msk.f32.gmra.mxu1 %vm554_vm0, %v2465_v44 }
 0x3b6   : > { %3238 = vmatmul.msk.f32.gmra.mxu2 %vm554_vm0, %v2465_v44  ;;  %3254 = vmatmul.msk.f32.gmra.mxu3 %vm554_vm0, %v2465_v44 }
 0x3b7   : > { %v2389_v57 = vadd.f32 %v2388_v59, %v2324_v16 }
 0x3b9   : > { %v2414_v4 = vadd.f32 %v2389_v57, %v2134_v54  ;;  %v2196_v37 = vpop.f32.mrf.mxu0  ;;  %v2136_v57 = vld [vmem:[#allocation3 + $0x68] sm:$0xff] }
 0x3ba   : > { %v2261_v55 = vpop.f32.mrf.mxu1  ;;  %v2449_v2 = vld [vmem:[#allocation3 + $0x50] sm:$0xff] }
 0x3bb   : > { %v2262_v45 = vadd.f32 %v2261_v55, %v2196_v37  ;;  %2431 = vst.msk [vmem:[#allocation3 + $0x58] sm:$0xff] %vm554_vm0, %v2414_v4  ;;  %v2466_v32 = vmul.f32 %v5076_v17, %v2449_v2 }
 0x3bc   : > { %v2326_v51 = vpop.f32.mrf.mxu2 }
 0x3bd   : > { %v2391_v40 = vpop.f32.mrf.mxu3  ;;  %v2327_v14 = vadd.f32 %v2326_v51, %v2262_v45  ;;  %3207 = vmatmul.msk.f32.gmra.mxu0 %vm554_vm0, %v2466_v32  ;;  %3223 = vmatmul.msk.f32.gmra.mxu1 %vm554_vm0, %v2466_v32 }
 0x3be   : > { %3239 = vmatmul.msk.f32.gmra.mxu2 %vm554_vm0, %v2466_v32  ;;  %3255 = vmatmul.msk.f32.gmra.mxu3 %vm554_vm0, %v2466_v32 }
 0x3bf   : > { %v2392_v3 = vadd.f32 %v2391_v40, %v2327_v14 }
 0x3c1   : > { %v2415_v15 = vadd.f32 %v2392_v3, %v2135_v39  ;;  %v2199_v56 = vpop.f32.mrf.mxu0  ;;  %v2137_v3 = vld [vmem:[#allocation3 + $0x70] sm:$0xff] }
 0x3c2   : > { %v2264_v6 = vpop.f32.mrf.mxu1  ;;  %v2450_v44 = vld [vmem:[#allocation3 + $0x58] sm:$0xff] }
 0x3c3   : > { %v2265_v25 = vadd.f32 %v2264_v6, %v2199_v56  ;;  %2432 = vst.msk [vmem:[#allocation3 + $0x60] sm:$0xff] %vm554_vm0, %v2415_v15  ;;  %v2467_v5 = vmul.f32 %v5076_v17, %v2450_v44 }
 0x3c4   : > { %v2329_v59 = vpop.f32.mrf.mxu2 }
 0x3c5   : > { %v2394_v16 = vpop.f32.mrf.mxu3  ;;  %v2330_v54 = vadd.f32 %v2329_v59, %v2265_v25  ;;  %3208 = vmatmul.msk.f32.gmra.mxu0 %vm554_vm0, %v2467_v5  ;;  %3224 = vmatmul.msk.f32.gmra.mxu1 %vm554_vm0, %v2467_v5 }
 0x3c6   : > { %3240 = vmatmul.msk.f32.gmra.mxu2 %vm554_vm0, %v2467_v5  ;;  %3256 = vmatmul.msk.f32.gmra.mxu3 %vm554_vm0, %v2467_v5 }
 0x3c7   : > { %v2395_v4 = vadd.f32 %v2394_v16, %v2330_v54 }
 0x3c9   : > { %v2416_v37 = vadd.f32 %v2395_v4, %v2136_v57  ;;  %v2202_v55 = vpop.f32.mrf.mxu0  ;;  %v2138_v4 = vld [vmem:[#allocation3 + $0x78] sm:$0xff] }
 0x3ca   : > { %v2267_v45 = vpop.f32.mrf.mxu1  ;;  %v2451_v32 = vld [vmem:[#allocation3 + $0x60] sm:$0xff] }
 0x3cb   : > { %v2268_v2 = vadd.f32 %v2267_v45, %v2202_v55  ;;  %2433 = vst.msk [vmem:[#allocation3 + $0x68] sm:$0xff] %vm554_vm0, %v2416_v37  ;;  %v2468_v51 = vmul.f32 %v5076_v17, %v2451_v32 }
 0x3cc   : > { %v2332_v40 = vpop.f32.mrf.mxu2 }
 0x3cd   : > { %v2397_v14 = vpop.f32.mrf.mxu3  ;;  %v2333_v39 = vadd.f32 %v2332_v40, %v2268_v2  ;;  %3209 = vmatmul.msk.f32.gmra.mxu0 %vm554_vm0, %v2468_v51  ;;  %3225 = vmatmul.msk.f32.gmra.mxu1 %vm554_vm0, %v2468_v51 }
 0x3ce   : > { %3241 = vmatmul.msk.f32.gmra.mxu2 %vm554_vm0, %v2468_v51  ;;  %3257 = vmatmul.msk.f32.gmra.mxu3 %vm554_vm0, %v2468_v51  ;;  %v480_v51 = vld [vmem:[#allocation12] sm:$0xf] }
 0x3cf   : > { %v2398_v15 = vadd.f32 %v2397_v14, %v2333_v39  ;;  %v5171_v14 = vperm.slane %v480_v51, 0  ;;  %v5173_v39 = vperm.slane %v480_v51, 1 }
 0x3d1   : > { %v2417_v56 = vadd.f32 %v2398_v15, %v2137_v3  ;;  %v2205_v6 = vpop.f32.mrf.mxu0  ;;  %v5667_v3 = vld [vmem:[#allocation47_spill] sm:$0xff] }
 0x3d2   : > { %v2270_v25 = vpop.f32.mrf.mxu1  ;;  %v2452_v5 = vld [vmem:[#allocation3 + $0x68] sm:$0xff]  ;;  %v1995_v15 = vadd.f32 %v5667_v3, %v5171_v14 }
 0x3d3   : > { %v2271_v44 = vadd.f32 %v2270_v25, %v2205_v6  ;;  %2434 = vst.msk [vmem:[#allocation3 + $0x70] sm:$0xff] %vm554_vm0, %v2417_v56  ;;  %v2469_v59 = vmul.f32 %v5076_v17, %v2452_v5  ;;  %v5668_v56 = vld [vmem:[#allocation40_spill] sm:$0xff] }
 0x3d4   : > { %v2335_v16 = vpop.f32.mrf.mxu2  ;;  %v1996_v6 = vadd.f32 %v5668_v56, %v5173_v39 }
 0x3d5   : > { %v2400_v54 = vpop.f32.mrf.mxu3  ;;  %v2336_v57 = vadd.f32 %v2335_v16, %v2271_v44  ;;  %3210 = vmatmul.msk.f32.gmra.mxu0 %vm554_vm0, %v2469_v59  ;;  %3226 = vmatmul.msk.f32.gmra.mxu1 %vm554_vm0, %v2469_v59  ;;  %v5183_v16 = vperm.slane %v480_v51, 3 }
 0x3d6   : > { %3242 = vmatmul.msk.f32.gmra.mxu2 %vm554_vm0, %v2469_v59  ;;  %3258 = vmatmul.msk.f32.gmra.mxu3 %vm554_vm0, %v2469_v59  ;;  %v5181_v59 = vperm.slane %v480_v51, 2 }
 0x3d7   : > { %v2401_v37 = vadd.f32 %v2400_v54, %v2336_v57  ;;  %v5669_v54 = vld [vmem:[#allocation85_spill] sm:$0xff] }
 0x3d8   : > { %v1997_v57 = vadd.f32 %v5669_v54, %v5181_v59 }
 0x3d9   : > { %v2418_v55 = vadd.f32 %v2401_v37, %v2138_v4  ;;  %v1998_v4 = vadd.f32 %v4918_v20, %v5183_v16  ;;  %v5672_v20 = vld [vmem:[#allocation86_spill] sm:$0xff] }
 0x3da   : > { %v2453_v45 = vld [vmem:[#allocation3 + $0x70] sm:$0xff] }
 0x3db   : > { %2435 = vst.msk [vmem:[#allocation3 + $0x78] sm:$0xff] %vm554_vm0, %v2418_v55  ;;  %v2470_v2 = vmul.f32 %v5076_v17, %v2453_v45  ;;  %v5670_v45 = vld [vmem:[#allocation48_spill] sm:$0xff] }
 0x3dd   : > { %3211 = vmatmul.msk.f32.gmra.mxu0 %vm554_vm0, %v2470_v2  ;;  %3227 = vmatmul.msk.f32.gmra.mxu1 %vm554_vm0, %v2470_v2 }
 0x3de   : > { %3243 = vmatmul.msk.f32.gmra.mxu2 %vm554_vm0, %v2470_v2  ;;  %3259 = vmatmul.msk.f32.gmra.mxu3 %vm554_vm0, %v2470_v2  ;;  %v1999_v2 = vadd.f32 %v5670_v45, %v5171_v14 }
 0x3e2   : > { %v2454_v32 = vld [vmem:[#allocation3 + $0x78] sm:$0xff] }
 0x3e3   : > { %v2471_v40 = vmul.f32 %v5076_v17, %v2454_v32  ;;  %v5671_v32 = vld [vmem:[#allocation41_spill] sm:$0xff] }
 0x3e4   : > { %v2000_v51 = vadd.f32 %v5671_v32, %v5173_v39 }
 0x3e5   : > { %3212 = vmatmul.msk.f32.gmra.mxu0 %vm554_vm0, %v2471_v40  ;;  %3228 = vmatmul.msk.f32.gmra.mxu1 %vm554_vm0, %v2471_v40 }
 0x3e6   : > { %3244 = vmatmul.msk.f32.gmra.mxu2 %vm554_vm0, %v2471_v40  ;;  %3260 = vmatmul.msk.f32.gmra.mxu3 %vm554_vm0, %v2471_v40 }
 0x3ea   : > { %v2541_v25 = vpop.f32.mrf.mxu0  ;;  %v2606_v17 = vpop.f32.mrf.mxu1 }
 0x3eb   : > { %v2848_v44 = vadd.f32 %v2541_v25, %v1995_v15  ;;  %v2849_v5 = vadd.f32 %v2606_v17, %v1996_v6  ;;  %v2001_v17 = vadd.f32 %v5672_v20, %v5181_v59  ;;  %v5676_v20 = vld [vmem:[#allocation50_spill] sm:$0xff] }
 0x3ed   : > { %2912 = vst [vmem:[%s5187_s22] sm:$0xff] %v2848_v44  ;;  %v2002_v44 = vadd.f32 %v4924_v24, %v5183_v16  ;;  %v5675_v24 = vld [vmem:[#allocation87_spill] sm:$0xff] }
 0x3ee   : > { %2913 = vst [vmem:[%s5187_s22 + $0x8] sm:$0xff] %v2849_v5 }
 0x3f1   : > { %v2671_v37 = vpop.f32.mrf.mxu2  ;;  %v2736_v55 = vpop.f32.mrf.mxu3 }
 0x3f2   : > { %v2850_v40 = vadd.f32 %v2671_v37, %v1997_v57  ;;  %v2851_v3 = vadd.f32 %v2736_v55, %v1998_v4  ;;  %v2544_v15 = vpop.f32.mrf.mxu0  ;;  %v2609_v56 = vpop.f32.mrf.mxu1  ;;  %v5673_v57 = vld [vmem:[#allocation49_spill] sm:$0xff]  ;;  %v5674_v37 = vld [vmem:[#allocation42_spill] sm:$0xff] }
 0x3f3   : > { %v2852_v6 = vadd.f32 %v2544_v15, %v1999_v2  ;;  %v2853_v25 = vadd.f32 %v2609_v56, %v2000_v51  ;;  %v2003_v4 = vadd.f32 %v5673_v57, %v5171_v14  ;;  %v2004_v55 = vadd.f32 %v5674_v37, %v5173_v39 }
 0x3f4   : > { %2914 = vst [vmem:[%s5187_s22 + $0x10] sm:$0xff] %v2850_v40  ;;  %v2005_v15 = vadd.f32 %v5675_v24, %v5181_v59  ;;  %v2006_v56 = vadd.f32 %v4930_v22, %v5183_v16  ;;  %v5678_v22 = vld [vmem:[#allocation88_spill] sm:$0xff] }
 0x3f5   : > { %2915 = vst [vmem:[%s5187_s22 + $0x18] sm:$0xff] %v2851_v3 }
 0x3f6   : > { %2916 = vst [vmem:[%s5187_s22 + $0x20] sm:$0xff] %v2852_v6 }
 0x3f7   : > { %2917 = vst [vmem:[%s5187_s22 + $0x28] sm:$0xff] %v2853_v25 }
 0x3f9   : > { %v2674_v5 = vpop.f32.mrf.mxu2  ;;  %v2739_v54 = vpop.f32.mrf.mxu3 }
 0x3fa   : > { %v2854_v45 = vadd.f32 %v2674_v5, %v2001_v17  ;;  %v2855_v2 = vadd.f32 %v2739_v54, %v2002_v44  ;;  %v2547_v32 = vpop.f32.mrf.mxu0  ;;  %v2612_v51 = vpop.f32.mrf.mxu1  ;;  %v2007_v17 = vadd.f32 %v5676_v20, %v5171_v14  ;;  %v5677_v44 = vld [vmem:[#allocation43_spill] sm:$0xff] }
 0x3fb   : > { %v2856_v40 = vadd.f32 %v2547_v32, %v2003_v4  ;;  %v2857_v3 = vadd.f32 %v2612_v51, %v2004_v55  ;;  %v2008_v5 = vadd.f32 %v5677_v44, %v5173_v39  ;;  %v2010_v32 = vadd.f32 %v4936_v30, %v5183_v16  ;;  %v5681_v30 = vld [vmem:[#allocation89_spill] sm:$0xff] }
 0x3fc   : > { %2918 = vst [vmem:[%s5187_s22 + $0x30] sm:$0xff] %v2854_v45 }
 0x3fd   : > { %2919 = vst [vmem:[%s5187_s22 + $0x38] sm:$0xff] %v2855_v2  ;;  %v2009_v2 = vadd.f32 %v5678_v22, %v5181_v59  ;;  %v5683_v22 = vld [vmem:[#allocation45_spill] sm:$0xff] }
 0x3fe   : > { %2920 = vst [vmem:[%s5187_s22 + $0x40] sm:$0xff] %v2856_v40 }
 0x3ff   : > { %2921 = vst [vmem:[%s5187_s22 + $0x48] sm:$0xff] %v2857_v3  ;;  %v5679_v3 = vld [vmem:[#allocation51_spill] sm:$0xff] }
 0x400   : > { %v2011_v24 = vadd.f32 %v5679_v3, %v5171_v14 }
 0x401   : > { %v2677_v6 = vpop.f32.mrf.mxu2  ;;  %v2742_v25 = vpop.f32.mrf.mxu3 }
 0x402   : > { %v2858_v54 = vadd.f32 %v2677_v6, %v2005_v15  ;;  %v2859_v57 = vadd.f32 %v2742_v25, %v2006_v56  ;;  %v2550_v4 = vpop.f32.mrf.mxu0  ;;  %v2615_v37 = vpop.f32.mrf.mxu1  ;;  %v5680_v15 = vld [vmem:[#allocation44_spill] sm:$0xff] }
 0x403   : > { %v2860_v55 = vadd.f32 %v2550_v4, %v2007_v17  ;;  %v2861_v45 = vadd.f32 %v2615_v37, %v2008_v5  ;;  %v2012_v56 = vadd.f32 %v5680_v15, %v5173_v39 }
 0x404   : > { %2922 = vst [vmem:[%s5187_s22 + $0x50] sm:$0xff] %v2858_v54  ;;  %v2013_v54 = vadd.f32 %v5681_v30, %v5181_v59 }
 0x405   : > { %2923 = vst [vmem:[%s5187_s22 + $0x58] sm:$0xff] %v2859_v57  ;;  %v2014_v57 = vadd.f32 %v4942_v21, %v5183_v16  ;;  %v5684_v21 = vld [vmem:[#allocation90_spill] sm:$0xff] }
 0x406   : > { %2924 = vst [vmem:[%s5187_s22 + $0x60] sm:$0xff] %v2860_v55  ;;  %v5682_v55 = vld [vmem:[#allocation52_spill] sm:$0xff] }
 0x407   : > { %2925 = vst [vmem:[%s5187_s22 + $0x68] sm:$0xff] %v2861_v45  ;;  %v2015_v45 = vadd.f32 %v5682_v55, %v5171_v14 }
 0x409   : > { %v2680_v51 = vpop.f32.mrf.mxu2  ;;  %v2745_v40 = vpop.f32.mrf.mxu3 }
 0x40a   : > { %v2862_v6 = vadd.f32 %v2680_v51, %v2009_v2  ;;  %v2863_v25 = vadd.f32 %v2745_v40, %v2010_v32  ;;  %v2553_v20 = vpop.f32.mrf.mxu0  ;;  %v2618_v17 = vpop.f32.mrf.mxu1  ;;  %v2016_v2 = vadd.f32 %v5683_v22, %v5173_v39 }
 0x40b   : > { %v2864_v44 = vadd.f32 %v2553_v20, %v2011_v24  ;;  %v2865_v5 = vadd.f32 %v2618_v17, %v2012_v56  ;;  %v2017_v56 = vadd.f32 %v5684_v21, %v5181_v59  ;;  %v5685_v17 = vld [vmem:[#allocation53_spill] sm:$0xff] }
 0x40c   : > { %2926 = vst [vmem:[%s5187_s22 + $0x70] sm:$0xff] %v2862_v6  ;;  %v2018_v6 = vadd.f32 %v4948_v29, %v5183_v16  ;;  %v5687_v29 = vld [vmem:[#allocation91_spill] sm:$0xff] }
 0x40d   : > { %2927 = vst [vmem:[%s5187_s22 + $0x78] sm:$0xff] %v2863_v25  ;;  %v2021_v22 = vadd.f32 %v5687_v29, %v5181_v59 }
 0x40e   : > { %2928 = vst [vmem:[%s5187_s22 + $0x80] sm:$0xff] %v2864_v44  ;;  %v2019_v44 = vadd.f32 %v5685_v17, %v5171_v14 }
 0x40f   : > { %2929 = vst [vmem:[%s5187_s22 + $0x88] sm:$0xff] %v2865_v5  ;;  %v5686_v5 = vld [vmem:[#allocation46_spill] sm:$0xff] }
 0x410   : > { %v2020_v30 = vadd.f32 %v5686_v5, %v5173_v39  ;;  %v5690_v5 = vld [vmem:[#allocation92_spill] sm:$0xff] }
 0x411   : > { %v2683_v4 = vpop.f32.mrf.mxu2  ;;  %v2748_v37 = vpop.f32.mrf.mxu3 }
 0x412   : > { %v2866_v32 = vadd.f32 %v2683_v4, %v2013_v54  ;;  %v2867_v51 = vadd.f32 %v2748_v37, %v2014_v57  ;;  %v2556_v40 = vpop.f32.mrf.mxu0  ;;  %v2621_v3 = vpop.f32.mrf.mxu1 }
 0x413   : > { %v2868_v24 = vadd.f32 %v2556_v40, %v2015_v45  ;;  %v2869_v15 = vadd.f32 %v2621_v3, %v2016_v2  ;;  %v2022_v2 = vadd.f32 %v4954_v50, %v5183_v16  ;;  %v5688_v40 = vld [vmem:[#allocation54_spill] sm:$0xff] }
 0x414   : > { %2930 = vst [vmem:[%s5187_s22 + $0x90] sm:$0xff] %v2866_v32  ;;  %v2023_v3 = vadd.f32 %v5688_v40, %v5171_v14 }
 0x415   : > { %2931 = vst [vmem:[%s5187_s22 + $0x98] sm:$0xff] %v2867_v51 }
 0x416   : > { %2932 = vst [vmem:[%s5187_s22 + $0xa0] sm:$0xff] %v2868_v24  ;;  %v5689_v24 = vld [vmem:[#allocation60_spill] sm:$0xff] }
 0x417   : > { %2933 = vst [vmem:[%s5187_s22 + $0xa8] sm:$0xff] %v2869_v15  ;;  %v2024_v15 = vadd.f32 %v5689_v24, %v5173_v39 }
 0x419   : > { %v2686_v25 = vpop.f32.mrf.mxu2  ;;  %v2751_v20 = vpop.f32.mrf.mxu3 }
 0x41a   : > { %v2870_v54 = vadd.f32 %v2686_v25, %v2017_v56  ;;  %v2871_v57 = vadd.f32 %v2751_v20, %v2018_v6  ;;  %v2559_v4 = vpop.f32.mrf.mxu0  ;;  %v2624_v37 = vpop.f32.mrf.mxu1 }
 0x41b   : > { %v2872_v55 = vadd.f32 %v2559_v4, %v2019_v44  ;;  %v2873_v45 = vadd.f32 %v2624_v37, %v2020_v30  ;;  %v1842_v44 = vadd.f32 %v4965_v34, %v4963_v42  ;;  %v2025_v30 = vadd.f32 %v5690_v5, %v5181_v59  ;;  %v5691_v42 = vld [vmem:[#allocation55_spill] sm:$0xff]  ;;  %v5692_v37 = vld [vmem:[#allocation61_spill] sm:$0xff] }
 0x41c   : > { %2934 = vst [vmem:[%s5187_s22 + $0xb0] sm:$0xff] %v2870_v54  ;;  %v2026_v54 = vadd.f32 %v4960_v27, %v5183_v16  ;;  %v2027_v34 = vadd.f32 %v5691_v42, %v5171_v14  ;;  %v1845_v27 = vadd.f32 %v4977_v9, %v4975_v53  ;;  %v5695_v9 = vld [vmem:[#allocation62_spill] sm:$0xff] }
 0x41d   : > { %2935 = vst [vmem:[%s5187_s22 + $0xb8] sm:$0xff] %v2871_v57  ;;  %v1907_v50 = vadd.f32 %v4968_v33, %v1842_v44 }
 0x41e   : > { %2936 = vst [vmem:[%s5187_s22 + $0xc0] sm:$0xff] %v2872_v55  ;;  %v2028_v55 = vadd.f32 %v5692_v37, %v5173_v39  ;;  %v1910_v40 = vadd.f32 %v4980_v1, %v1845_v27  ;;  %v5697_v37 = vld [vmem:[#allocation57_spill] sm:$0xff] }
 0x41f   : > { %2937 = vst [vmem:[%s5187_s22 + $0xc8] sm:$0xff] %v2873_v45 }
 0x420   : > { %v1975_v5 = vadd.f32 %v4984_v18, %v1910_v40  ;;  %v5699_v40 = vld [vmem:[#allocation95_spill] sm:$0xff] }
 0x421   : > { %v2689_v32 = vpop.f32.mrf.mxu2  ;;  %v2754_v51 = vpop.f32.mrf.mxu3 }
 0x422   : > { %v2874_v21 = vadd.f32 %v2689_v32, %v2021_v22  ;;  %v2875_v56 = vadd.f32 %v2754_v51, %v2022_v2  ;;  %v2562_v6 = vpop.f32.mrf.mxu0  ;;  %v2627_v25 = vpop.f32.mrf.mxu1  ;;  %v1972_v51 = vadd.f32 %v4972_v35, %v1907_v50  ;;  %v2034_v42 = vadd.f32 %v1975_v5, %v5183_v16 }
 0x423   : > { %v2876_v20 = vadd.f32 %v2562_v6, %v2023_v3  ;;  %v2877_v17 = vadd.f32 %v2627_v25, %v2024_v15  ;;  %v5693_v3 = vld [vmem:[#allocation93_spill] sm:$0xff]  ;;  %v2032_v6 = vadd.f32 %v5695_v9, %v5173_v39 }
 0x424   : > { %2938 = vst [vmem:[%s5187_s22 + $0xd0] sm:$0xff] %v2874_v21  ;;  %v2029_v24 = vadd.f32 %v5693_v3, %v5181_v59  ;;  %v2030_v15 = vadd.f32 %v1972_v51, %v5183_v16  ;;  %v1851_v51 = vadd.f32 %v5001_v28, %v4999_v8  ;;  %v2037_v3 = vadd.f32 %v5699_v40, %v5181_v59  ;;  %v5701_v28 = vld [vmem:[#allocation66_spill] sm:$0xff] }
 0x425   : > { %2939 = vst [vmem:[%s5187_s22 + $0xd8] sm:$0xff] %v2875_v56  ;;  %v5694_v56 = vld [vmem:[#allocation56_spill] sm:$0xff] }
 0x426   : > { %2940 = vst [vmem:[%s5187_s22 + $0xe0] sm:$0xff] %v2876_v20  ;;  %v2031_v53 = vadd.f32 %v5694_v56, %v5171_v14  ;;  %v1916_v27 = vadd.f32 %v5004_v41, %v1851_v51 }
 0x427   : > { %2941 = vst [vmem:[%s5187_s22 + $0xe8] sm:$0xff] %v2877_v17 }
 0x429   : > { %v2692_v57 = vpop.f32.mrf.mxu2  ;;  %v2757_v4 = vpop.f32.mrf.mxu3 }
 0x42a   : > { %v2878_v45 = vadd.f32 %v2692_v57, %v2025_v30  ;;  %v2879_v29 = vadd.f32 %v2757_v4, %v2026_v54  ;;  %v2565_v33 = vpop.f32.mrf.mxu0  ;;  %v2630_v22 = vpop.f32.mrf.mxu1  ;;  %v1848_v30 = vadd.f32 %v4989_v13, %v4987_v10  ;;  %v5696_v57 = vld [vmem:[#allocation94_spill] sm:$0xff]  ;;  %v2035_v10 = vadd.f32 %v5697_v37, %v5171_v14  ;;  %v5698_v13 = vld [vmem:[#allocation63_spill] sm:$0xff] }
 0x42b   : > { %v2880_v2 = vadd.f32 %v2565_v33, %v2027_v34  ;;  %v2881_v32 = vadd.f32 %v2630_v22, %v2028_v55  ;;  %v2033_v4 = vadd.f32 %v5696_v57, %v5181_v59  ;;  %v2036_v55 = vadd.f32 %v5698_v13, %v5173_v39 }
 0x42c   : > { %2942 = vst [vmem:[%s5187_s22 + $0xf0] sm:$0xff] %v2878_v45  ;;  %v1913_v54 = vadd.f32 %v4992_v19, %v1848_v30  ;;  %v1857_v13 = vadd.f32 %v5033_v7, %v5031_v52  ;;  %v5707_v7 = vld [vmem:[#allocation75_spill] sm:$0xff] }
 0x42d   : > { %2943 = vst [vmem:[%s5187_s22 + $0xf8] sm:$0xff] %v2879_v29 }
 0x42e   : > { %2944 = vst [vmem:[%s5187_s22 + $0x100] sm:$0xff] %v2880_v2 }
 0x42f   : > { %2945 = vst [vmem:[%s5187_s22 + $0x108] sm:$0xff] %v2881_v32  ;;  %v1978_v32 = vadd.f32 %v4996_v36, %v1913_v54  ;;  %v5703_v54 = vld [vmem:[#allocation59_spill] sm:$0xff] }
 0x431   : > { %v2695_v21 = vpop.f32.mrf.mxu2  ;;  %v2760_v35 = vpop.f32.mrf.mxu3 }
 0x432   : > { %v2882_v25 = vadd.f32 %v2695_v21, %v2029_v24  ;;  %v2883_v20 = vadd.f32 %v2760_v35, %v2030_v15  ;;  %v2568_v17 = vpop.f32.mrf.mxu0  ;;  %v2633_v1 = vpop.f32.mrf.mxu1  ;;  %v2038_v24 = vadd.f32 %v1978_v32, %v5183_v16  ;;  %v5700_v21 = vld [vmem:[#allocation58_spill] sm:$0xff]  ;;  %v2040_v35 = vadd.f32 %v5701_v28, %v5173_v39 }
 0x433   : > { %v2884_v44 = vadd.f32 %v2568_v17, %v2031_v53  ;;  %v2885_v50 = vadd.f32 %v2633_v1, %v2032_v6  ;;  %v2039_v8 = vadd.f32 %v5700_v21, %v5171_v14  ;;  %v1854_v17 = vadd.f32 %v5013_v46, %v5011_v60  ;;  %v5704_v46 = vld [vmem:[#allocation70_spill] sm:$0xff] }
 0x434   : > { %2946 = vst [vmem:[%s5187_s22 + $0x110] sm:$0xff] %v2882_v25  ;;  %v2043_v60 = vadd.f32 %v5703_v54, %v5171_v14  ;;  %v2044_v57 = vadd.f32 %v5704_v46, %v5173_v39  ;;  %v5708_v21 = vld [vmem:[#allocation98_spill] sm:$0xff] }
 0x435   : > { %2947 = vst [vmem:[%s5187_s22 + $0x118] sm:$0xff] %v2883_v20  ;;  %v1981_v20 = vadd.f32 %v5008_v58, %v1916_v27  ;;  %v1919_v1 = vadd.f32 %v5019_v0, %v1854_v17 }
 0x436   : > { %2948 = vst [vmem:[%s5187_s22 + $0x120] sm:$0xff] %v2884_v44  ;;  %v5702_v44 = vld [vmem:[#allocation96_spill] sm:$0xff] }
 0x437   : > { %2949 = vst [vmem:[%s5187_s22 + $0x128] sm:$0xff] %v2885_v50  ;;  %v2041_v50 = vadd.f32 %v5702_v44, %v5181_v59  ;;  %v2042_v5 = vadd.f32 %v1981_v20, %v5183_v16 }
 0x439   : > { %v2698_v34 = vpop.f32.mrf.mxu2  ;;  %v2763_v18 = vpop.f32.mrf.mxu3 }
 0x43a   : > { %v2886_v45 = vadd.f32 %v2698_v34, %v2033_v4  ;;  %v2887_v29 = vadd.f32 %v2763_v18, %v2034_v42  ;;  %v2571_v33 = vpop.f32.mrf.mxu0  ;;  %v2636_v19 = vpop.f32.mrf.mxu1 }
 0x43b   : > { %v2888_v22 = vadd.f32 %v2571_v33, %v2035_v10  ;;  %v2889_v2 = vadd.f32 %v2636_v19, %v2036_v55  ;;  %v1984_v10 = vadd.f32 %v5023_v47, %v1919_v1  ;;  %v1922_v55 = vadd.f32 %v5039_v63, %v1857_v13 }
 0x43c   : > { %2950 = vst [vmem:[%s5187_s22 + $0x130] sm:$0xff] %v2886_v45  ;;  %v5705_v45 = vld [vmem:[#allocation97_spill] sm:$0xff]  ;;  %v1863_v1 = vadd.f32 %v5065_v49, %v5063_v43  ;;  %v5712_v49 = vld [vmem:[#allocation84_spill] sm:$0xff] }
 0x43d   : > { %2951 = vst [vmem:[%s5187_s22 + $0x138] sm:$0xff] %v2887_v29  ;;  %v2045_v29 = vadd.f32 %v5705_v45, %v5181_v59  ;;  %v2046_v33 = vadd.f32 %v1984_v10, %v5183_v16  ;;  %v2056_v54 = vadd.f32 %v5712_v49, %v5173_v39 }
 0x43e   : > { %2952 = vst [vmem:[%s5187_s22 + $0x140] sm:$0xff] %v2888_v22  ;;  %v5706_v22 = vld [vmem:[#allocation37_spill] sm:$0xff]  ;;  %v1928_v44 = vadd.f32 %v5068_v23, %v1863_v1 }
 0x43f   : > { %2953 = vst [vmem:[%s5187_s22 + $0x148] sm:$0xff] %v2889_v2  ;;  %v2047_v52 = vadd.f32 %v5706_v22, %v5171_v14  ;;  %v2048_v2 = vadd.f32 %v5707_v7, %v5173_v39 }
 0x441   : > { %v2701_v15 = vpop.f32.mrf.mxu2  ;;  %v2766_v36 = vpop.f32.mrf.mxu3 }
 0x442   : > { %v2890_v56 = vadd.f32 %v2701_v15, %v2037_v3  ;;  %v2891_v53 = vadd.f32 %v2766_v36, %v2038_v24  ;;  %v2574_v9 = vpop.f32.mrf.mxu0  ;;  %v2639_v41 = vpop.f32.mrf.mxu1  ;;  %v1987_v24 = vadd.f32 %v5043_v61, %v1922_v55  ;;  %v1860_v15 = vadd.f32 %v5053_v26, %v5051_v11  ;;  %v5710_v26 = vld [vmem:[#allocation80_spill] sm:$0xff] }
 0x443   : > { %v2892_v6 = vadd.f32 %v2574_v9, %v2039_v8  ;;  %v2893_v25 = vadd.f32 %v2639_v41, %v2040_v35  ;;  %v2049_v8 = vadd.f32 %v5708_v21, %v5181_v59 }
 0x444   : > { %2954 = vst [vmem:[%s5187_s22 + $0x150] sm:$0xff] %v2890_v56  ;;  %v1925_v36 = vadd.f32 %v5056_v38, %v1860_v15  ;;  %v2050_v28 = vadd.f32 %v1987_v24, %v5183_v16  ;;  %v5709_v56 = vld [vmem:[#allocation38_spill] sm:$0xff] }
 0x445   : > { %2955 = vst [vmem:[%s5187_s22 + $0x158] sm:$0xff] %v2891_v53  ;;  %v2051_v11 = vadd.f32 %v5709_v56, %v5171_v14  ;;  %v2052_v53 = vadd.f32 %v5710_v26, %v5173_v39 }
 0x446   : > { %2956 = vst [vmem:[%s5187_s22 + $0x160] sm:$0xff] %v2892_v6  ;;  %v1990_v17 = vadd.f32 %v5060_v31, %v1925_v36 }
 0x447   : > { %2957 = vst [vmem:[%s5187_s22 + $0x168] sm:$0xff] %v2893_v25 }
 0x449   : > { %v2704_v30 = vpop.f32.mrf.mxu2  ;;  %v2769_v58 = vpop.f32.mrf.mxu3 }
 0x44a   : > { %v2894_v4 = vadd.f32 %v2704_v30, %v2041_v50  ;;  %v2895_v42 = vadd.f32 %v2769_v58, %v2042_v5  ;;  %v2577_v34 = vpop.f32.mrf.mxu0  ;;  %v2642_v0 = vpop.f32.mrf.mxu1  ;;  %v2053_v50 = vadd.f32 %v4904_v12, %v5181_v59  ;;  %v2054_v5 = vadd.f32 %v1990_v17, %v5183_v16  ;;  %v5711_v58 = vld [vmem:[#allocation39_spill] sm:$0xff] }
 0x44b   : > { %v2896_v18 = vadd.f32 %v2577_v34, %v2043_v60  ;;  %v2897_v37 = vadd.f32 %v2642_v0, %v2044_v57  ;;  %v2055_v43 = vadd.f32 %v5711_v58, %v5171_v14  ;;  %v2057_v14 = vadd.f32 %v4912_v48, %v5181_v59 }
 0x44c   : > { %2958 = vst [vmem:[%s5187_s22 + $0x170] sm:$0xff] %v2894_v4 }
 0x44d   : > { %2959 = vst [vmem:[%s5187_s22 + $0x178] sm:$0xff] %v2895_v42  ;;  %v1993_v42 = vadd.f32 %v5072_v62, %v1928_v44 }
 0x44e   : > { %2960 = vst [vmem:[%s5187_s22 + $0x180] sm:$0xff] %v2896_v18 }
 0x44f   : > { %2961 = vst [vmem:[%s5187_s22 + $0x188] sm:$0xff] %v2897_v37  ;;  %v2058_v39 = vadd.f32 %v1993_v42, %v5183_v16 }
 0x451   : > { %v2707_v19 = vpop.f32.mrf.mxu2  ;;  %v2772_v47 = vpop.f32.mrf.mxu3 }
 0x452   : > { %v2898_v32 = vadd.f32 %v2707_v19, %v2045_v29  ;;  %v2899_v51 = vadd.f32 %v2772_v47, %v2046_v33  ;;  %v2580_v27 = vpop.f32.mrf.mxu0  ;;  %v2645_v63 = vpop.f32.mrf.mxu1 }
 0x453   : > { %v2900_v40 = vadd.f32 %v2580_v27, %v2047_v52  ;;  %v2901_v3 = vadd.f32 %v2645_v63, %v2048_v2 }
 0x454   : > { %2962 = vst [vmem:[%s5187_s22 + $0x190] sm:$0xff] %v2898_v32 }
 0x455   : > { %2963 = vst [vmem:[%s5187_s22 + $0x198] sm:$0xff] %v2899_v51 }
 0x456   : > { %2964 = vst [vmem:[%s5187_s22 + $0x1a0] sm:$0xff] %v2900_v40 }
 0x457   : > { %2965 = vst [vmem:[%s5187_s22 + $0x1a8] sm:$0xff] %v2901_v3 }
 0x459   : > { %v2710_v35 = vpop.f32.mrf.mxu2  ;;  %v2775_v61 = vpop.f32.mrf.mxu3 }
 0x45a   : > { %v2902_v9 = vadd.f32 %v2710_v35, %v2049_v8  ;;  %v2903_v41 = vadd.f32 %v2775_v61, %v2050_v28  ;;  %v2583_v6 = vpop.f32.mrf.mxu0  ;;  %v2648_v38 = vpop.f32.mrf.mxu1 }
 0x45b   : > { %v2904_v25 = vadd.f32 %v2583_v6, %v2051_v11  ;;  %v2905_v20 = vadd.f32 %v2648_v38, %v2052_v53 }
 0x45c   : > { %2966 = vst [vmem:[%s5187_s22 + $0x1b0] sm:$0xff] %v2902_v9 }
 0x45d   : > { %2967 = vst [vmem:[%s5187_s22 + $0x1b8] sm:$0xff] %v2903_v41 }
 0x45e   : > { %2968 = vst [vmem:[%s5187_s22 + $0x1c0] sm:$0xff] %v2904_v25 }
 0x45f   : > { %2969 = vst [vmem:[%s5187_s22 + $0x1c8] sm:$0xff] %v2905_v20 }
 0x461   : > { %v2713_v30 = vpop.f32.mrf.mxu2  ;;  %v2778_v31 = vpop.f32.mrf.mxu3 }
 0x462   : > { %v2906_v60 = vadd.f32 %v2713_v30, %v2053_v50  ;;  %v2907_v23 = vadd.f32 %v2778_v31, %v2054_v5  ;;  %v2586_v46 = vpop.f32.mrf.mxu0  ;;  %v2651_v57 = vpop.f32.mrf.mxu1 }
 0x463   : > { %v2908_v12 = vadd.f32 %v2586_v46, %v2055_v43  ;;  %v2909_v4 = vadd.f32 %v2651_v57, %v2056_v54 }
 0x464   : > { %2970 = vst [vmem:[%s5187_s22 + $0x1d0] sm:$0xff] %v2906_v60 }
 0x465   : > { %2971 = vst [vmem:[%s5187_s22 + $0x1d8] sm:$0xff] %v2907_v23 }
 0x466   : > { %2972 = vst [vmem:[%s5187_s22 + $0x1e0] sm:$0xff] %v2908_v12 }
 0x467   : > { %2973 = vst [vmem:[%s5187_s22 + $0x1e8] sm:$0xff] %v2909_v4 }
 0x469   : > { %v2716_v62 = vpop.f32.mrf.mxu2  ;;  %v2781_v34 = vpop.f32.mrf.mxu3 }
 0x46a   : > { %v2910_v0 = vadd.f32 %v2716_v62, %v2057_v14  ;;  %v2911_v18 = vadd.f32 %v2781_v34, %v2058_v39 }
 0x46c   : > { %2974 = vst [vmem:[%s5187_s22 + $0x1f0] sm:$0xff] %v2910_v0 }
 0x46d   : > { %2975 = vst [vmem:[%s5187_s22 + $0x1f8] sm:$0xff] %v2911_v18 }
 0x46e   : > { %3706 = shalt.err (!%p3703_p6)
}
 0x46f   : > { %s3836_s19 = smov 512   ;;  %s3837_s5 = smov 32  }
 0x470   : > { %3295 = dma.vmem_to_hbm [thread:$0]  (%p4070_p11), %s2993_s21, 8192, %s2995_s28, %s2977_s25, %s3836_s19, %s3836_s19, %s3837_s5  }
 0x471 PF: > { %p3332_p13 = scmp.ge.s32.totalorder %s3827_s15, 2  ;;  %s3009_s3 = sand.u32 1, %s3807_s10  }
 0x472   : > { %p5714_p8 = scmp.ne.s32.totalorder %s5545_s1, 0  ;;  %s3010_s22 = scalar_lea.sflag [#allocation8], %s3009_s3 }
 0x474   : > { %p3322_p1 = pnand %p3332_p13, %p5714_p8 }
 0x476   : > { %p3323_p3 = pneg %p3322_p1 }
 0x478   : > { %3778 = dma.done.wait (%p3323_p3), %s3010_s22, 8192  }
 0x479   : > { %3780 = vsyncadd (%p3323_p3), %s3010_s22, 4294959104  ;;  %s36_s15 = sadd.s32 1, %s3827_s15   ;;  %s5715_s0 = sld [smem:[#allocation29_spill]] }
 0x47a   : > { %p33_p5 = scmp.ge.s32.totalorder %s36_s15, 5   ;;  %s5716_s18 = sld [smem:[#allocation36_spill]] }
 0x47b   : > { %s5717_s13 = sld [smem:[#allocation31_spill]]  ;;  %s5719_s28 = smov %s3787_s29 }
 0x47c   : > { %s5718_s14 = sld [smem:[#allocation33_spill]]  ;;  %s5720_s29 = smov %s3791_s30 }
 0x47d   : > { %s5721_s30 = smov %s4108_s4  ;;  %s5722_s8 = smov %s3803_s9 }
 0x47e   : > { %s5724_s10 = smov %s3811_s11  ;;  %s5725_s11 = smov %s3815_s12 }
 0x47f   : > { %s5726_s12 = smov %s4053_s17  ;;  %35 = sbr.rel (!%p33_p5) target bundleno = 25 (0x19), region = 136 }
 0x480   : > { %s5723_s9 = smov %s5716_s18 }
 0x484   :  { %3016 = vsyncpa [#allocation7], 1 }
 0x485   :  { %3018 = vsyncpa [#allocation7 + $0x1], 1 }
 0x486   :  { %3019 = vsyncpa [#allocation11], 1 }
 0x487   :  { %3020 = vsyncpa [#allocation14], 1 }
 0x488   :  { %3022 = vsyncpa [#allocation14 + $0x1], 1 }
 0x489   :  { %3023 = vsyncpa [#allocation8], 1 }
 0x48a   :  { %3025 = vsyncpa [#allocation8 + $0x1], 1 }
 0x48b   :  { %3026 = vsyncpa [#allocation9], 1 }
 0x48c   :  { %3028 = vsyncpa [#allocation9 + $0x1], 1 }

</bundles_post_ra>
